<compile_context>
chip_gen: v5e
topology: v5e:2x2
jax: 0.10.0
libtpu: 0.0.40
codegen_flags: <defaults>
</compile_context>

<pallas_src>
import jax
import jax.numpy as jnp
from jax.experimental import pallas as pl
from jax.experimental.pallas import tpu as pltpu

# ----------------------------- small config -----------------------------
IN_CHANNELS = 3
IMG_SIZE    = 16
PATCH_SIZE  = 8
EMB_DIM     = 128
N_ENCODER   = 2
N_HEAD      = 4
EXPANSION   = 4
NUM_CLASSES = 16
BATCH       = 2

N_PATCHES = (IMG_SIZE * IMG_SIZE) // (PATCH_SIZE ** 2)   # 4
SEQ       = N_PATCHES + 1                                # 5 (cls token)
PATCH_DIM = IN_CHANNELS * PATCH_SIZE * PATCH_SIZE        # 192
HEAD_DIM  = EMB_DIM // N_HEAD                            # 32
HIDDEN    = EXPANSION * EMB_DIM                          # 512
LN_EPS    = 1e-5
BS        = BATCH * SEQ                                  # 10 (batch folded)

N_LAYER_PARAMS = 12                                      # per encoder block


# ----------------------------- in-kernel helpers -----------------------------
def _layernorm(x, gamma, beta):
    mu = jnp.mean(x, axis=-1, keepdims=True)
    var = jnp.mean((x - mu) ** 2, axis=-1, keepdims=True)
    return (x - mu) * jax.lax.rsqrt(var + LN_EPS) * gamma + beta


# ----------------------------- fused kernel -----------------------------
def vit_kernel(patches_ref, emb_w_ref, emb_b_ref, cls_ref, pos_ref, *rest):
    n_lw = N_LAYER_PARAMS * N_ENCODER
    layer_refs = rest[:n_lw]
    ln_g_ref, ln_b_ref, head_w_ref, head_b_ref = rest[n_lw:n_lw + 4]
    logits_ref = rest[n_lw + 4]
    att_refs = rest[n_lw + 5:]                            # one per encoder layer

    # ---- image embedding: patch linear on all B*N_PATCHES rows at once ----
    emb = (jnp.dot(patches_ref[...], emb_w_ref[...],
                   preferred_element_type=jnp.float32) + emb_b_ref[...])  # (B*NP, E)
    pos = pos_ref[...]                                    # (SEQ, E)
    cls_pos = cls_ref[...] + pos[0:1, :]                  # (1, E)
    rows = []
    for b in range(BATCH):                                # prepend cls + add pos
        rows.append(cls_pos)
        rows.append(emb[b * N_PATCHES:(b + 1) * N_PATCHES, :] + pos[1:, :])
    x = jnp.concatenate(rows, axis=0)                     # (B*SEQ, E), batch folded

    scale = 1.0 / (HEAD_DIM ** 0.5)
    for layer in range(N_ENCODER):
        (g1, b1, wqkv, bqkv, wo, bo,
         g2, b2, w1, bb1, w2, bb2) = layer_refs[layer * N_LAYER_PARAMS:
                                                (layer + 1) * N_LAYER_PARAMS]
        att_ref = att_refs[layer]

        # --- multi-head self attention (pre-norm), batch folded into rows ---
        h = _layernorm(x, g1[...], b1[...])
        qkv = (jnp.dot(h, wqkv[...], preferred_element_type=jnp.float32)
               + bqkv[...])                               # (B*SEQ, 3E)
        wo_full = wo[...]
        attn_rows = []
        for b in range(BATCH):                            # static unroll
            r0 = b * SEQ
            ctx_out = None
            for hd in range(N_HEAD):                      # static unroll
                c0 = hd * HEAD_DIM
                qh = qkv[r0:r0 + SEQ, c0:c0 + HEAD_DIM]
                kh = qkv[r0:r0 + SEQ, EMB_DIM + c0:EMB_DIM + c0 + HEAD_DIM]
                vh = qkv[r0:r0 + SEQ, 2 * EMB_DIM + c0:2 * EMB_DIM + c0 + HEAD_DIM]
                s = jax.lax.dot_general(qh, kh, (((1,), (1,)), ((), ())),
                                        preferred_element_type=jnp.float32) * scale
                s = s - jnp.max(s, axis=-1, keepdims=True)
                e = jnp.exp(s)
                p = e * pl.reciprocal(jnp.sum(e, axis=-1, keepdims=True),
                                      approx=True)
                att_ref[b, hd] = p.astype(att_ref.dtype)
                head_ctx = jnp.dot(p, vh, preferred_element_type=jnp.float32)
                # fold the head directly into the output projection: no lane concat
                contrib = jnp.dot(head_ctx, wo_full[c0:c0 + HEAD_DIM, :],
                                  preferred_element_type=jnp.float32)      # (S, E)
                ctx_out = contrib if ctx_out is None else ctx_out + contrib
            attn_rows.append(ctx_out)
        attn_out = jnp.concatenate(attn_rows, axis=0) + bo[...]            # (B*SEQ, E)
        x = x + attn_out                                  # residual

        # --- feed-forward (pre-norm), whole batch in one matmul ---
        h2 = _layernorm(x, g2[...], b2[...])
        ff = jnp.dot(h2, w1[...], preferred_element_type=jnp.float32) + bb1[...]
        ff = jax.nn.gelu(ff, approximate=True)
        ff = jnp.dot(ff, w2[...], preferred_element_type=jnp.float32) + bb2[...]
        x = x + ff                                        # residual

    # ---- Reduce 'b n e -> b e' (mean) -> LayerNorm -> classification head ----
    means = [jnp.mean(x[b * SEQ:(b + 1) * SEQ, :], axis=0, keepdims=True)
             for b in range(BATCH)]
    m = jnp.concatenate(means, axis=0)                    # (B, E)
    y = _layernorm(m, ln_g_ref[...], ln_b_ref[...])
    logits_ref[...] = (jnp.dot(y, head_w_ref[...],
                               preferred_element_type=jnp.float32)
                       + head_b_ref[...]).astype(logits_ref.dtype)


# ----------------------------- pallas wrapper -----------------------------
def rearrange_patches(x):
    # 'b c (num_w p1) (num_h p2) -> b (num_w num_h) (p1 p2 c)'
    B, C, W, H = x.shape
    nw, nh = W // PATCH_SIZE, H // PATCH_SIZE
    x = x.reshape(B, C, nw, PATCH_SIZE, nh, PATCH_SIZE)
    x = x.transpose(0, 2, 4, 3, 5, 1)                     # b nw nh p1 p2 c
    return x.reshape(B, nw * nh, PATCH_SIZE * PATCH_SIZE * C)


def vit_forward(x, params):
    B = x.shape[0]
    assert B == BATCH
    patches = rearrange_patches(x).reshape(B * N_PATCHES, PATCH_DIM)

    flat_layers = []
    for lp in params["layers"]:
        flat_layers += [lp["g1"], lp["b1"], lp["wqkv"], lp["bqkv"], lp["wo"],
                        lp["bo"], lp["g2"], lp["b2"], lp["w1"], lp["bb1"],
                        lp["w2"], lp["bb2"]]
    inputs = [patches, params["emb_w"], params["emb_b"], params["cls"],
              params["pos"], *flat_layers,
              params["ln_g"], params["ln_b"], params["head_w"], params["head_b"]]

    out_shape = ((jax.ShapeDtypeStruct((B, NUM_CLASSES), jnp.float32),)
                 + tuple(jax.ShapeDtypeStruct((B, N_HEAD, SEQ, SEQ), jnp.float32)
                         for _ in range(N_ENCODER)))

    # Whole model fits in VMEM (~1.7 MB weights + <1 MB activations); single
    # un-gridded call -> no pipelining/double-buffering, one dispatch total.
    vmem = pl.BlockSpec(memory_space=pltpu.MemorySpace.VMEM)
    outs = pl.pallas_call(
        vit_kernel,
        in_specs=[vmem] * len(inputs),
        out_specs=tuple([vmem] * (1 + N_ENCODER)),
        out_shape=out_shape,
    )(*inputs)
    logits = outs[0]
    attentions = list(outs[1:])
    return logits, attentions


# ----------------------------- parameters -----------------------------
def init_params(key):
    def nrm(k, shape, scale=0.02):
        return scale * jax.random.normal(k, shape, jnp.float32)
    keys = iter(jax.random.split(key, 64))
    p = {
        "emb_w": nrm(next(keys), (PATCH_DIM, EMB_DIM)),
        "emb_b": nrm(next(keys), (1, EMB_DIM)),
        "cls":   jax.random.normal(next(keys), (1, EMB_DIM), jnp.float32),
        "pos":   jax.random.normal(next(keys), (SEQ, EMB_DIM), jnp.float32),
        "ln_g":  jnp.ones((1, EMB_DIM), jnp.float32),
        "ln_b":  jnp.zeros((1, EMB_DIM), jnp.float32),
        "head_w": nrm(next(keys), (EMB_DIM, NUM_CLASSES)),
        "head_b": jnp.zeros((1, NUM_CLASSES), jnp.float32),
        "layers": [],
    }
    for _ in range(N_ENCODER):
        p["layers"].append({
            "g1": jnp.ones((1, EMB_DIM), jnp.float32),
            "b1": jnp.zeros((1, EMB_DIM), jnp.float32),
            "wqkv": nrm(next(keys), (EMB_DIM, 3 * EMB_DIM)),
            "bqkv": jnp.zeros((1, 3 * EMB_DIM), jnp.float32),
            "wo": nrm(next(keys), (EMB_DIM, EMB_DIM)),
            "bo": jnp.zeros((1, EMB_DIM), jnp.float32),
            "g2": jnp.ones((1, EMB_DIM), jnp.float32),
            "b2": jnp.zeros((1, EMB_DIM), jnp.float32),
            "w1": nrm(next(keys), (EMB_DIM, HIDDEN)),
            "bb1": jnp.zeros((1, HIDDEN), jnp.float32),
            "w2": nrm(next(keys), (HIDDEN, EMB_DIM)),
            "bb2": jnp.zeros((1, EMB_DIM), jnp.float32),
        })
    return p


# ----------------------------- pure-JAX reference -----------------------------
def ref_forward(x, params):
    def ln(t, g, b):
        mu = t.mean(-1, keepdims=True)
        var = ((t - mu) ** 2).mean(-1, keepdims=True)
        return (t - mu) / jnp.sqrt(var + LN_EPS) * g + b

    h = rearrange_patches(x) @ params["emb_w"] + params["emb_b"]
    cls = jnp.broadcast_to(params["cls"][None], (x.shape[0], 1, EMB_DIM))
    h = jnp.concatenate([cls, h], axis=1) + params["pos"]
    atts = []
    for lp in params["layers"]:
        z = ln(h, lp["g1"], lp["b1"])
        qkv = z @ lp["wqkv"] + lp["bqkv"]
        q, k, v = (qkv[..., :EMB_DIM], qkv[..., EMB_DIM:2 * EMB_DIM],
                   qkv[..., 2 * EMB_DIM:])

        def split(a):
            B, S, _ = a.shape
            return a.reshape(B, S, N_HEAD, HEAD_DIM).transpose(0, 2, 1, 3)

        q, k, v = split(q), split(k), split(v)
        s = jnp.einsum("bhqd,bhkd->bhqk", q, k) / (HEAD_DIM ** 0.5)
        att = jax.nn.softmax(s, axis=-1)
        atts.append(att)
        ctx = jnp.einsum("bhqk,bhkd->bhqd", att, v)
        ctx = ctx.transpose(0, 2, 1, 3).reshape(h.shape)
        h = h + (ctx @ lp["wo"] + lp["bo"])
        z2 = ln(h, lp["g2"], lp["b2"])
        ff = jax.nn.gelu(z2 @ lp["w1"] + lp["bb1"], approximate=True)
        h = h + (ff @ lp["w2"] + lp["bb2"])
    m = ln(h.mean(axis=1), params["ln_g"], params["ln_b"])
    return m @ params["head_w"] + params["head_b"], atts


# ----------------------------- main -----------------------------
if __name__ == "__main__":
    key = jax.random.PRNGKey(0)
    pk, xk = jax.random.split(key)
    params = init_params(pk)
    x = jax.random.normal(xk, (BATCH, IN_CHANNELS, IMG_SIZE, IMG_SIZE), jnp.float32)

    logits, atts = vit_forward(x, params)
    logits = jax.block_until_ready(logits)
    atts = jax.block_until_ready(atts)

    ref_logits, ref_atts = ref_forward(x, params)
    assert logits.shape == (BATCH, NUM_CLASSES)
    assert len(atts) == N_ENCODER and atts[0].shape == (BATCH, N_HEAD, SEQ, SEQ)
    # tolerance covers the EUP approximate-reciprocal softmax denominator
    assert jnp.allclose(logits, ref_logits, rtol=5e-3, atol=5e-3), "logits mismatch"
    for a, ra in zip(atts, ref_atts):
        assert jnp.allclose(a, ra, rtol=5e-3, atol=5e-3), "attention mismatch"

    print("KERNEL_OK")
</pallas_src>

<mosaic_0001>
module attributes {stable_mosaic.version = 11 : i64} {
  func.func @vit_kernel(%arg0: memref<8x192xf32, #tpu.memory_space<vmem>>, %arg1: memref<192x128xf32, #tpu.memory_space<vmem>>, %arg2: memref<1x128xf32, #tpu.memory_space<vmem>>, %arg3: memref<1x128xf32, #tpu.memory_space<vmem>>, %arg4: memref<5x128xf32, #tpu.memory_space<vmem>>, %arg5: memref<1x128xf32, #tpu.memory_space<vmem>>, %arg6: memref<1x128xf32, #tpu.memory_space<vmem>>, %arg7: memref<128x384xf32, #tpu.memory_space<vmem>>, %arg8: memref<1x384xf32, #tpu.memory_space<vmem>>, %arg9: memref<128x128xf32, #tpu.memory_space<vmem>>, %arg10: memref<1x128xf32, #tpu.memory_space<vmem>>, %arg11: memref<1x128xf32, #tpu.memory_space<vmem>>, %arg12: memref<1x128xf32, #tpu.memory_space<vmem>>, %arg13: memref<128x512xf32, #tpu.memory_space<vmem>>, %arg14: memref<1x512xf32, #tpu.memory_space<vmem>>, %arg15: memref<512x128xf32, #tpu.memory_space<vmem>>, %arg16: memref<1x128xf32, #tpu.memory_space<vmem>>, %arg17: memref<1x128xf32, #tpu.memory_space<vmem>>, %arg18: memref<1x128xf32, #tpu.memory_space<vmem>>, %arg19: memref<128x384xf32, #tpu.memory_space<vmem>>, %arg20: memref<1x384xf32, #tpu.memory_space<vmem>>, %arg21: memref<128x128xf32, #tpu.memory_space<vmem>>, %arg22: memref<1x128xf32, #tpu.memory_space<vmem>>, %arg23: memref<1x128xf32, #tpu.memory_space<vmem>>, %arg24: memref<1x128xf32, #tpu.memory_space<vmem>>, %arg25: memref<128x512xf32, #tpu.memory_space<vmem>>, %arg26: memref<1x512xf32, #tpu.memory_space<vmem>>, %arg27: memref<512x128xf32, #tpu.memory_space<vmem>>, %arg28: memref<1x128xf32, #tpu.memory_space<vmem>>, %arg29: memref<1x128xf32, #tpu.memory_space<vmem>>, %arg30: memref<1x128xf32, #tpu.memory_space<vmem>>, %arg31: memref<128x16xf32, #tpu.memory_space<vmem>>, %arg32: memref<1x16xf32, #tpu.memory_space<vmem>>, %arg33: memref<2x16xf32, #tpu.memory_space<vmem>>, %arg34: memref<2x4x5x5xf32, #tpu.memory_space<vmem>>, %arg35: memref<2x4x5x5xf32, #tpu.memory_space<vmem>>) attributes {dimension_semantics = [], scalar_prefetch = 0 : i64, scratch_operands = 0 : i64, tpu.core_type = #tpu.core_type<tc>} {
    %c0 = arith.constant 0 : index
    %c0_0 = arith.constant 0 : index
    %0 = vector.load %arg0[%c0, %c0_0] : memref<8x192xf32, #tpu.memory_space<vmem>>, vector<8x192xf32>
    %c0_1 = arith.constant 0 : index
    %c0_2 = arith.constant 0 : index
    %1 = vector.load %arg1[%c0_1, %c0_2] : memref<192x128xf32, #tpu.memory_space<vmem>>, vector<192x128xf32>
    %cst = arith.constant dense<0.000000e+00> : vector<8x128xf32>
    %2 = tpu.matmul %0, %1, %cst {dimension_numbers = #tpu.dot_dimension_numbers<[1], [0], [0], [1], [0, 0, 1, 1], [], []>} : vector<8x192xf32>, vector<192x128xf32>, vector<8x128xf32> -> vector<8x128xf32>
    %c0_3 = arith.constant 0 : index
    %c0_4 = arith.constant 0 : index
    %3 = vector.load %arg2[%c0_3, %c0_4] : memref<1x128xf32, #tpu.memory_space<vmem>>, vector<1x128xf32>
    %4 = vector.broadcast %3 : vector<1x128xf32> to vector<8x128xf32>
    %5 = arith.addf %2, %4 : vector<8x128xf32>
    %c0_5 = arith.constant 0 : index
    %c0_6 = arith.constant 0 : index
    %6 = vector.load %arg4[%c0_5, %c0_6] : memref<5x128xf32, #tpu.memory_space<vmem>>, vector<5x128xf32>
    %c0_7 = arith.constant 0 : index
    %c0_8 = arith.constant 0 : index
    %7 = vector.load %arg3[%c0_7, %c0_8] : memref<1x128xf32, #tpu.memory_space<vmem>>, vector<1x128xf32>
    %8 = vector.extract_strided_slice %6 {offsets = [0, 0], sizes = [1, 128], strides = [1, 1]} : vector<5x128xf32> to vector<1x128xf32>
    %9 = arith.addf %7, %8 : vector<1x128xf32>
    %10 = vector.extract_strided_slice %5 {offsets = [0, 0], sizes = [4, 128], strides = [1, 1]} : vector<8x128xf32> to vector<4x128xf32>
    %11 = vector.extract_strided_slice %6 {offsets = [1, 0], sizes = [4, 128], strides = [1, 1]} : vector<5x128xf32> to vector<4x128xf32>
    %12 = arith.addf %10, %11 : vector<4x128xf32>
    %13 = vector.extract_strided_slice %5 {offsets = [4, 0], sizes = [4, 128], strides = [1, 1]} : vector<8x128xf32> to vector<4x128xf32>
    %14 = vector.extract_strided_slice %6 {offsets = [1, 0], sizes = [4, 128], strides = [1, 1]} : vector<5x128xf32> to vector<4x128xf32>
    %15 = arith.addf %13, %14 : vector<4x128xf32>
    %16 = tpu.concatenate %9, %12, %9, %15 in 0 : vector<1x128xf32>, vector<4x128xf32>, vector<1x128xf32>, vector<4x128xf32> -> vector<10x128xf32>
    %c0_9 = arith.constant 0 : index
    %c0_10 = arith.constant 0 : index
    %17 = vector.load %arg5[%c0_9, %c0_10] : memref<1x128xf32, #tpu.memory_space<vmem>>, vector<1x128xf32>
    %c0_11 = arith.constant 0 : index
    %c0_12 = arith.constant 0 : index
    %18 = vector.load %arg6[%c0_11, %c0_12] : memref<1x128xf32, #tpu.memory_space<vmem>>, vector<1x128xf32>
    %cst_13 = arith.constant dense<0.000000e+00> : vector<10xf32>
    %19 = vector.multi_reduction <add>, %16, %cst_13 [1] : vector<10x128xf32> to vector<10xf32>
    %20 = vector.shape_cast %19 : vector<10xf32> to vector<10x1xf32>
    %cst_14 = arith.constant 1.280000e+02 : f32
    %21 = vector.broadcast %cst_14 : f32 to vector<10x1xf32>
    %22 = arith.divf %20, %21 : vector<10x1xf32>
    %23 = vector.broadcast %22 : vector<10x1xf32> to vector<10x128xf32>
    %24 = arith.subf %16, %23 : vector<10x128xf32>
    %25 = arith.mulf %24, %24 : vector<10x128xf32>
    %cst_15 = arith.constant dense<0.000000e+00> : vector<10xf32>
    %26 = vector.multi_reduction <add>, %25, %cst_15 [1] : vector<10x128xf32> to vector<10xf32>
    %27 = vector.shape_cast %26 : vector<10xf32> to vector<10x1xf32>
    %cst_16 = arith.constant 1.280000e+02 : f32
    %28 = vector.broadcast %cst_16 : f32 to vector<10x1xf32>
    %29 = arith.divf %27, %28 : vector<10x1xf32>
    %30 = vector.broadcast %22 : vector<10x1xf32> to vector<10x128xf32>
    %31 = arith.subf %16, %30 : vector<10x128xf32>
    %cst_17 = arith.constant 9.99999974E-6 : f32
    %32 = vector.broadcast %cst_17 : f32 to vector<10x1xf32>
    %33 = arith.addf %29, %32 : vector<10x1xf32>
    %34 = math.rsqrt %33 : vector<10x1xf32>
    %35 = vector.broadcast %34 : vector<10x1xf32> to vector<10x128xf32>
    %36 = arith.mulf %31, %35 : vector<10x128xf32>
    %37 = vector.broadcast %17 : vector<1x128xf32> to vector<10x128xf32>
    %38 = arith.mulf %36, %37 : vector<10x128xf32>
    %39 = vector.broadcast %18 : vector<1x128xf32> to vector<10x128xf32>
    %40 = arith.addf %38, %39 : vector<10x128xf32>
    %c0_18 = arith.constant 0 : index
    %c0_19 = arith.constant 0 : index
    %41 = vector.load %arg7[%c0_18, %c0_19] : memref<128x384xf32, #tpu.memory_space<vmem>>, vector<128x384xf32>
    %cst_20 = arith.constant dense<0.000000e+00> : vector<10x384xf32>
    %42 = tpu.matmul %40, %41, %cst_20 {dimension_numbers = #tpu.dot_dimension_numbers<[1], [0], [0], [1], [0, 0, 1, 1], [], []>} : vector<10x128xf32>, vector<128x384xf32>, vector<10x384xf32> -> vector<10x384xf32>
    %c0_21 = arith.constant 0 : index
    %c0_22 = arith.constant 0 : index
    %43 = vector.load %arg8[%c0_21, %c0_22] : memref<1x384xf32, #tpu.memory_space<vmem>>, vector<1x384xf32>
    %44 = vector.broadcast %43 : vector<1x384xf32> to vector<10x384xf32>
    %45 = arith.addf %42, %44 : vector<10x384xf32>
    %c0_23 = arith.constant 0 : index
    %c0_24 = arith.constant 0 : index
    %46 = vector.load %arg9[%c0_23, %c0_24] : memref<128x128xf32, #tpu.memory_space<vmem>>, vector<128x128xf32>
    %47 = vector.extract_strided_slice %45 {offsets = [0, 0], sizes = [5, 32], strides = [1, 1]} : vector<10x384xf32> to vector<5x32xf32>
    %48 = vector.extract_strided_slice %45 {offsets = [0, 128], sizes = [5, 32], strides = [1, 1]} : vector<10x384xf32> to vector<5x32xf32>
    %49 = vector.extract_strided_slice %45 {offsets = [0, 256], sizes = [5, 32], strides = [1, 1]} : vector<10x384xf32> to vector<5x32xf32>
    %cst_25 = arith.constant dense<0.000000e+00> : vector<5x5xf32>
    %50 = tpu.matmul %47, %48, %cst_25 {dimension_numbers = #tpu.dot_dimension_numbers<[1], [1], [0], [0], [0, 0, 1, 0], [], []>} : vector<5x32xf32>, vector<5x32xf32>, vector<5x5xf32> -> vector<5x5xf32>
    %cst_26 = arith.constant 0.176776692 : f32
    %51 = vector.broadcast %cst_26 : f32 to vector<5x5xf32>
    %52 = arith.mulf %50, %51 : vector<5x5xf32>
    %cst_27 = arith.constant dense<0xFF800000> : vector<5xf32>
    %53 = vector.multi_reduction <maximumf>, %52, %cst_27 [1] : vector<5x5xf32> to vector<5xf32>
    %54 = vector.shape_cast %53 : vector<5xf32> to vector<5x1xf32>
    %55 = vector.broadcast %54 : vector<5x1xf32> to vector<5x5xf32>
    %56 = arith.subf %52, %55 : vector<5x5xf32>
    %57 = math.exp %56 : vector<5x5xf32>
    %cst_28 = arith.constant dense<0.000000e+00> : vector<5xf32>
    %58 = vector.multi_reduction <add>, %57, %cst_28 [1] : vector<5x5xf32> to vector<5xf32>
    %59 = vector.shape_cast %58 : vector<5xf32> to vector<5x1xf32>
    %60 = tpu.reciprocal %59 {approx = true} : vector<5x1xf32> -> vector<5x1xf32>
    %61 = vector.broadcast %60 : vector<5x1xf32> to vector<5x5xf32>
    %62 = arith.mulf %57, %61 : vector<5x5xf32>
    %c0_29 = arith.constant 0 : index
    %c0_30 = arith.constant 0 : index
    %c0_31 = arith.constant 0 : index
    %c0_32 = arith.constant 0 : index
    %63 = vector.load %arg34[%c0_29, %c0_30, %c0_31, %c0_32] : memref<2x4x5x5xf32, #tpu.memory_space<vmem>>, vector<1x1x5x5xf32>
    %64 = vector.shape_cast %63 : vector<1x1x5x5xf32> to vector<5x5xf32>
    %65 = vector.shape_cast %62 : vector<5x5xf32> to vector<1x1x5x5xf32>
    tpu.vector_store %arg34[%c0_29, %c0_30, %c0_31, %c0_32], %65 {strides = array<i32>} : memref<2x4x5x5xf32, #tpu.memory_space<vmem>>, vector<1x1x5x5xf32>,
    %cst_33 = arith.constant dense<0.000000e+00> : vector<5x32xf32>
    %66 = tpu.matmul %62, %49, %cst_33 {dimension_numbers = #tpu.dot_dimension_numbers<[1], [0], [0], [1], [0, 0, 1, 1], [], []>} : vector<5x5xf32>, vector<5x32xf32>, vector<5x32xf32> -> vector<5x32xf32>
    %67 = vector.extract_strided_slice %46 {offsets = [0, 0], sizes = [32, 128], strides = [1, 1]} : vector<128x128xf32> to vector<32x128xf32>
    %cst_34 = arith.constant dense<0.000000e+00> : vector<5x128xf32>
    %68 = tpu.matmul %66, %67, %cst_34 {dimension_numbers = #tpu.dot_dimension_numbers<[1], [0], [0], [1], [0, 0, 1, 1], [], []>} : vector<5x32xf32>, vector<32x128xf32>, vector<5x128xf32> -> vector<5x128xf32>
    %69 = vector.extract_strided_slice %45 {offsets = [0, 32], sizes = [5, 32], strides = [1, 1]} : vector<10x384xf32> to vector<5x32xf32>
    %70 = vector.extract_strided_slice %45 {offsets = [0, 160], sizes = [5, 32], strides = [1, 1]} : vector<10x384xf32> to vector<5x32xf32>
    %71 = vector.extract_strided_slice %45 {offsets = [0, 288], sizes = [5, 32], strides = [1, 1]} : vector<10x384xf32> to vector<5x32xf32>
    %cst_35 = arith.constant dense<0.000000e+00> : vector<5x5xf32>
    %72 = tpu.matmul %69, %70, %cst_35 {dimension_numbers = #tpu.dot_dimension_numbers<[1], [1], [0], [0], [0, 0, 1, 0], [], []>} : vector<5x32xf32>, vector<5x32xf32>, vector<5x5xf32> -> vector<5x5xf32>
    %cst_36 = arith.constant 0.176776692 : f32
    %73 = vector.broadcast %cst_36 : f32 to vector<5x5xf32>
    %74 = arith.mulf %72, %73 : vector<5x5xf32>
    %cst_37 = arith.constant dense<0xFF800000> : vector<5xf32>
    %75 = vector.multi_reduction <maximumf>, %74, %cst_37 [1] : vector<5x5xf32> to vector<5xf32>
    %76 = vector.shape_cast %75 : vector<5xf32> to vector<5x1xf32>
    %77 = vector.broadcast %76 : vector<5x1xf32> to vector<5x5xf32>
    %78 = arith.subf %74, %77 : vector<5x5xf32>
    %79 = math.exp %78 : vector<5x5xf32>
    %cst_38 = arith.constant dense<0.000000e+00> : vector<5xf32>
    %80 = vector.multi_reduction <add>, %79, %cst_38 [1] : vector<5x5xf32> to vector<5xf32>
    %81 = vector.shape_cast %80 : vector<5xf32> to vector<5x1xf32>
    %82 = tpu.reciprocal %81 {approx = true} : vector<5x1xf32> -> vector<5x1xf32>
    %83 = vector.broadcast %82 : vector<5x1xf32> to vector<5x5xf32>
    %84 = arith.mulf %79, %83 : vector<5x5xf32>
    %c0_39 = arith.constant 0 : index
    %c1 = arith.constant 1 : index
    %c0_40 = arith.constant 0 : index
    %c0_41 = arith.constant 0 : index
    %85 = vector.load %arg34[%c0_39, %c1, %c0_40, %c0_41] : memref<2x4x5x5xf32, #tpu.memory_space<vmem>>, vector<1x1x5x5xf32>
    %86 = vector.shape_cast %85 : vector<1x1x5x5xf32> to vector<5x5xf32>
    %87 = vector.shape_cast %84 : vector<5x5xf32> to vector<1x1x5x5xf32>
    tpu.vector_store %arg34[%c0_39, %c1, %c0_40, %c0_41], %87 {strides = array<i32>} : memref<2x4x5x5xf32, #tpu.memory_space<vmem>>, vector<1x1x5x5xf32>,
    %cst_42 = arith.constant dense<0.000000e+00> : vector<5x32xf32>
    %88 = tpu.matmul %84, %71, %cst_42 {dimension_numbers = #tpu.dot_dimension_numbers<[1], [0], [0], [1], [0, 0, 1, 1], [], []>} : vector<5x5xf32>, vector<5x32xf32>, vector<5x32xf32> -> vector<5x32xf32>
    %89 = vector.extract_strided_slice %46 {offsets = [32, 0], sizes = [32, 128], strides = [1, 1]} : vector<128x128xf32> to vector<32x128xf32>
    %cst_43 = arith.constant dense<0.000000e+00> : vector<5x128xf32>
    %90 = tpu.matmul %88, %89, %cst_43 {dimension_numbers = #tpu.dot_dimension_numbers<[1], [0], [0], [1], [0, 0, 1, 1], [], []>} : vector<5x32xf32>, vector<32x128xf32>, vector<5x128xf32> -> vector<5x128xf32>
    %91 = arith.addf %68, %90 : vector<5x128xf32>
    %92 = vector.extract_strided_slice %45 {offsets = [0, 64], sizes = [5, 32], strides = [1, 1]} : vector<10x384xf32> to vector<5x32xf32>
    %93 = vector.extract_strided_slice %45 {offsets = [0, 192], sizes = [5, 32], strides = [1, 1]} : vector<10x384xf32> to vector<5x32xf32>
    %94 = vector.extract_strided_slice %45 {offsets = [0, 320], sizes = [5, 32], strides = [1, 1]} : vector<10x384xf32> to vector<5x32xf32>
    %cst_44 = arith.constant dense<0.000000e+00> : vector<5x5xf32>
    %95 = tpu.matmul %92, %93, %cst_44 {dimension_numbers = #tpu.dot_dimension_numbers<[1], [1], [0], [0], [0, 0, 1, 0], [], []>} : vector<5x32xf32>, vector<5x32xf32>, vector<5x5xf32> -> vector<5x5xf32>
    %cst_45 = arith.constant 0.176776692 : f32
    %96 = vector.broadcast %cst_45 : f32 to vector<5x5xf32>
    %97 = arith.mulf %95, %96 : vector<5x5xf32>
    %cst_46 = arith.constant dense<0xFF800000> : vector<5xf32>
    %98 = vector.multi_reduction <maximumf>, %97, %cst_46 [1] : vector<5x5xf32> to vector<5xf32>
    %99 = vector.shape_cast %98 : vector<5xf32> to vector<5x1xf32>
    %100 = vector.broadcast %99 : vector<5x1xf32> to vector<5x5xf32>
    %101 = arith.subf %97, %100 : vector<5x5xf32>
    %102 = math.exp %101 : vector<5x5xf32>
    %cst_47 = arith.constant dense<0.000000e+00> : vector<5xf32>
    %103 = vector.multi_reduction <add>, %102, %cst_47 [1] : vector<5x5xf32> to vector<5xf32>
    %104 = vector.shape_cast %103 : vector<5xf32> to vector<5x1xf32>
    %105 = tpu.reciprocal %104 {approx = true} : vector<5x1xf32> -> vector<5x1xf32>
    %106 = vector.broadcast %105 : vector<5x1xf32> to vector<5x5xf32>
    %107 = arith.mulf %102, %106 : vector<5x5xf32>
    %c0_48 = arith.constant 0 : index
    %c2 = arith.constant 2 : index
    %c0_49 = arith.constant 0 : index
    %c0_50 = arith.constant 0 : index
    %108 = vector.load %arg34[%c0_48, %c2, %c0_49, %c0_50] : memref<2x4x5x5xf32, #tpu.memory_space<vmem>>, vector<1x1x5x5xf32>
    %109 = vector.shape_cast %108 : vector<1x1x5x5xf32> to vector<5x5xf32>
    %110 = vector.shape_cast %107 : vector<5x5xf32> to vector<1x1x5x5xf32>
    tpu.vector_store %arg34[%c0_48, %c2, %c0_49, %c0_50], %110 {strides = array<i32>} : memref<2x4x5x5xf32, #tpu.memory_space<vmem>>, vector<1x1x5x5xf32>,
    %cst_51 = arith.constant dense<0.000000e+00> : vector<5x32xf32>
    %111 = tpu.matmul %107, %94, %cst_51 {dimension_numbers = #tpu.dot_dimension_numbers<[1], [0], [0], [1], [0, 0, 1, 1], [], []>} : vector<5x5xf32>, vector<5x32xf32>, vector<5x32xf32> -> vector<5x32xf32>
    %112 = vector.extract_strided_slice %46 {offsets = [64, 0], sizes = [32, 128], strides = [1, 1]} : vector<128x128xf32> to vector<32x128xf32>
    %cst_52 = arith.constant dense<0.000000e+00> : vector<5x128xf32>
    %113 = tpu.matmul %111, %112, %cst_52 {dimension_numbers = #tpu.dot_dimension_numbers<[1], [0], [0], [1], [0, 0, 1, 1], [], []>} : vector<5x32xf32>, vector<32x128xf32>, vector<5x128xf32> -> vector<5x128xf32>
    %114 = arith.addf %91, %113 : vector<5x128xf32>
    %115 = vector.extract_strided_slice %45 {offsets = [0, 96], sizes = [5, 32], strides = [1, 1]} : vector<10x384xf32> to vector<5x32xf32>
    %116 = vector.extract_strided_slice %45 {offsets = [0, 224], sizes = [5, 32], strides = [1, 1]} : vector<10x384xf32> to vector<5x32xf32>
    %117 = vector.extract_strided_slice %45 {offsets = [0, 352], sizes = [5, 32], strides = [1, 1]} : vector<10x384xf32> to vector<5x32xf32>
    %cst_53 = arith.constant dense<0.000000e+00> : vector<5x5xf32>
    %118 = tpu.matmul %115, %116, %cst_53 {dimension_numbers = #tpu.dot_dimension_numbers<[1], [1], [0], [0], [0, 0, 1, 0], [], []>} : vector<5x32xf32>, vector<5x32xf32>, vector<5x5xf32> -> vector<5x5xf32>
    %cst_54 = arith.constant 0.176776692 : f32
    %119 = vector.broadcast %cst_54 : f32 to vector<5x5xf32>
    %120 = arith.mulf %118, %119 : vector<5x5xf32>
    %cst_55 = arith.constant dense<0xFF800000> : vector<5xf32>
    %121 = vector.multi_reduction <maximumf>, %120, %cst_55 [1] : vector<5x5xf32> to vector<5xf32>
    %122 = vector.shape_cast %121 : vector<5xf32> to vector<5x1xf32>
    %123 = vector.broadcast %122 : vector<5x1xf32> to vector<5x5xf32>
    %124 = arith.subf %120, %123 : vector<5x5xf32>
    %125 = math.exp %124 : vector<5x5xf32>
    %cst_56 = arith.constant dense<0.000000e+00> : vector<5xf32>
    %126 = vector.multi_reduction <add>, %125, %cst_56 [1] : vector<5x5xf32> to vector<5xf32>
    %127 = vector.shape_cast %126 : vector<5xf32> to vector<5x1xf32>
    %128 = tpu.reciprocal %127 {approx = true} : vector<5x1xf32> -> vector<5x1xf32>
    %129 = vector.broadcast %128 : vector<5x1xf32> to vector<5x5xf32>
    %130 = arith.mulf %125, %129 : vector<5x5xf32>
    %c0_57 = arith.constant 0 : index
    %c3 = arith.constant 3 : index
    %c0_58 = arith.constant 0 : index
    %c0_59 = arith.constant 0 : index
    %131 = vector.load %arg34[%c0_57, %c3, %c0_58, %c0_59] : memref<2x4x5x5xf32, #tpu.memory_space<vmem>>, vector<1x1x5x5xf32>
    %132 = vector.shape_cast %131 : vector<1x1x5x5xf32> to vector<5x5xf32>
    %133 = vector.shape_cast %130 : vector<5x5xf32> to vector<1x1x5x5xf32>
    tpu.vector_store %arg34[%c0_57, %c3, %c0_58, %c0_59], %133 {strides = array<i32>} : memref<2x4x5x5xf32, #tpu.memory_space<vmem>>, vector<1x1x5x5xf32>,
    %cst_60 = arith.constant dense<0.000000e+00> : vector<5x32xf32>
    %134 = tpu.matmul %130, %117, %cst_60 {dimension_numbers = #tpu.dot_dimension_numbers<[1], [0], [0], [1], [0, 0, 1, 1], [], []>} : vector<5x5xf32>, vector<5x32xf32>, vector<5x32xf32> -> vector<5x32xf32>
    %135 = vector.extract_strided_slice %46 {offsets = [96, 0], sizes = [32, 128], strides = [1, 1]} : vector<128x128xf32> to vector<32x128xf32>
    %cst_61 = arith.constant dense<0.000000e+00> : vector<5x128xf32>
    %136 = tpu.matmul %134, %135, %cst_61 {dimension_numbers = #tpu.dot_dimension_numbers<[1], [0], [0], [1], [0, 0, 1, 1], [], []>} : vector<5x32xf32>, vector<32x128xf32>, vector<5x128xf32> -> vector<5x128xf32>
    %137 = arith.addf %114, %136 : vector<5x128xf32>
    %138 = vector.extract_strided_slice %45 {offsets = [5, 0], sizes = [5, 32], strides = [1, 1]} : vector<10x384xf32> to vector<5x32xf32>
    %139 = vector.extract_strided_slice %45 {offsets = [5, 128], sizes = [5, 32], strides = [1, 1]} : vector<10x384xf32> to vector<5x32xf32>
    %140 = vector.extract_strided_slice %45 {offsets = [5, 256], sizes = [5, 32], strides = [1, 1]} : vector<10x384xf32> to vector<5x32xf32>
    %cst_62 = arith.constant dense<0.000000e+00> : vector<5x5xf32>
    %141 = tpu.matmul %138, %139, %cst_62 {dimension_numbers = #tpu.dot_dimension_numbers<[1], [1], [0], [0], [0, 0, 1, 0], [], []>} : vector<5x32xf32>, vector<5x32xf32>, vector<5x5xf32> -> vector<5x5xf32>
    %cst_63 = arith.constant 0.176776692 : f32
    %142 = vector.broadcast %cst_63 : f32 to vector<5x5xf32>
    %143 = arith.mulf %141, %142 : vector<5x5xf32>
    %cst_64 = arith.constant dense<0xFF800000> : vector<5xf32>
    %144 = vector.multi_reduction <maximumf>, %143, %cst_64 [1] : vector<5x5xf32> to vector<5xf32>
    %145 = vector.shape_cast %144 : vector<5xf32> to vector<5x1xf32>
    %146 = vector.broadcast %145 : vector<5x1xf32> to vector<5x5xf32>
    %147 = arith.subf %143, %146 : vector<5x5xf32>
    %148 = math.exp %147 : vector<5x5xf32>
    %cst_65 = arith.constant dense<0.000000e+00> : vector<5xf32>
    %149 = vector.multi_reduction <add>, %148, %cst_65 [1] : vector<5x5xf32> to vector<5xf32>
    %150 = vector.shape_cast %149 : vector<5xf32> to vector<5x1xf32>
    %151 = tpu.reciprocal %150 {approx = true} : vector<5x1xf32> -> vector<5x1xf32>
    %152 = vector.broadcast %151 : vector<5x1xf32> to vector<5x5xf32>
    %153 = arith.mulf %148, %152 : vector<5x5xf32>
    %c1_66 = arith.constant 1 : index
    %c0_67 = arith.constant 0 : index
    %c0_68 = arith.constant 0 : index
    %c0_69 = arith.constant 0 : index
    %154 = vector.load %arg34[%c1_66, %c0_67, %c0_68, %c0_69] : memref<2x4x5x5xf32, #tpu.memory_space<vmem>>, vector<1x1x5x5xf32>
    %155 = vector.shape_cast %154 : vector<1x1x5x5xf32> to vector<5x5xf32>
    %156 = vector.shape_cast %153 : vector<5x5xf32> to vector<1x1x5x5xf32>
    tpu.vector_store %arg34[%c1_66, %c0_67, %c0_68, %c0_69], %156 {strides = array<i32>} : memref<2x4x5x5xf32, #tpu.memory_space<vmem>>, vector<1x1x5x5xf32>,
    %cst_70 = arith.constant dense<0.000000e+00> : vector<5x32xf32>
    %157 = tpu.matmul %153, %140, %cst_70 {dimension_numbers = #tpu.dot_dimension_numbers<[1], [0], [0], [1], [0, 0, 1, 1], [], []>} : vector<5x5xf32>, vector<5x32xf32>, vector<5x32xf32> -> vector<5x32xf32>
    %158 = vector.extract_strided_slice %46 {offsets = [0, 0], sizes = [32, 128], strides = [1, 1]} : vector<128x128xf32> to vector<32x128xf32>
    %cst_71 = arith.constant dense<0.000000e+00> : vector<5x128xf32>
    %159 = tpu.matmul %157, %158, %cst_71 {dimension_numbers = #tpu.dot_dimension_numbers<[1], [0], [0], [1], [0, 0, 1, 1], [], []>} : vector<5x32xf32>, vector<32x128xf32>, vector<5x128xf32> -> vector<5x128xf32>
    %160 = vector.extract_strided_slice %45 {offsets = [5, 32], sizes = [5, 32], strides = [1, 1]} : vector<10x384xf32> to vector<5x32xf32>
    %161 = vector.extract_strided_slice %45 {offsets = [5, 160], sizes = [5, 32], strides = [1, 1]} : vector<10x384xf32> to vector<5x32xf32>
    %162 = vector.extract_strided_slice %45 {offsets = [5, 288], sizes = [5, 32], strides = [1, 1]} : vector<10x384xf32> to vector<5x32xf32>
    %cst_72 = arith.constant dense<0.000000e+00> : vector<5x5xf32>
    %163 = tpu.matmul %160, %161, %cst_72 {dimension_numbers = #tpu.dot_dimension_numbers<[1], [1], [0], [0], [0, 0, 1, 0], [], []>} : vector<5x32xf32>, vector<5x32xf32>, vector<5x5xf32> -> vector<5x5xf32>
    %cst_73 = arith.constant 0.176776692 : f32
    %164 = vector.broadcast %cst_73 : f32 to vector<5x5xf32>
    %165 = arith.mulf %163, %164 : vector<5x5xf32>
    %cst_74 = arith.constant dense<0xFF800000> : vector<5xf32>
    %166 = vector.multi_reduction <maximumf>, %165, %cst_74 [1] : vector<5x5xf32> to vector<5xf32>
    %167 = vector.shape_cast %166 : vector<5xf32> to vector<5x1xf32>
    %168 = vector.broadcast %167 : vector<5x1xf32> to vector<5x5xf32>
    %169 = arith.subf %165, %168 : vector<5x5xf32>
    %170 = math.exp %169 : vector<5x5xf32>
    %cst_75 = arith.constant dense<0.000000e+00> : vector<5xf32>
    %171 = vector.multi_reduction <add>, %170, %cst_75 [1] : vector<5x5xf32> to vector<5xf32>
    %172 = vector.shape_cast %171 : vector<5xf32> to vector<5x1xf32>
    %173 = tpu.reciprocal %172 {approx = true} : vector<5x1xf32> -> vector<5x1xf32>
    %174 = vector.broadcast %173 : vector<5x1xf32> to vector<5x5xf32>
    %175 = arith.mulf %170, %174 : vector<5x5xf32>
    %c1_76 = arith.constant 1 : index
    %c1_77 = arith.constant 1 : index
    %c0_78 = arith.constant 0 : index
    %c0_79 = arith.constant 0 : index
    %176 = vector.load %arg34[%c1_76, %c1_77, %c0_78, %c0_79] : memref<2x4x5x5xf32, #tpu.memory_space<vmem>>, vector<1x1x5x5xf32>
    %177 = vector.shape_cast %176 : vector<1x1x5x5xf32> to vector<5x5xf32>
    %178 = vector.shape_cast %175 : vector<5x5xf32> to vector<1x1x5x5xf32>
    tpu.vector_store %arg34[%c1_76, %c1_77, %c0_78, %c0_79], %178 {strides = array<i32>} : memref<2x4x5x5xf32, #tpu.memory_space<vmem>>, vector<1x1x5x5xf32>,
    %cst_80 = arith.constant dense<0.000000e+00> : vector<5x32xf32>
    %179 = tpu.matmul %175, %162, %cst_80 {dimension_numbers = #tpu.dot_dimension_numbers<[1], [0], [0], [1], [0, 0, 1, 1], [], []>} : vector<5x5xf32>, vector<5x32xf32>, vector<5x32xf32> -> vector<5x32xf32>
    %180 = vector.extract_strided_slice %46 {offsets = [32, 0], sizes = [32, 128], strides = [1, 1]} : vector<128x128xf32> to vector<32x128xf32>
    %cst_81 = arith.constant dense<0.000000e+00> : vector<5x128xf32>
    %181 = tpu.matmul %179, %180, %cst_81 {dimension_numbers = #tpu.dot_dimension_numbers<[1], [0], [0], [1], [0, 0, 1, 1], [], []>} : vector<5x32xf32>, vector<32x128xf32>, vector<5x128xf32> -> vector<5x128xf32>
    %182 = arith.addf %159, %181 : vector<5x128xf32>
    %183 = vector.extract_strided_slice %45 {offsets = [5, 64], sizes = [5, 32], strides = [1, 1]} : vector<10x384xf32> to vector<5x32xf32>
    %184 = vector.extract_strided_slice %45 {offsets = [5, 192], sizes = [5, 32], strides = [1, 1]} : vector<10x384xf32> to vector<5x32xf32>
    %185 = vector.extract_strided_slice %45 {offsets = [5, 320], sizes = [5, 32], strides = [1, 1]} : vector<10x384xf32> to vector<5x32xf32>
    %cst_82 = arith.constant dense<0.000000e+00> : vector<5x5xf32>
    %186 = tpu.matmul %183, %184, %cst_82 {dimension_numbers = #tpu.dot_dimension_numbers<[1], [1], [0], [0], [0, 0, 1, 0], [], []>} : vector<5x32xf32>, vector<5x32xf32>, vector<5x5xf32> -> vector<5x5xf32>
    %cst_83 = arith.constant 0.176776692 : f32
    %187 = vector.broadcast %cst_83 : f32 to vector<5x5xf32>
    %188 = arith.mulf %186, %187 : vector<5x5xf32>
    %cst_84 = arith.constant dense<0xFF800000> : vector<5xf32>
    %189 = vector.multi_reduction <maximumf>, %188, %cst_84 [1] : vector<5x5xf32> to vector<5xf32>
    %190 = vector.shape_cast %189 : vector<5xf32> to vector<5x1xf32>
    %191 = vector.broadcast %190 : vector<5x1xf32> to vector<5x5xf32>
    %192 = arith.subf %188, %191 : vector<5x5xf32>
    %193 = math.exp %192 : vector<5x5xf32>
    %cst_85 = arith.constant dense<0.000000e+00> : vector<5xf32>
    %194 = vector.multi_reduction <add>, %193, %cst_85 [1] : vector<5x5xf32> to vector<5xf32>
    %195 = vector.shape_cast %194 : vector<5xf32> to vector<5x1xf32>
    %196 = tpu.reciprocal %195 {approx = true} : vector<5x1xf32> -> vector<5x1xf32>
    %197 = vector.broadcast %196 : vector<5x1xf32> to vector<5x5xf32>
    %198 = arith.mulf %193, %197 : vector<5x5xf32>
    %c1_86 = arith.constant 1 : index
    %c2_87 = arith.constant 2 : index
    %c0_88 = arith.constant 0 : index
    %c0_89 = arith.constant 0 : index
    %199 = vector.load %arg34[%c1_86, %c2_87, %c0_88, %c0_89] : memref<2x4x5x5xf32, #tpu.memory_space<vmem>>, vector<1x1x5x5xf32>
    %200 = vector.shape_cast %199 : vector<1x1x5x5xf32> to vector<5x5xf32>
    %201 = vector.shape_cast %198 : vector<5x5xf32> to vector<1x1x5x5xf32>
    tpu.vector_store %arg34[%c1_86, %c2_87, %c0_88, %c0_89], %201 {strides = array<i32>} : memref<2x4x5x5xf32, #tpu.memory_space<vmem>>, vector<1x1x5x5xf32>,
    %cst_90 = arith.constant dense<0.000000e+00> : vector<5x32xf32>
    %202 = tpu.matmul %198, %185, %cst_90 {dimension_numbers = #tpu.dot_dimension_numbers<[1], [0], [0], [1], [0, 0, 1, 1], [], []>} : vector<5x5xf32>, vector<5x32xf32>, vector<5x32xf32> -> vector<5x32xf32>
    %203 = vector.extract_strided_slice %46 {offsets = [64, 0], sizes = [32, 128], strides = [1, 1]} : vector<128x128xf32> to vector<32x128xf32>
    %cst_91 = arith.constant dense<0.000000e+00> : vector<5x128xf32>
    %204 = tpu.matmul %202, %203, %cst_91 {dimension_numbers = #tpu.dot_dimension_numbers<[1], [0], [0], [1], [0, 0, 1, 1], [], []>} : vector<5x32xf32>, vector<32x128xf32>, vector<5x128xf32> -> vector<5x128xf32>
    %205 = arith.addf %182, %204 : vector<5x128xf32>
    %206 = vector.extract_strided_slice %45 {offsets = [5, 96], sizes = [5, 32], strides = [1, 1]} : vector<10x384xf32> to vector<5x32xf32>
    %207 = vector.extract_strided_slice %45 {offsets = [5, 224], sizes = [5, 32], strides = [1, 1]} : vector<10x384xf32> to vector<5x32xf32>
    %208 = vector.extract_strided_slice %45 {offsets = [5, 352], sizes = [5, 32], strides = [1, 1]} : vector<10x384xf32> to vector<5x32xf32>
    %cst_92 = arith.constant dense<0.000000e+00> : vector<5x5xf32>
    %209 = tpu.matmul %206, %207, %cst_92 {dimension_numbers = #tpu.dot_dimension_numbers<[1], [1], [0], [0], [0, 0, 1, 0], [], []>} : vector<5x32xf32>, vector<5x32xf32>, vector<5x5xf32> -> vector<5x5xf32>
    %cst_93 = arith.constant 0.176776692 : f32
    %210 = vector.broadcast %cst_93 : f32 to vector<5x5xf32>
    %211 = arith.mulf %209, %210 : vector<5x5xf32>
    %cst_94 = arith.constant dense<0xFF800000> : vector<5xf32>
    %212 = vector.multi_reduction <maximumf>, %211, %cst_94 [1] : vector<5x5xf32> to vector<5xf32>
    %213 = vector.shape_cast %212 : vector<5xf32> to vector<5x1xf32>
    %214 = vector.broadcast %213 : vector<5x1xf32> to vector<5x5xf32>
    %215 = arith.subf %211, %214 : vector<5x5xf32>
    %216 = math.exp %215 : vector<5x5xf32>
    %cst_95 = arith.constant dense<0.000000e+00> : vector<5xf32>
    %217 = vector.multi_reduction <add>, %216, %cst_95 [1] : vector<5x5xf32> to vector<5xf32>
    %218 = vector.shape_cast %217 : vector<5xf32> to vector<5x1xf32>
    %219 = tpu.reciprocal %218 {approx = true} : vector<5x1xf32> -> vector<5x1xf32>
    %220 = vector.broadcast %219 : vector<5x1xf32> to vector<5x5xf32>
    %221 = arith.mulf %216, %220 : vector<5x5xf32>
    %c1_96 = arith.constant 1 : index
    %c3_97 = arith.constant 3 : index
    %c0_98 = arith.constant 0 : index
    %c0_99 = arith.constant 0 : index
    %222 = vector.load %arg34[%c1_96, %c3_97, %c0_98, %c0_99] : memref<2x4x5x5xf32, #tpu.memory_space<vmem>>, vector<1x1x5x5xf32>
    %223 = vector.shape_cast %222 : vector<1x1x5x5xf32> to vector<5x5xf32>
    %224 = vector.shape_cast %221 : vector<5x5xf32> to vector<1x1x5x5xf32>
    tpu.vector_store %arg34[%c1_96, %c3_97, %c0_98, %c0_99], %224 {strides = array<i32>} : memref<2x4x5x5xf32, #tpu.memory_space<vmem>>, vector<1x1x5x5xf32>,
    %cst_100 = arith.constant dense<0.000000e+00> : vector<5x32xf32>
    %225 = tpu.matmul %221, %208, %cst_100 {dimension_numbers = #tpu.dot_dimension_numbers<[1], [0], [0], [1], [0, 0, 1, 1], [], []>} : vector<5x5xf32>, vector<5x32xf32>, vector<5x32xf32> -> vector<5x32xf32>
    %226 = vector.extract_strided_slice %46 {offsets = [96, 0], sizes = [32, 128], strides = [1, 1]} : vector<128x128xf32> to vector<32x128xf32>
    %cst_101 = arith.constant dense<0.000000e+00> : vector<5x128xf32>
    %227 = tpu.matmul %225, %226, %cst_101 {dimension_numbers = #tpu.dot_dimension_numbers<[1], [0], [0], [1], [0, 0, 1, 1], [], []>} : vector<5x32xf32>, vector<32x128xf32>, vector<5x128xf32> -> vector<5x128xf32>
    %228 = arith.addf %205, %227 : vector<5x128xf32>
    %229 = tpu.concatenate %137, %228 in 0 : vector<5x128xf32>, vector<5x128xf32> -> vector<10x128xf32>
    %c0_102 = arith.constant 0 : index
    %c0_103 = arith.constant 0 : index
    %230 = vector.load %arg10[%c0_102, %c0_103] : memref<1x128xf32, #tpu.memory_space<vmem>>, vector<1x128xf32>
    %231 = vector.broadcast %230 : vector<1x128xf32> to vector<10x128xf32>
    %232 = arith.addf %229, %231 : vector<10x128xf32>
    %233 = arith.addf %16, %232 : vector<10x128xf32>
    %c0_104 = arith.constant 0 : index
    %c0_105 = arith.constant 0 : index
    %234 = vector.load %arg11[%c0_104, %c0_105] : memref<1x128xf32, #tpu.memory_space<vmem>>, vector<1x128xf32>
    %c0_106 = arith.constant 0 : index
    %c0_107 = arith.constant 0 : index
    %235 = vector.load %arg12[%c0_106, %c0_107] : memref<1x128xf32, #tpu.memory_space<vmem>>, vector<1x128xf32>
    %cst_108 = arith.constant dense<0.000000e+00> : vector<10xf32>
    %236 = vector.multi_reduction <add>, %233, %cst_108 [1] : vector<10x128xf32> to vector<10xf32>
    %237 = vector.shape_cast %236 : vector<10xf32> to vector<10x1xf32>
    %cst_109 = arith.constant 1.280000e+02 : f32
    %238 = vector.broadcast %cst_109 : f32 to vector<10x1xf32>
    %239 = arith.divf %237, %238 : vector<10x1xf32>
    %240 = vector.broadcast %239 : vector<10x1xf32> to vector<10x128xf32>
    %241 = arith.subf %233, %240 : vector<10x128xf32>
    %242 = arith.mulf %241, %241 : vector<10x128xf32>
    %cst_110 = arith.constant dense<0.000000e+00> : vector<10xf32>
    %243 = vector.multi_reduction <add>, %242, %cst_110 [1] : vector<10x128xf32> to vector<10xf32>
    %244 = vector.shape_cast %243 : vector<10xf32> to vector<10x1xf32>
    %cst_111 = arith.constant 1.280000e+02 : f32
    %245 = vector.broadcast %cst_111 : f32 to vector<10x1xf32>
    %246 = arith.divf %244, %245 : vector<10x1xf32>
    %247 = vector.broadcast %239 : vector<10x1xf32> to vector<10x128xf32>
    %248 = arith.subf %233, %247 : vector<10x128xf32>
    %cst_112 = arith.constant 9.99999974E-6 : f32
    %249 = vector.broadcast %cst_112 : f32 to vector<10x1xf32>
    %250 = arith.addf %246, %249 : vector<10x1xf32>
    %251 = math.rsqrt %250 : vector<10x1xf32>
    %252 = vector.broadcast %251 : vector<10x1xf32> to vector<10x128xf32>
    %253 = arith.mulf %248, %252 : vector<10x128xf32>
    %254 = vector.broadcast %234 : vector<1x128xf32> to vector<10x128xf32>
    %255 = arith.mulf %253, %254 : vector<10x128xf32>
    %256 = vector.broadcast %235 : vector<1x128xf32> to vector<10x128xf32>
    %257 = arith.addf %255, %256 : vector<10x128xf32>
    %c0_113 = arith.constant 0 : index
    %c0_114 = arith.constant 0 : index
    %258 = vector.load %arg13[%c0_113, %c0_114] : memref<128x512xf32, #tpu.memory_space<vmem>>, vector<128x512xf32>
    %cst_115 = arith.constant dense<0.000000e+00> : vector<10x512xf32>
    %259 = tpu.matmul %257, %258, %cst_115 {dimension_numbers = #tpu.dot_dimension_numbers<[1], [0], [0], [1], [0, 0, 1, 1], [], []>} : vector<10x128xf32>, vector<128x512xf32>, vector<10x512xf32> -> vector<10x512xf32>
    %c0_116 = arith.constant 0 : index
    %c0_117 = arith.constant 0 : index
    %260 = vector.load %arg14[%c0_116, %c0_117] : memref<1x512xf32, #tpu.memory_space<vmem>>, vector<1x512xf32>
    %261 = vector.broadcast %260 : vector<1x512xf32> to vector<10x512xf32>
    %262 = arith.addf %259, %261 : vector<10x512xf32>
    %263 = arith.mulf %262, %262 : vector<10x512xf32>
    %264 = arith.mulf %262, %263 : vector<10x512xf32>
    %cst_118 = arith.constant 4.471500e-02 : f32
    %265 = vector.broadcast %cst_118 : f32 to vector<10x512xf32>
    %266 = arith.mulf %265, %264 : vector<10x512xf32>
    %267 = arith.addf %262, %266 : vector<10x512xf32>
    %cst_119 = arith.constant 0.797884583 : f32
    %268 = vector.broadcast %cst_119 : f32 to vector<10x512xf32>
    %269 = arith.mulf %268, %267 : vector<10x512xf32>
    %270 = math.tanh %269 : vector<10x512xf32>
    %cst_120 = arith.constant 1.000000e+00 : f32
    %271 = vector.broadcast %cst_120 : f32 to vector<10x512xf32>
    %272 = arith.addf %271, %270 : vector<10x512xf32>
    %cst_121 = arith.constant 5.000000e-01 : f32
    %273 = vector.broadcast %cst_121 : f32 to vector<10x512xf32>
    %274 = arith.mulf %273, %272 : vector<10x512xf32>
    %275 = arith.mulf %262, %274 : vector<10x512xf32>
    %c0_122 = arith.constant 0 : index
    %c0_123 = arith.constant 0 : index
    %276 = vector.load %arg15[%c0_122, %c0_123] : memref<512x128xf32, #tpu.memory_space<vmem>>, vector<512x128xf32>
    %cst_124 = arith.constant dense<0.000000e+00> : vector<10x128xf32>
    %277 = tpu.matmul %275, %276, %cst_124 {dimension_numbers = #tpu.dot_dimension_numbers<[1], [0], [0], [1], [0, 0, 1, 1], [], []>} : vector<10x512xf32>, vector<512x128xf32>, vector<10x128xf32> -> vector<10x128xf32>
    %c0_125 = arith.constant 0 : index
    %c0_126 = arith.constant 0 : index
    %278 = vector.load %arg16[%c0_125, %c0_126] : memref<1x128xf32, #tpu.memory_space<vmem>>, vector<1x128xf32>
    %279 = vector.broadcast %278 : vector<1x128xf32> to vector<10x128xf32>
    %280 = arith.addf %277, %279 : vector<10x128xf32>
    %281 = arith.addf %233, %280 : vector<10x128xf32>
    %c0_127 = arith.constant 0 : index
    %c0_128 = arith.constant 0 : index
    %282 = vector.load %arg17[%c0_127, %c0_128] : memref<1x128xf32, #tpu.memory_space<vmem>>, vector<1x128xf32>
    %c0_129 = arith.constant 0 : index
    %c0_130 = arith.constant 0 : index
    %283 = vector.load %arg18[%c0_129, %c0_130] : memref<1x128xf32, #tpu.memory_space<vmem>>, vector<1x128xf32>
    %cst_131 = arith.constant dense<0.000000e+00> : vector<10xf32>
    %284 = vector.multi_reduction <add>, %281, %cst_131 [1] : vector<10x128xf32> to vector<10xf32>
    %285 = vector.shape_cast %284 : vector<10xf32> to vector<10x1xf32>
    %cst_132 = arith.constant 1.280000e+02 : f32
    %286 = vector.broadcast %cst_132 : f32 to vector<10x1xf32>
    %287 = arith.divf %285, %286 : vector<10x1xf32>
    %288 = vector.broadcast %287 : vector<10x1xf32> to vector<10x128xf32>
    %289 = arith.subf %281, %288 : vector<10x128xf32>
    %290 = arith.mulf %289, %289 : vector<10x128xf32>
    %cst_133 = arith.constant dense<0.000000e+00> : vector<10xf32>
    %291 = vector.multi_reduction <add>, %290, %cst_133 [1] : vector<10x128xf32> to vector<10xf32>
    %292 = vector.shape_cast %291 : vector<10xf32> to vector<10x1xf32>
    %cst_134 = arith.constant 1.280000e+02 : f32
    %293 = vector.broadcast %cst_134 : f32 to vector<10x1xf32>
    %294 = arith.divf %292, %293 : vector<10x1xf32>
    %295 = vector.broadcast %287 : vector<10x1xf32> to vector<10x128xf32>
    %296 = arith.subf %281, %295 : vector<10x128xf32>
    %cst_135 = arith.constant 9.99999974E-6 : f32
    %297 = vector.broadcast %cst_135 : f32 to vector<10x1xf32>
    %298 = arith.addf %294, %297 : vector<10x1xf32>
    %299 = math.rsqrt %298 : vector<10x1xf32>
    %300 = vector.broadcast %299 : vector<10x1xf32> to vector<10x128xf32>
    %301 = arith.mulf %296, %300 : vector<10x128xf32>
    %302 = vector.broadcast %282 : vector<1x128xf32> to vector<10x128xf32>
    %303 = arith.mulf %301, %302 : vector<10x128xf32>
    %304 = vector.broadcast %283 : vector<1x128xf32> to vector<10x128xf32>
    %305 = arith.addf %303, %304 : vector<10x128xf32>
    %c0_136 = arith.constant 0 : index
    %c0_137 = arith.constant 0 : index
    %306 = vector.load %arg19[%c0_136, %c0_137] : memref<128x384xf32, #tpu.memory_space<vmem>>, vector<128x384xf32>
    %cst_138 = arith.constant dense<0.000000e+00> : vector<10x384xf32>
    %307 = tpu.matmul %305, %306, %cst_138 {dimension_numbers = #tpu.dot_dimension_numbers<[1], [0], [0], [1], [0, 0, 1, 1], [], []>} : vector<10x128xf32>, vector<128x384xf32>, vector<10x384xf32> -> vector<10x384xf32>
    %c0_139 = arith.constant 0 : index
    %c0_140 = arith.constant 0 : index
    %308 = vector.load %arg20[%c0_139, %c0_140] : memref<1x384xf32, #tpu.memory_space<vmem>>, vector<1x384xf32>
    %309 = vector.broadcast %308 : vector<1x384xf32> to vector<10x384xf32>
    %310 = arith.addf %307, %309 : vector<10x384xf32>
    %c0_141 = arith.constant 0 : index
    %c0_142 = arith.constant 0 : index
    %311 = vector.load %arg21[%c0_141, %c0_142] : memref<128x128xf32, #tpu.memory_space<vmem>>, vector<128x128xf32>
    %312 = vector.extract_strided_slice %310 {offsets = [0, 0], sizes = [5, 32], strides = [1, 1]} : vector<10x384xf32> to vector<5x32xf32>
    %313 = vector.extract_strided_slice %310 {offsets = [0, 128], sizes = [5, 32], strides = [1, 1]} : vector<10x384xf32> to vector<5x32xf32>
    %314 = vector.extract_strided_slice %310 {offsets = [0, 256], sizes = [5, 32], strides = [1, 1]} : vector<10x384xf32> to vector<5x32xf32>
    %cst_143 = arith.constant dense<0.000000e+00> : vector<5x5xf32>
    %315 = tpu.matmul %312, %313, %cst_143 {dimension_numbers = #tpu.dot_dimension_numbers<[1], [1], [0], [0], [0, 0, 1, 0], [], []>} : vector<5x32xf32>, vector<5x32xf32>, vector<5x5xf32> -> vector<5x5xf32>
    %cst_144 = arith.constant 0.176776692 : f32
    %316 = vector.broadcast %cst_144 : f32 to vector<5x5xf32>
    %317 = arith.mulf %315, %316 : vector<5x5xf32>
    %cst_145 = arith.constant dense<0xFF800000> : vector<5xf32>
    %318 = vector.multi_reduction <maximumf>, %317, %cst_145 [1] : vector<5x5xf32> to vector<5xf32>
    %319 = vector.shape_cast %318 : vector<5xf32> to vector<5x1xf32>
    %320 = vector.broadcast %319 : vector<5x1xf32> to vector<5x5xf32>
    %321 = arith.subf %317, %320 : vector<5x5xf32>
    %322 = math.exp %321 : vector<5x5xf32>
    %cst_146 = arith.constant dense<0.000000e+00> : vector<5xf32>
    %323 = vector.multi_reduction <add>, %322, %cst_146 [1] : vector<5x5xf32> to vector<5xf32>
    %324 = vector.shape_cast %323 : vector<5xf32> to vector<5x1xf32>
    %325 = tpu.reciprocal %324 {approx = true} : vector<5x1xf32> -> vector<5x1xf32>
    %326 = vector.broadcast %325 : vector<5x1xf32> to vector<5x5xf32>
    %327 = arith.mulf %322, %326 : vector<5x5xf32>
    %c0_147 = arith.constant 0 : index
    %c0_148 = arith.constant 0 : index
    %c0_149 = arith.constant 0 : index
    %c0_150 = arith.constant 0 : index
    %328 = vector.load %arg35[%c0_147, %c0_148, %c0_149, %c0_150] : memref<2x4x5x5xf32, #tpu.memory_space<vmem>>, vector<1x1x5x5xf32>
    %329 = vector.shape_cast %328 : vector<1x1x5x5xf32> to vector<5x5xf32>
    %330 = vector.shape_cast %327 : vector<5x5xf32> to vector<1x1x5x5xf32>
    tpu.vector_store %arg35[%c0_147, %c0_148, %c0_149, %c0_150], %330 {strides = array<i32>} : memref<2x4x5x5xf32, #tpu.memory_space<vmem>>, vector<1x1x5x5xf32>,
    %cst_151 = arith.constant dense<0.000000e+00> : vector<5x32xf32>
    %331 = tpu.matmul %327, %314, %cst_151 {dimension_numbers = #tpu.dot_dimension_numbers<[1], [0], [0], [1], [0, 0, 1, 1], [], []>} : vector<5x5xf32>, vector<5x32xf32>, vector<5x32xf32> -> vector<5x32xf32>
    %332 = vector.extract_strided_slice %311 {offsets = [0, 0], sizes = [32, 128], strides = [1, 1]} : vector<128x128xf32> to vector<32x128xf32>
    %cst_152 = arith.constant dense<0.000000e+00> : vector<5x128xf32>
    %333 = tpu.matmul %331, %332, %cst_152 {dimension_numbers = #tpu.dot_dimension_numbers<[1], [0], [0], [1], [0, 0, 1, 1], [], []>} : vector<5x32xf32>, vector<32x128xf32>, vector<5x128xf32> -> vector<5x128xf32>
    %334 = vector.extract_strided_slice %310 {offsets = [0, 32], sizes = [5, 32], strides = [1, 1]} : vector<10x384xf32> to vector<5x32xf32>
    %335 = vector.extract_strided_slice %310 {offsets = [0, 160], sizes = [5, 32], strides = [1, 1]} : vector<10x384xf32> to vector<5x32xf32>
    %336 = vector.extract_strided_slice %310 {offsets = [0, 288], sizes = [5, 32], strides = [1, 1]} : vector<10x384xf32> to vector<5x32xf32>
    %cst_153 = arith.constant dense<0.000000e+00> : vector<5x5xf32>
    %337 = tpu.matmul %334, %335, %cst_153 {dimension_numbers = #tpu.dot_dimension_numbers<[1], [1], [0], [0], [0, 0, 1, 0], [], []>} : vector<5x32xf32>, vector<5x32xf32>, vector<5x5xf32> -> vector<5x5xf32>
    %cst_154 = arith.constant 0.176776692 : f32
    %338 = vector.broadcast %cst_154 : f32 to vector<5x5xf32>
    %339 = arith.mulf %337, %338 : vector<5x5xf32>
    %cst_155 = arith.constant dense<0xFF800000> : vector<5xf32>
    %340 = vector.multi_reduction <maximumf>, %339, %cst_155 [1] : vector<5x5xf32> to vector<5xf32>
    %341 = vector.shape_cast %340 : vector<5xf32> to vector<5x1xf32>
    %342 = vector.broadcast %341 : vector<5x1xf32> to vector<5x5xf32>
    %343 = arith.subf %339, %342 : vector<5x5xf32>
    %344 = math.exp %343 : vector<5x5xf32>
    %cst_156 = arith.constant dense<0.000000e+00> : vector<5xf32>
    %345 = vector.multi_reduction <add>, %344, %cst_156 [1] : vector<5x5xf32> to vector<5xf32>
    %346 = vector.shape_cast %345 : vector<5xf32> to vector<5x1xf32>
    %347 = tpu.reciprocal %346 {approx = true} : vector<5x1xf32> -> vector<5x1xf32>
    %348 = vector.broadcast %347 : vector<5x1xf32> to vector<5x5xf32>
    %349 = arith.mulf %344, %348 : vector<5x5xf32>
    %c0_157 = arith.constant 0 : index
    %c1_158 = arith.constant 1 : index
    %c0_159 = arith.constant 0 : index
    %c0_160 = arith.constant 0 : index
    %350 = vector.load %arg35[%c0_157, %c1_158, %c0_159, %c0_160] : memref<2x4x5x5xf32, #tpu.memory_space<vmem>>, vector<1x1x5x5xf32>
    %351 = vector.shape_cast %350 : vector<1x1x5x5xf32> to vector<5x5xf32>
    %352 = vector.shape_cast %349 : vector<5x5xf32> to vector<1x1x5x5xf32>
    tpu.vector_store %arg35[%c0_157, %c1_158, %c0_159, %c0_160], %352 {strides = array<i32>} : memref<2x4x5x5xf32, #tpu.memory_space<vmem>>, vector<1x1x5x5xf32>,
    %cst_161 = arith.constant dense<0.000000e+00> : vector<5x32xf32>
    %353 = tpu.matmul %349, %336, %cst_161 {dimension_numbers = #tpu.dot_dimension_numbers<[1], [0], [0], [1], [0, 0, 1, 1], [], []>} : vector<5x5xf32>, vector<5x32xf32>, vector<5x32xf32> -> vector<5x32xf32>
    %354 = vector.extract_strided_slice %311 {offsets = [32, 0], sizes = [32, 128], strides = [1, 1]} : vector<128x128xf32> to vector<32x128xf32>
    %cst_162 = arith.constant dense<0.000000e+00> : vector<5x128xf32>
    %355 = tpu.matmul %353, %354, %cst_162 {dimension_numbers = #tpu.dot_dimension_numbers<[1], [0], [0], [1], [0, 0, 1, 1], [], []>} : vector<5x32xf32>, vector<32x128xf32>, vector<5x128xf32> -> vector<5x128xf32>
    %356 = arith.addf %333, %355 : vector<5x128xf32>
    %357 = vector.extract_strided_slice %310 {offsets = [0, 64], sizes = [5, 32], strides = [1, 1]} : vector<10x384xf32> to vector<5x32xf32>
    %358 = vector.extract_strided_slice %310 {offsets = [0, 192], sizes = [5, 32], strides = [1, 1]} : vector<10x384xf32> to vector<5x32xf32>
    %359 = vector.extract_strided_slice %310 {offsets = [0, 320], sizes = [5, 32], strides = [1, 1]} : vector<10x384xf32> to vector<5x32xf32>
    %cst_163 = arith.constant dense<0.000000e+00> : vector<5x5xf32>
    %360 = tpu.matmul %357, %358, %cst_163 {dimension_numbers = #tpu.dot_dimension_numbers<[1], [1], [0], [0], [0, 0, 1, 0], [], []>} : vector<5x32xf32>, vector<5x32xf32>, vector<5x5xf32> -> vector<5x5xf32>
    %cst_164 = arith.constant 0.176776692 : f32
    %361 = vector.broadcast %cst_164 : f32 to vector<5x5xf32>
    %362 = arith.mulf %360, %361 : vector<5x5xf32>
    %cst_165 = arith.constant dense<0xFF800000> : vector<5xf32>
    %363 = vector.multi_reduction <maximumf>, %362, %cst_165 [1] : vector<5x5xf32> to vector<5xf32>
    %364 = vector.shape_cast %363 : vector<5xf32> to vector<5x1xf32>
    %365 = vector.broadcast %364 : vector<5x1xf32> to vector<5x5xf32>
    %366 = arith.subf %362, %365 : vector<5x5xf32>
    %367 = math.exp %366 : vector<5x5xf32>
    %cst_166 = arith.constant dense<0.000000e+00> : vector<5xf32>
    %368 = vector.multi_reduction <add>, %367, %cst_166 [1] : vector<5x5xf32> to vector<5xf32>
    %369 = vector.shape_cast %368 : vector<5xf32> to vector<5x1xf32>
    %370 = tpu.reciprocal %369 {approx = true} : vector<5x1xf32> -> vector<5x1xf32>
    %371 = vector.broadcast %370 : vector<5x1xf32> to vector<5x5xf32>
    %372 = arith.mulf %367, %371 : vector<5x5xf32>
    %c0_167 = arith.constant 0 : index
    %c2_168 = arith.constant 2 : index
    %c0_169 = arith.constant 0 : index
    %c0_170 = arith.constant 0 : index
    %373 = vector.load %arg35[%c0_167, %c2_168, %c0_169, %c0_170] : memref<2x4x5x5xf32, #tpu.memory_space<vmem>>, vector<1x1x5x5xf32>
    %374 = vector.shape_cast %373 : vector<1x1x5x5xf32> to vector<5x5xf32>
    %375 = vector.shape_cast %372 : vector<5x5xf32> to vector<1x1x5x5xf32>
    tpu.vector_store %arg35[%c0_167, %c2_168, %c0_169, %c0_170], %375 {strides = array<i32>} : memref<2x4x5x5xf32, #tpu.memory_space<vmem>>, vector<1x1x5x5xf32>,
    %cst_171 = arith.constant dense<0.000000e+00> : vector<5x32xf32>
    %376 = tpu.matmul %372, %359, %cst_171 {dimension_numbers = #tpu.dot_dimension_numbers<[1], [0], [0], [1], [0, 0, 1, 1], [], []>} : vector<5x5xf32>, vector<5x32xf32>, vector<5x32xf32> -> vector<5x32xf32>
    %377 = vector.extract_strided_slice %311 {offsets = [64, 0], sizes = [32, 128], strides = [1, 1]} : vector<128x128xf32> to vector<32x128xf32>
    %cst_172 = arith.constant dense<0.000000e+00> : vector<5x128xf32>
    %378 = tpu.matmul %376, %377, %cst_172 {dimension_numbers = #tpu.dot_dimension_numbers<[1], [0], [0], [1], [0, 0, 1, 1], [], []>} : vector<5x32xf32>, vector<32x128xf32>, vector<5x128xf32> -> vector<5x128xf32>
    %379 = arith.addf %356, %378 : vector<5x128xf32>
    %380 = vector.extract_strided_slice %310 {offsets = [0, 96], sizes = [5, 32], strides = [1, 1]} : vector<10x384xf32> to vector<5x32xf32>
    %381 = vector.extract_strided_slice %310 {offsets = [0, 224], sizes = [5, 32], strides = [1, 1]} : vector<10x384xf32> to vector<5x32xf32>
    %382 = vector.extract_strided_slice %310 {offsets = [0, 352], sizes = [5, 32], strides = [1, 1]} : vector<10x384xf32> to vector<5x32xf32>
    %cst_173 = arith.constant dense<0.000000e+00> : vector<5x5xf32>
    %383 = tpu.matmul %380, %381, %cst_173 {dimension_numbers = #tpu.dot_dimension_numbers<[1], [1], [0], [0], [0, 0, 1, 0], [], []>} : vector<5x32xf32>, vector<5x32xf32>, vector<5x5xf32> -> vector<5x5xf32>
    %cst_174 = arith.constant 0.176776692 : f32
    %384 = vector.broadcast %cst_174 : f32 to vector<5x5xf32>
    %385 = arith.mulf %383, %384 : vector<5x5xf32>
    %cst_175 = arith.constant dense<0xFF800000> : vector<5xf32>
    %386 = vector.multi_reduction <maximumf>, %385, %cst_175 [1] : vector<5x5xf32> to vector<5xf32>
    %387 = vector.shape_cast %386 : vector<5xf32> to vector<5x1xf32>
    %388 = vector.broadcast %387 : vector<5x1xf32> to vector<5x5xf32>
    %389 = arith.subf %385, %388 : vector<5x5xf32>
    %390 = math.exp %389 : vector<5x5xf32>
    %cst_176 = arith.constant dense<0.000000e+00> : vector<5xf32>
    %391 = vector.multi_reduction <add>, %390, %cst_176 [1] : vector<5x5xf32> to vector<5xf32>
    %392 = vector.shape_cast %391 : vector<5xf32> to vector<5x1xf32>
    %393 = tpu.reciprocal %392 {approx = true} : vector<5x1xf32> -> vector<5x1xf32>
    %394 = vector.broadcast %393 : vector<5x1xf32> to vector<5x5xf32>
    %395 = arith.mulf %390, %394 : vector<5x5xf32>
    %c0_177 = arith.constant 0 : index
    %c3_178 = arith.constant 3 : index
    %c0_179 = arith.constant 0 : index
    %c0_180 = arith.constant 0 : index
    %396 = vector.load %arg35[%c0_177, %c3_178, %c0_179, %c0_180] : memref<2x4x5x5xf32, #tpu.memory_space<vmem>>, vector<1x1x5x5xf32>
    %397 = vector.shape_cast %396 : vector<1x1x5x5xf32> to vector<5x5xf32>
    %398 = vector.shape_cast %395 : vector<5x5xf32> to vector<1x1x5x5xf32>
    tpu.vector_store %arg35[%c0_177, %c3_178, %c0_179, %c0_180], %398 {strides = array<i32>} : memref<2x4x5x5xf32, #tpu.memory_space<vmem>>, vector<1x1x5x5xf32>,
    %cst_181 = arith.constant dense<0.000000e+00> : vector<5x32xf32>
    %399 = tpu.matmul %395, %382, %cst_181 {dimension_numbers = #tpu.dot_dimension_numbers<[1], [0], [0], [1], [0, 0, 1, 1], [], []>} : vector<5x5xf32>, vector<5x32xf32>, vector<5x32xf32> -> vector<5x32xf32>
    %400 = vector.extract_strided_slice %311 {offsets = [96, 0], sizes = [32, 128], strides = [1, 1]} : vector<128x128xf32> to vector<32x128xf32>
    %cst_182 = arith.constant dense<0.000000e+00> : vector<5x128xf32>
    %401 = tpu.matmul %399, %400, %cst_182 {dimension_numbers = #tpu.dot_dimension_numbers<[1], [0], [0], [1], [0, 0, 1, 1], [], []>} : vector<5x32xf32>, vector<32x128xf32>, vector<5x128xf32> -> vector<5x128xf32>
    %402 = arith.addf %379, %401 : vector<5x128xf32>
    %403 = vector.extract_strided_slice %310 {offsets = [5, 0], sizes = [5, 32], strides = [1, 1]} : vector<10x384xf32> to vector<5x32xf32>
    %404 = vector.extract_strided_slice %310 {offsets = [5, 128], sizes = [5, 32], strides = [1, 1]} : vector<10x384xf32> to vector<5x32xf32>
    %405 = vector.extract_strided_slice %310 {offsets = [5, 256], sizes = [5, 32], strides = [1, 1]} : vector<10x384xf32> to vector<5x32xf32>
    %cst_183 = arith.constant dense<0.000000e+00> : vector<5x5xf32>
    %406 = tpu.matmul %403, %404, %cst_183 {dimension_numbers = #tpu.dot_dimension_numbers<[1], [1], [0], [0], [0, 0, 1, 0], [], []>} : vector<5x32xf32>, vector<5x32xf32>, vector<5x5xf32> -> vector<5x5xf32>
    %cst_184 = arith.constant 0.176776692 : f32
    %407 = vector.broadcast %cst_184 : f32 to vector<5x5xf32>
    %408 = arith.mulf %406, %407 : vector<5x5xf32>
    %cst_185 = arith.constant dense<0xFF800000> : vector<5xf32>
    %409 = vector.multi_reduction <maximumf>, %408, %cst_185 [1] : vector<5x5xf32> to vector<5xf32>
    %410 = vector.shape_cast %409 : vector<5xf32> to vector<5x1xf32>
    %411 = vector.broadcast %410 : vector<5x1xf32> to vector<5x5xf32>
    %412 = arith.subf %408, %411 : vector<5x5xf32>
    %413 = math.exp %412 : vector<5x5xf32>
    %cst_186 = arith.constant dense<0.000000e+00> : vector<5xf32>
    %414 = vector.multi_reduction <add>, %413, %cst_186 [1] : vector<5x5xf32> to vector<5xf32>
    %415 = vector.shape_cast %414 : vector<5xf32> to vector<5x1xf32>
    %416 = tpu.reciprocal %415 {approx = true} : vector<5x1xf32> -> vector<5x1xf32>
    %417 = vector.broadcast %416 : vector<5x1xf32> to vector<5x5xf32>
    %418 = arith.mulf %413, %417 : vector<5x5xf32>
    %c1_187 = arith.constant 1 : index
    %c0_188 = arith.constant 0 : index
    %c0_189 = arith.constant 0 : index
    %c0_190 = arith.constant 0 : index
    %419 = vector.load %arg35[%c1_187, %c0_188, %c0_189, %c0_190] : memref<2x4x5x5xf32, #tpu.memory_space<vmem>>, vector<1x1x5x5xf32>
    %420 = vector.shape_cast %419 : vector<1x1x5x5xf32> to vector<5x5xf32>
    %421 = vector.shape_cast %418 : vector<5x5xf32> to vector<1x1x5x5xf32>
    tpu.vector_store %arg35[%c1_187, %c0_188, %c0_189, %c0_190], %421 {strides = array<i32>} : memref<2x4x5x5xf32, #tpu.memory_space<vmem>>, vector<1x1x5x5xf32>,
    %cst_191 = arith.constant dense<0.000000e+00> : vector<5x32xf32>
    %422 = tpu.matmul %418, %405, %cst_191 {dimension_numbers = #tpu.dot_dimension_numbers<[1], [0], [0], [1], [0, 0, 1, 1], [], []>} : vector<5x5xf32>, vector<5x32xf32>, vector<5x32xf32> -> vector<5x32xf32>
    %423 = vector.extract_strided_slice %311 {offsets = [0, 0], sizes = [32, 128], strides = [1, 1]} : vector<128x128xf32> to vector<32x128xf32>
    %cst_192 = arith.constant dense<0.000000e+00> : vector<5x128xf32>
    %424 = tpu.matmul %422, %423, %cst_192 {dimension_numbers = #tpu.dot_dimension_numbers<[1], [0], [0], [1], [0, 0, 1, 1], [], []>} : vector<5x32xf32>, vector<32x128xf32>, vector<5x128xf32> -> vector<5x128xf32>
    %425 = vector.extract_strided_slice %310 {offsets = [5, 32], sizes = [5, 32], strides = [1, 1]} : vector<10x384xf32> to vector<5x32xf32>
    %426 = vector.extract_strided_slice %310 {offsets = [5, 160], sizes = [5, 32], strides = [1, 1]} : vector<10x384xf32> to vector<5x32xf32>
    %427 = vector.extract_strided_slice %310 {offsets = [5, 288], sizes = [5, 32], strides = [1, 1]} : vector<10x384xf32> to vector<5x32xf32>
    %cst_193 = arith.constant dense<0.000000e+00> : vector<5x5xf32>
    %428 = tpu.matmul %425, %426, %cst_193 {dimension_numbers = #tpu.dot_dimension_numbers<[1], [1], [0], [0], [0, 0, 1, 0], [], []>} : vector<5x32xf32>, vector<5x32xf32>, vector<5x5xf32> -> vector<5x5xf32>
    %cst_194 = arith.constant 0.176776692 : f32
    %429 = vector.broadcast %cst_194 : f32 to vector<5x5xf32>
    %430 = arith.mulf %428, %429 : vector<5x5xf32>
    %cst_195 = arith.constant dense<0xFF800000> : vector<5xf32>
    %431 = vector.multi_reduction <maximumf>, %430, %cst_195 [1] : vector<5x5xf32> to vector<5xf32>
    %432 = vector.shape_cast %431 : vector<5xf32> to vector<5x1xf32>
    %433 = vector.broadcast %432 : vector<5x1xf32> to vector<5x5xf32>
    %434 = arith.subf %430, %433 : vector<5x5xf32>
    %435 = math.exp %434 : vector<5x5xf32>
    %cst_196 = arith.constant dense<0.000000e+00> : vector<5xf32>
    %436 = vector.multi_reduction <add>, %435, %cst_196 [1] : vector<5x5xf32> to vector<5xf32>
    %437 = vector.shape_cast %436 : vector<5xf32> to vector<5x1xf32>
    %438 = tpu.reciprocal %437 {approx = true} : vector<5x1xf32> -> vector<5x1xf32>
    %439 = vector.broadcast %438 : vector<5x1xf32> to vector<5x5xf32>
    %440 = arith.mulf %435, %439 : vector<5x5xf32>
    %c1_197 = arith.constant 1 : index
    %c1_198 = arith.constant 1 : index
    %c0_199 = arith.constant 0 : index
    %c0_200 = arith.constant 0 : index
    %441 = vector.load %arg35[%c1_197, %c1_198, %c0_199, %c0_200] : memref<2x4x5x5xf32, #tpu.memory_space<vmem>>, vector<1x1x5x5xf32>
    %442 = vector.shape_cast %441 : vector<1x1x5x5xf32> to vector<5x5xf32>
    %443 = vector.shape_cast %440 : vector<5x5xf32> to vector<1x1x5x5xf32>
    tpu.vector_store %arg35[%c1_197, %c1_198, %c0_199, %c0_200], %443 {strides = array<i32>} : memref<2x4x5x5xf32, #tpu.memory_space<vmem>>, vector<1x1x5x5xf32>,
    %cst_201 = arith.constant dense<0.000000e+00> : vector<5x32xf32>
    %444 = tpu.matmul %440, %427, %cst_201 {dimension_numbers = #tpu.dot_dimension_numbers<[1], [0], [0], [1], [0, 0, 1, 1], [], []>} : vector<5x5xf32>, vector<5x32xf32>, vector<5x32xf32> -> vector<5x32xf32>
    %445 = vector.extract_strided_slice %311 {offsets = [32, 0], sizes = [32, 128], strides = [1, 1]} : vector<128x128xf32> to vector<32x128xf32>
    %cst_202 = arith.constant dense<0.000000e+00> : vector<5x128xf32>
    %446 = tpu.matmul %444, %445, %cst_202 {dimension_numbers = #tpu.dot_dimension_numbers<[1], [0], [0], [1], [0, 0, 1, 1], [], []>} : vector<5x32xf32>, vector<32x128xf32>, vector<5x128xf32> -> vector<5x128xf32>
    %447 = arith.addf %424, %446 : vector<5x128xf32>
    %448 = vector.extract_strided_slice %310 {offsets = [5, 64], sizes = [5, 32], strides = [1, 1]} : vector<10x384xf32> to vector<5x32xf32>
    %449 = vector.extract_strided_slice %310 {offsets = [5, 192], sizes = [5, 32], strides = [1, 1]} : vector<10x384xf32> to vector<5x32xf32>
    %450 = vector.extract_strided_slice %310 {offsets = [5, 320], sizes = [5, 32], strides = [1, 1]} : vector<10x384xf32> to vector<5x32xf32>
    %cst_203 = arith.constant dense<0.000000e+00> : vector<5x5xf32>
    %451 = tpu.matmul %448, %449, %cst_203 {dimension_numbers = #tpu.dot_dimension_numbers<[1], [1], [0], [0], [0, 0, 1, 0], [], []>} : vector<5x32xf32>, vector<5x32xf32>, vector<5x5xf32> -> vector<5x5xf32>
    %cst_204 = arith.constant 0.176776692 : f32
    %452 = vector.broadcast %cst_204 : f32 to vector<5x5xf32>
    %453 = arith.mulf %451, %452 : vector<5x5xf32>
    %cst_205 = arith.constant dense<0xFF800000> : vector<5xf32>
    %454 = vector.multi_reduction <maximumf>, %453, %cst_205 [1] : vector<5x5xf32> to vector<5xf32>
    %455 = vector.shape_cast %454 : vector<5xf32> to vector<5x1xf32>
    %456 = vector.broadcast %455 : vector<5x1xf32> to vector<5x5xf32>
    %457 = arith.subf %453, %456 : vector<5x5xf32>
    %458 = math.exp %457 : vector<5x5xf32>
    %cst_206 = arith.constant dense<0.000000e+00> : vector<5xf32>
    %459 = vector.multi_reduction <add>, %458, %cst_206 [1] : vector<5x5xf32> to vector<5xf32>
    %460 = vector.shape_cast %459 : vector<5xf32> to vector<5x1xf32>
    %461 = tpu.reciprocal %460 {approx = true} : vector<5x1xf32> -> vector<5x1xf32>
    %462 = vector.broadcast %461 : vector<5x1xf32> to vector<5x5xf32>
    %463 = arith.mulf %458, %462 : vector<5x5xf32>
    %c1_207 = arith.constant 1 : index
    %c2_208 = arith.constant 2 : index
    %c0_209 = arith.constant 0 : index
    %c0_210 = arith.constant 0 : index
    %464 = vector.load %arg35[%c1_207, %c2_208, %c0_209, %c0_210] : memref<2x4x5x5xf32, #tpu.memory_space<vmem>>, vector<1x1x5x5xf32>
    %465 = vector.shape_cast %464 : vector<1x1x5x5xf32> to vector<5x5xf32>
    %466 = vector.shape_cast %463 : vector<5x5xf32> to vector<1x1x5x5xf32>
    tpu.vector_store %arg35[%c1_207, %c2_208, %c0_209, %c0_210], %466 {strides = array<i32>} : memref<2x4x5x5xf32, #tpu.memory_space<vmem>>, vector<1x1x5x5xf32>,
    %cst_211 = arith.constant dense<0.000000e+00> : vector<5x32xf32>
    %467 = tpu.matmul %463, %450, %cst_211 {dimension_numbers = #tpu.dot_dimension_numbers<[1], [0], [0], [1], [0, 0, 1, 1], [], []>} : vector<5x5xf32>, vector<5x32xf32>, vector<5x32xf32> -> vector<5x32xf32>
    %468 = vector.extract_strided_slice %311 {offsets = [64, 0], sizes = [32, 128], strides = [1, 1]} : vector<128x128xf32> to vector<32x128xf32>
    %cst_212 = arith.constant dense<0.000000e+00> : vector<5x128xf32>
    %469 = tpu.matmul %467, %468, %cst_212 {dimension_numbers = #tpu.dot_dimension_numbers<[1], [0], [0], [1], [0, 0, 1, 1], [], []>} : vector<5x32xf32>, vector<32x128xf32>, vector<5x128xf32> -> vector<5x128xf32>
    %470 = arith.addf %447, %469 : vector<5x128xf32>
    %471 = vector.extract_strided_slice %310 {offsets = [5, 96], sizes = [5, 32], strides = [1, 1]} : vector<10x384xf32> to vector<5x32xf32>
    %472 = vector.extract_strided_slice %310 {offsets = [5, 224], sizes = [5, 32], strides = [1, 1]} : vector<10x384xf32> to vector<5x32xf32>
    %473 = vector.extract_strided_slice %310 {offsets = [5, 352], sizes = [5, 32], strides = [1, 1]} : vector<10x384xf32> to vector<5x32xf32>
    %cst_213 = arith.constant dense<0.000000e+00> : vector<5x5xf32>
    %474 = tpu.matmul %471, %472, %cst_213 {dimension_numbers = #tpu.dot_dimension_numbers<[1], [1], [0], [0], [0, 0, 1, 0], [], []>} : vector<5x32xf32>, vector<5x32xf32>, vector<5x5xf32> -> vector<5x5xf32>
    %cst_214 = arith.constant 0.176776692 : f32
    %475 = vector.broadcast %cst_214 : f32 to vector<5x5xf32>
    %476 = arith.mulf %474, %475 : vector<5x5xf32>
    %cst_215 = arith.constant dense<0xFF800000> : vector<5xf32>
    %477 = vector.multi_reduction <maximumf>, %476, %cst_215 [1] : vector<5x5xf32> to vector<5xf32>
    %478 = vector.shape_cast %477 : vector<5xf32> to vector<5x1xf32>
    %479 = vector.broadcast %478 : vector<5x1xf32> to vector<5x5xf32>
    %480 = arith.subf %476, %479 : vector<5x5xf32>
    %481 = math.exp %480 : vector<5x5xf32>
    %cst_216 = arith.constant dense<0.000000e+00> : vector<5xf32>
    %482 = vector.multi_reduction <add>, %481, %cst_216 [1] : vector<5x5xf32> to vector<5xf32>
    %483 = vector.shape_cast %482 : vector<5xf32> to vector<5x1xf32>
    %484 = tpu.reciprocal %483 {approx = true} : vector<5x1xf32> -> vector<5x1xf32>
    %485 = vector.broadcast %484 : vector<5x1xf32> to vector<5x5xf32>
    %486 = arith.mulf %481, %485 : vector<5x5xf32>
    %c1_217 = arith.constant 1 : index
    %c3_218 = arith.constant 3 : index
    %c0_219 = arith.constant 0 : index
    %c0_220 = arith.constant 0 : index
    %487 = vector.load %arg35[%c1_217, %c3_218, %c0_219, %c0_220] : memref<2x4x5x5xf32, #tpu.memory_space<vmem>>, vector<1x1x5x5xf32>
    %488 = vector.shape_cast %487 : vector<1x1x5x5xf32> to vector<5x5xf32>
    %489 = vector.shape_cast %486 : vector<5x5xf32> to vector<1x1x5x5xf32>
    tpu.vector_store %arg35[%c1_217, %c3_218, %c0_219, %c0_220], %489 {strides = array<i32>} : memref<2x4x5x5xf32, #tpu.memory_space<vmem>>, vector<1x1x5x5xf32>,
    %cst_221 = arith.constant dense<0.000000e+00> : vector<5x32xf32>
    %490 = tpu.matmul %486, %473, %cst_221 {dimension_numbers = #tpu.dot_dimension_numbers<[1], [0], [0], [1], [0, 0, 1, 1], [], []>} : vector<5x5xf32>, vector<5x32xf32>, vector<5x32xf32> -> vector<5x32xf32>
    %491 = vector.extract_strided_slice %311 {offsets = [96, 0], sizes = [32, 128], strides = [1, 1]} : vector<128x128xf32> to vector<32x128xf32>
    %cst_222 = arith.constant dense<0.000000e+00> : vector<5x128xf32>
    %492 = tpu.matmul %490, %491, %cst_222 {dimension_numbers = #tpu.dot_dimension_numbers<[1], [0], [0], [1], [0, 0, 1, 1], [], []>} : vector<5x32xf32>, vector<32x128xf32>, vector<5x128xf32> -> vector<5x128xf32>
    %493 = arith.addf %470, %492 : vector<5x128xf32>
    %494 = tpu.concatenate %402, %493 in 0 : vector<5x128xf32>, vector<5x128xf32> -> vector<10x128xf32>
    %c0_223 = arith.constant 0 : index
    %c0_224 = arith.constant 0 : index
    %495 = vector.load %arg22[%c0_223, %c0_224] : memref<1x128xf32, #tpu.memory_space<vmem>>, vector<1x128xf32>
    %496 = vector.broadcast %495 : vector<1x128xf32> to vector<10x128xf32>
    %497 = arith.addf %494, %496 : vector<10x128xf32>
    %498 = arith.addf %281, %497 : vector<10x128xf32>
    %c0_225 = arith.constant 0 : index
    %c0_226 = arith.constant 0 : index
    %499 = vector.load %arg23[%c0_225, %c0_226] : memref<1x128xf32, #tpu.memory_space<vmem>>, vector<1x128xf32>
    %c0_227 = arith.constant 0 : index
    %c0_228 = arith.constant 0 : index
    %500 = vector.load %arg24[%c0_227, %c0_228] : memref<1x128xf32, #tpu.memory_space<vmem>>, vector<1x128xf32>
    %cst_229 = arith.constant dense<0.000000e+00> : vector<10xf32>
    %501 = vector.multi_reduction <add>, %498, %cst_229 [1] : vector<10x128xf32> to vector<10xf32>
    %502 = vector.shape_cast %501 : vector<10xf32> to vector<10x1xf32>
    %cst_230 = arith.constant 1.280000e+02 : f32
    %503 = vector.broadcast %cst_230 : f32 to vector<10x1xf32>
    %504 = arith.divf %502, %503 : vector<10x1xf32>
    %505 = vector.broadcast %504 : vector<10x1xf32> to vector<10x128xf32>
    %506 = arith.subf %498, %505 : vector<10x128xf32>
    %507 = arith.mulf %506, %506 : vector<10x128xf32>
    %cst_231 = arith.constant dense<0.000000e+00> : vector<10xf32>
    %508 = vector.multi_reduction <add>, %507, %cst_231 [1] : vector<10x128xf32> to vector<10xf32>
    %509 = vector.shape_cast %508 : vector<10xf32> to vector<10x1xf32>
    %cst_232 = arith.constant 1.280000e+02 : f32
    %510 = vector.broadcast %cst_232 : f32 to vector<10x1xf32>
    %511 = arith.divf %509, %510 : vector<10x1xf32>
    %512 = vector.broadcast %504 : vector<10x1xf32> to vector<10x128xf32>
    %513 = arith.subf %498, %512 : vector<10x128xf32>
    %cst_233 = arith.constant 9.99999974E-6 : f32
    %514 = vector.broadcast %cst_233 : f32 to vector<10x1xf32>
    %515 = arith.addf %511, %514 : vector<10x1xf32>
    %516 = math.rsqrt %515 : vector<10x1xf32>
    %517 = vector.broadcast %516 : vector<10x1xf32> to vector<10x128xf32>
    %518 = arith.mulf %513, %517 : vector<10x128xf32>
    %519 = vector.broadcast %499 : vector<1x128xf32> to vector<10x128xf32>
    %520 = arith.mulf %518, %519 : vector<10x128xf32>
    %521 = vector.broadcast %500 : vector<1x128xf32> to vector<10x128xf32>
    %522 = arith.addf %520, %521 : vector<10x128xf32>
    %c0_234 = arith.constant 0 : index
    %c0_235 = arith.constant 0 : index
    %523 = vector.load %arg25[%c0_234, %c0_235] : memref<128x512xf32, #tpu.memory_space<vmem>>, vector<128x512xf32>
    %cst_236 = arith.constant dense<0.000000e+00> : vector<10x512xf32>
    %524 = tpu.matmul %522, %523, %cst_236 {dimension_numbers = #tpu.dot_dimension_numbers<[1], [0], [0], [1], [0, 0, 1, 1], [], []>} : vector<10x128xf32>, vector<128x512xf32>, vector<10x512xf32> -> vector<10x512xf32>
    %c0_237 = arith.constant 0 : index
    %c0_238 = arith.constant 0 : index
    %525 = vector.load %arg26[%c0_237, %c0_238] : memref<1x512xf32, #tpu.memory_space<vmem>>, vector<1x512xf32>
    %526 = vector.broadcast %525 : vector<1x512xf32> to vector<10x512xf32>
    %527 = arith.addf %524, %526 : vector<10x512xf32>
    %528 = arith.mulf %527, %527 : vector<10x512xf32>
    %529 = arith.mulf %527, %528 : vector<10x512xf32>
    %cst_239 = arith.constant 4.471500e-02 : f32
    %530 = vector.broadcast %cst_239 : f32 to vector<10x512xf32>
    %531 = arith.mulf %530, %529 : vector<10x512xf32>
    %532 = arith.addf %527, %531 : vector<10x512xf32>
    %cst_240 = arith.constant 0.797884583 : f32
    %533 = vector.broadcast %cst_240 : f32 to vector<10x512xf32>
    %534 = arith.mulf %533, %532 : vector<10x512xf32>
    %535 = math.tanh %534 : vector<10x512xf32>
    %cst_241 = arith.constant 1.000000e+00 : f32
    %536 = vector.broadcast %cst_241 : f32 to vector<10x512xf32>
    %537 = arith.addf %536, %535 : vector<10x512xf32>
    %cst_242 = arith.constant 5.000000e-01 : f32
    %538 = vector.broadcast %cst_242 : f32 to vector<10x512xf32>
    %539 = arith.mulf %538, %537 : vector<10x512xf32>
    %540 = arith.mulf %527, %539 : vector<10x512xf32>
    %c0_243 = arith.constant 0 : index
    %c0_244 = arith.constant 0 : index
    %541 = vector.load %arg27[%c0_243, %c0_244] : memref<512x128xf32, #tpu.memory_space<vmem>>, vector<512x128xf32>
    %cst_245 = arith.constant dense<0.000000e+00> : vector<10x128xf32>
    %542 = tpu.matmul %540, %541, %cst_245 {dimension_numbers = #tpu.dot_dimension_numbers<[1], [0], [0], [1], [0, 0, 1, 1], [], []>} : vector<10x512xf32>, vector<512x128xf32>, vector<10x128xf32> -> vector<10x128xf32>
    %c0_246 = arith.constant 0 : index
    %c0_247 = arith.constant 0 : index
    %543 = vector.load %arg28[%c0_246, %c0_247] : memref<1x128xf32, #tpu.memory_space<vmem>>, vector<1x128xf32>
    %544 = vector.broadcast %543 : vector<1x128xf32> to vector<10x128xf32>
    %545 = arith.addf %542, %544 : vector<10x128xf32>
    %546 = arith.addf %498, %545 : vector<10x128xf32>
    %547 = vector.extract_strided_slice %546 {offsets = [0, 0], sizes = [5, 128], strides = [1, 1]} : vector<10x128xf32> to vector<5x128xf32>
    %cst_248 = arith.constant dense<0.000000e+00> : vector<128xf32>
    %548 = vector.multi_reduction <add>, %547, %cst_248 [0] : vector<5x128xf32> to vector<128xf32>
    %549 = vector.shape_cast %548 : vector<128xf32> to vector<1x128xf32>
    %cst_249 = arith.constant 5.000000e+00 : f32
    %550 = vector.broadcast %cst_249 : f32 to vector<1x128xf32>
    %551 = arith.divf %549, %550 : vector<1x128xf32>
    %552 = vector.extract_strided_slice %546 {offsets = [5, 0], sizes = [5, 128], strides = [1, 1]} : vector<10x128xf32> to vector<5x128xf32>
    %cst_250 = arith.constant dense<0.000000e+00> : vector<128xf32>
    %553 = vector.multi_reduction <add>, %552, %cst_250 [0] : vector<5x128xf32> to vector<128xf32>
    %554 = vector.shape_cast %553 : vector<128xf32> to vector<1x128xf32>
    %cst_251 = arith.constant 5.000000e+00 : f32
    %555 = vector.broadcast %cst_251 : f32 to vector<1x128xf32>
    %556 = arith.divf %554, %555 : vector<1x128xf32>
    %557 = tpu.concatenate %551, %556 in 0 : vector<1x128xf32>, vector<1x128xf32> -> vector<2x128xf32>
    %c0_252 = arith.constant 0 : index
    %c0_253 = arith.constant 0 : index
    %558 = vector.load %arg29[%c0_252, %c0_253] : memref<1x128xf32, #tpu.memory_space<vmem>>, vector<1x128xf32>
    %c0_254 = arith.constant 0 : index
    %c0_255 = arith.constant 0 : index
    %559 = vector.load %arg30[%c0_254, %c0_255] : memref<1x128xf32, #tpu.memory_space<vmem>>, vector<1x128xf32>
    %cst_256 = arith.constant dense<0.000000e+00> : vector<2xf32>
    %560 = vector.multi_reduction <add>, %557, %cst_256 [1] : vector<2x128xf32> to vector<2xf32>
    %561 = vector.shape_cast %560 : vector<2xf32> to vector<2x1xf32>
    %cst_257 = arith.constant 1.280000e+02 : f32
    %562 = vector.broadcast %cst_257 : f32 to vector<2x1xf32>
    %563 = arith.divf %561, %562 : vector<2x1xf32>
    %564 = vector.broadcast %563 : vector<2x1xf32> to vector<2x128xf32>
    %565 = arith.subf %557, %564 : vector<2x128xf32>
    %566 = arith.mulf %565, %565 : vector<2x128xf32>
    %cst_258 = arith.constant dense<0.000000e+00> : vector<2xf32>
    %567 = vector.multi_reduction <add>, %566, %cst_258 [1] : vector<2x128xf32> to vector<2xf32>
    %568 = vector.shape_cast %567 : vector<2xf32> to vector<2x1xf32>
    %cst_259 = arith.constant 1.280000e+02 : f32
    %569 = vector.broadcast %cst_259 : f32 to vector<2x1xf32>
    %570 = arith.divf %568, %569 : vector<2x1xf32>
    %571 = vector.broadcast %563 : vector<2x1xf32> to vector<2x128xf32>
    %572 = arith.subf %557, %571 : vector<2x128xf32>
    %cst_260 = arith.constant 9.99999974E-6 : f32
    %573 = vector.broadcast %cst_260 : f32 to vector<2x1xf32>
    %574 = arith.addf %570, %573 : vector<2x1xf32>
    %575 = math.rsqrt %574 : vector<2x1xf32>
    %576 = vector.broadcast %575 : vector<2x1xf32> to vector<2x128xf32>
    %577 = arith.mulf %572, %576 : vector<2x128xf32>
    %578 = vector.broadcast %558 : vector<1x128xf32> to vector<2x128xf32>
    %579 = arith.mulf %577, %578 : vector<2x128xf32>
    %580 = vector.broadcast %559 : vector<1x128xf32> to vector<2x128xf32>
    %581 = arith.addf %579, %580 : vector<2x128xf32>
    %c0_261 = arith.constant 0 : index
    %c0_262 = arith.constant 0 : index
    %582 = vector.load %arg31[%c0_261, %c0_262] : memref<128x16xf32, #tpu.memory_space<vmem>>, vector<128x16xf32>
    %cst_263 = arith.constant dense<0.000000e+00> : vector<2x16xf32>
    %583 = tpu.matmul %581, %582, %cst_263 {dimension_numbers = #tpu.dot_dimension_numbers<[1], [0], [0], [1], [0, 0, 1, 1], [], []>} : vector<2x128xf32>, vector<128x16xf32>, vector<2x16xf32> -> vector<2x16xf32>
    %c0_264 = arith.constant 0 : index
    %c0_265 = arith.constant 0 : index
    %584 = vector.load %arg32[%c0_264, %c0_265] : memref<1x16xf32, #tpu.memory_space<vmem>>, vector<1x16xf32>
    %585 = vector.broadcast %584 : vector<1x16xf32> to vector<2x16xf32>
    %586 = arith.addf %583, %585 : vector<2x16xf32>
    %c0_266 = arith.constant 0 : index
    %c0_267 = arith.constant 0 : index
    %587 = vector.load %arg33[%c0_266, %c0_267] : memref<2x16xf32, #tpu.memory_space<vmem>>, vector<2x16xf32>
    tpu.vector_store %arg33[%c0_266, %c0_267], %586 {strides = array<i32>} : memref<2x16xf32, #tpu.memory_space<vmem>>, vector<2x16xf32>,
    return
  }
}

</mosaic_0001>

<bundles_post_ra>
// kernel: tpu_custom_call.1
= control target key start
LH: loop header
LB: loop body
LE: loop exit
PB: predicated region body
PF: predicated region fallthrough
CT: control target
= control target key end

     0   :  { %s4585_s6 = smov 1   ;;  %s4586_s10 = smov 2   ;;  %s5611_s0 = inlined_call_operand.smem [shape: u32[36], index: -1, kind: input, shape index: {}] }
   0x1   :  { %s4665_s5 = sld [smem:[%s5611_s0]]   ;;  %s4587_s14 = smov 3  }
   0x2   :  { %s4670_s9 = sld [smem:[%s5611_s0 + %s4585_s6]]   ;;  %s4588_s18 = smov 4  }
   0x3   :  { %s4675_s13 = sld [smem:[%s5611_s0 + %s4586_s10]]   ;;  %s4589_s22 = smov 5  }
   0x4   :  { %s4680_s17 = sld [smem:[%s5611_s0 + %s4587_s14]]   ;;  %s4590_s26 = smov 6  }
   0x5   :  { %s4685_s21 = sld [smem:[%s5611_s0 + %s4588_s18]]   ;;  %s4591_s30 = smov 7  }
   0x6   :  { %s4690_s25 = sld [smem:[%s5611_s0 + %s4589_s22]]   ;;  %s4592_s4 = smov 8  }
   0x7   :  { %5627 = sst [smem:[#allocation59_spill]] %s4665_s5  ;;  %s4593_s10 = smov 9  }
   0x8   :  { %s4695_s29 = sld [smem:[%s5611_s0 + %s4590_s26]]   ;;  %s4594_s15 = smov 10  }
   0x9   :  { %s4700_s3 = sld [smem:[%s5611_s0 + %s4591_s30]]   ;;  %s4595_s20 = smov 11  }
   0xa   :  { %s4705_s8 = sld [smem:[%s5611_s0 + %s4592_s4]]   ;;  %s4596_s26 = smov 12  }
   0xb   :  { %5628 = sst [smem:[#allocation60_spill]] %s4685_s21  ;;  %s4597_s1 = smov 13  }
   0xc   :  { %s4710_s14 = sld [smem:[%s5611_s0 + %s4593_s10]]   ;;  %s4598_s7 = smov 14  }
   0xd   :  { %s4715_s19 = sld [smem:[%s5611_s0 + %s4594_s15]]   ;;  %s4599_s15 = smov 15  }
   0xe   :  { %5629 = sst [smem:[#allocation61_spill]] %s4695_s29  ;;  %s4600_s22 = smov 16  }
   0xf   :  { %s4720_s24 = sld [smem:[%s5611_s0 + %s4595_s20]]   ;;  %s4601_s28 = smov 17  }
  0x10   :  { %5630 = sst [smem:[#allocation62_spill]] %s4705_s8 }
  0x11   :  { %s4725_s30 = sld [smem:[%s5611_s0 + %s4596_s26]]  }
  0x12   :  { %5631 = sst [smem:[#allocation63_spill]] %s4710_s14 }
  0x13   :  { %5632 = sst [smem:[#allocation64_spill]] %s4715_s19 }
  0x14   :  { %s4730_s6 = sld [smem:[%s5611_s0 + %s4597_s1]]  }
  0x15   :  { %s4735_s12 = sld [smem:[%s5611_s0 + %s4598_s7]]   ;;  %s4602_s7 = smov 18  }
  0x16   :  { %s4740_s20 = sld [smem:[%s5611_s0 + %s4599_s15]]   ;;  %s4603_s15 = smov 19  }
  0x17   :  { %5633 = sst [smem:[#allocation65_spill]] %s4725_s30 }
  0x18   :  { %s4745_s27 = sld [smem:[%s5611_s0 + %s4600_s22]]   ;;  %s4604_s22 = smov 20  }
  0x19   :  { %s4750_s4 = sld [smem:[%s5611_s0 + %s4601_s28]]   ;;  %s4605_s28 = smov 21  }
  0x1a   :  { %s4760_s19 = sld [smem:[%s5611_s0 + %s4603_s15]]   ;;  %s4607_s15 = smov 23  }
  0x1b   :  { %5634 = sst [smem:[#allocation66_spill]] %s4735_s12 }
  0x1c   :  { %5635 = sst [smem:[#allocation67_spill]] %s4740_s20 }
  0x1d   :  { %s4755_s12 = sld [smem:[%s5611_s0 + %s4602_s7]]   ;;  %s4606_s7 = smov 22  }
  0x1e   :  { %s4765_s14 = sld [smem:[%s5611_s0 + %s4604_s22]]   ;;  %s4608_s22 = smov 24  }
  0x1f   :  { %5636 = sst [smem:[#allocation68_spill]] %s4750_s4 }
  0x20   :  { %5637 = sst [smem:[#allocation69_spill]] %s4760_s19 }
  0x21   :  { %s4770_s21 = sld [smem:[%s5611_s0 + %s4605_s28]]   ;;  %s4609_s28 = smov 25  }
  0x22   :  { %s4775_s5 = sld [smem:[%s5611_s0 + %s4606_s7]]   ;;  %s4610_s7 = smov 26  }
  0x23   :  { %s4780_s19 = sld [smem:[%s5611_s0 + %s4607_s15]]   ;;  %s4611_s15 = smov 27  }
  0x24   :  { %s4785_s4 = sld [smem:[%s5611_s0 + %s4608_s22]]   ;;  %s4612_s22 = smov 28  }
  0x25   :  { %s4795_s20 = sld [smem:[%s5611_s0 + %s4610_s7]]   ;;  %s4614_s7 = smov 30  }
  0x26   :  { %s4805_s30 = sld [smem:[%s5611_s0 + %s4612_s22]]   ;;  %s4616_s22 = smov 32  }
  0x27   :  { %5638 = sst [smem:[#allocation70_spill]] %s4770_s21 }
  0x28   :  { %s4790_s21 = sld [smem:[%s5611_s0 + %s4609_s28]]   ;;  %s4613_s28 = smov 29  }
  0x29   :  { %5639 = sst [smem:[#allocation71_spill]] %s4780_s19 }
  0x2a   :  { %s4800_s19 = sld [smem:[%s5611_s0 + %s4611_s15]]   ;;  %s4615_s15 = smov 31  }
  0x2b   :  { %s4815_s8 = sld [smem:[%s5611_s0 + %s4614_s7]]   ;;  %s4618_s7 = smov 34  }
  0x2c   :  { %s4825_s29 = sld [smem:[%s5611_s0 + %s4616_s22]]  }
  0x2e   :  { %5640 = sst [smem:[#allocation72_spill]] %s4790_s21 }
  0x2f   :  { %s4810_s21 = sld [smem:[%s5611_s0 + %s4613_s28]]   ;;  %s4617_s28 = smov 33  }
  0x30   :  { %5641 = sst [smem:[#allocation73_spill]] %s4800_s19 }
  0x31   :  { %5643 = sst [smem:[#allocation75_spill]] %s4815_s8 }
  0x32   :  { %s4820_s19 = sld [smem:[%s5611_s0 + %s4615_s15]]   ;;  %s4619_s15 = smov 35  }
  0x33   :  { %s4835_s8 = sld [smem:[%s5611_s0 + %s4618_s7]]  }
  0x35   :  { %5642 = sst [smem:[#allocation74_spill]] %s4810_s21 }
  0x36   :  { %s4830_s21 = sld [smem:[%s5611_s0 + %s4617_s28]]  }
  0x38   :  { %5644 = sst [smem:[#allocation76_spill]] %s4820_s19 }
  0x39   :  { %s4840_s19 = sld [smem:[%s5611_s0 + %s4619_s15]]  }
  0x3a   :  { %77 = vsyncpa [#allocation3], 0 }
  0x3b   :  { %78 = vsyncpa [#allocation6], 0 }
  0x3c   :  { %79 = vsyncpa [#allocation9], 0 }
  0x3d   :  { %80 = vsyncpa [#allocation12], 0 }
  0x3e   :  { %81 = vsyncpa [#allocation15], 0 }
  0x3f   :  { %82 = vsyncpa [#allocation18], 0 }
  0x40   :  { %83 = vsyncpa [#allocation21], 0 }
  0x41   :  { %84 = vsyncpa [#allocation24], 0 }
  0x42   :  { %85 = vsyncpa [#allocation27], 0 }
  0x43   :  { %86 = vsyncpa [#allocation30], 0 }
  0x44   :  { %87 = vsyncpa [#allocation33], 0 }
  0x45   :  { %88 = vsyncpa [#allocation36], 0 }
  0x46   :  { %89 = vsyncpa [#allocation39], 0 }
  0x47   :  { %90 = vsyncpa [#allocation42], 0  ;;  %s112_s22 = sshll.u32 %s4675_s13, 4  ;;  %s113_s22 = int_to_ptr.hbm [resolvable:$true] %s112_s22 }
  0x48   :  { %91 = vsyncpa [#allocation4], 0  ;;  %s4620_s0 = smov [#allocation5]   ;;  %s136_s26 = sshll.u32 %s4690_s25, 4  ;;  %s137_s26 = int_to_ptr.hbm [resolvable:$true] %s136_s26 }
  0x49   :  { %s114_s23 = sshll.u32 %s4620_s0, 4  ;;  %s3907_s28 = sshra.s32 %s113_s22, 4  ;;  %s115_s23 = int_to_ptr.vmem [resolvable:$true] %s114_s23  ;;  %s3908_s28 = int_to_ptr.hbm [resolvable:$true] %s3907_s28 }
  0x4a   :  { %s3909_s1 = scalar_lea.hbm %s3908_s28, 1  ;;  %s3911_s2 = scalar_lea.hbm %s4675_s13, 1 }
  0x4b   :  { %p3910_p0 = scmp.ne.s32.totalorder %s3908_s28, %s3909_s1  ;;  %p3912_p1 = scmp.lt.s32.totalorder %s3908_s28, %s4675_s13 }
  0x4c   :  { %p3913_p2 = scmp.lt.s32.totalorder %s3911_s2, %s3909_s1 }
  0x4e   :  { %p3914_p3 = por %p3913_p2, %p3912_p1 }
  0x50   :  { %p3915_p4 = pnand %p3914_p3, %p3910_p0 }
  0x52   :  { %3918 = shalt.err (!%p3915_p4)
}
  0x53   :  { %117 = dma.hbm_to_vmem [thread:$0]  %s113_s22, 16, %s115_s23, [#allocation6]  }
  0x54   :  { %s4621_s7 = smov [#allocation8]   ;;  %s157_s11 = sshll.u32 %s4700_s3, 4  ;;  %s4847_s11 = int_to_ptr.hbm [resolvable:$true] %s157_s11 }
  0x55   :  { %s138_s10 = sshll.u32 %s4621_s7, 4  ;;  %s3931_s15 = sshra.s32 %s137_s26, 4  ;;  %s139_s10 = int_to_ptr.vmem [resolvable:$true] %s138_s10  ;;  %s3932_s15 = int_to_ptr.hbm [resolvable:$true] %s3931_s15 }
  0x56   :  { %s3933_s16 = scalar_lea.hbm %s3932_s15, 1  ;;  %s3935_s13 = scalar_lea.hbm %s4690_s25, 1 }
  0x57   :  { %p3934_p5 = scmp.ne.s32.totalorder %s3932_s15, %s3933_s16  ;;  %p3936_p6 = scmp.lt.s32.totalorder %s3932_s15, %s4690_s25 }
  0x58   :  { %p3937_p7 = scmp.lt.s32.totalorder %s3935_s13, %s3933_s16 }
  0x5a   :  { %p3938_p8 = por %p3937_p7, %p3936_p6 }
  0x5c   :  { %p3939_p9 = pnand %p3938_p8, %p3934_p5 }
  0x5e   :  { %3942 = shalt.err (!%p3939_p9)
}
  0x5f   :  { %141 = dma.hbm_to_vmem [thread:$0]  %s137_s26, 16, %s139_s10, [#allocation9]  }
  0x60   :  { %s4622_s18 = smov [#allocation11]   ;;  %s186_s0 = sshll.u32 %s4720_s24, 4  ;;  %s187_s0 = int_to_ptr.hbm [resolvable:$true] %s186_s0 }
  0x61   :  { %s159_s22 = sshll.u32 %s4622_s18, 4  ;;  %s3955_s23 = sshra.s32 %s4847_s11, 4  ;;  %s160_s22 = int_to_ptr.vmem [resolvable:$true] %s159_s22  ;;  %s3956_s23 = int_to_ptr.hbm [resolvable:$true] %s3955_s23 }
  0x62   :  { %s3957_s28 = scalar_lea.hbm %s3956_s23, 384  ;;  %s3959_s1 = scalar_lea.hbm %s4700_s3, 384 }
  0x63   :  { %p3958_p10 = scmp.ne.s32.totalorder %s3956_s23, %s3957_s28  ;;  %p3960_p11 = scmp.lt.s32.totalorder %s3956_s23, %s4700_s3 }
  0x64   :  { %p3961_p12 = scmp.lt.s32.totalorder %s3959_s1, %s3957_s28 }
  0x66   :  { %p3962_p13 = por %p3961_p12, %p3960_p11 }
  0x68   :  { %p3963_p0 = pnand %p3962_p13, %p3958_p10 }
  0x6a   :  { %3966 = shalt.err (!%p3963_p0)
}
  0x6b   :  { %s4623_s25 = smov 384   ;;  %s4624_s26 = smov 24  }
  0x6c   :  { %165 = dma.hbm_to_vmem [thread:$0]  %s4847_s11, 6144, %s160_s22, [#allocation12], %s4623_s25, %s4623_s25, %s4624_s26  }
  0x6d   :  { %s4625_s2 = smov [#allocation14]   ;;  %s207_s10 = sshll.u32 %s4730_s6, 4  ;;  %s4860_s10 = int_to_ptr.hbm [resolvable:$true] %s207_s10 }
  0x6e   :  { %s188_s7 = sshll.u32 %s4625_s2, 4  ;;  %s3979_s3 = sshra.s32 %s187_s0, 4  ;;  %s189_s7 = int_to_ptr.vmem [resolvable:$true] %s188_s7  ;;  %s3980_s3 = int_to_ptr.hbm [resolvable:$true] %s3979_s3 }
  0x6f   :  { %s3981_s15 = scalar_lea.hbm %s3980_s3, 1  ;;  %s3983_s16 = scalar_lea.hbm %s4720_s24, 1 }
  0x70   :  { %p3982_p1 = scmp.ne.s32.totalorder %s3980_s3, %s3981_s15  ;;  %p3984_p2 = scmp.lt.s32.totalorder %s3980_s3, %s4720_s24 }
  0x71   :  { %p3985_p3 = scmp.lt.s32.totalorder %s3983_s16, %s3981_s15 }
  0x73   :  { %p3986_p4 = por %p3985_p3, %p3984_p2 }
  0x75   :  { %p3987_p5 = pnand %p3986_p4, %p3982_p1 }
  0x77   :  { %3990 = shalt.err (!%p3987_p5)
}
  0x78   :  { %191 = dma.hbm_to_vmem [thread:$0]  %s187_s0, 16, %s189_s7, [#allocation15]  }
  0x79   :  { %s4626_s11 = smov [#allocation17]   ;;  %s236_s18 = sshll.u32 %s4745_s27, 4  ;;  %s237_s18 = int_to_ptr.hbm [resolvable:$true] %s236_s18 }
  0x7a   :  { %s209_s13 = sshll.u32 %s4626_s11, 4  ;;  %s4003_s22 = sshra.s32 %s4860_s10, 4  ;;  %s210_s13 = int_to_ptr.vmem [resolvable:$true] %s209_s13  ;;  %s4004_s22 = int_to_ptr.hbm [resolvable:$true] %s4003_s22 }
  0x7b   :  { %s4005_s23 = scalar_lea.hbm %s4004_s22, 512  ;;  %s4007_s28 = scalar_lea.hbm %s4730_s6, 512 }
  0x7c   :  { %p4006_p6 = scmp.ne.s32.totalorder %s4004_s22, %s4005_s23  ;;  %p4008_p7 = scmp.lt.s32.totalorder %s4004_s22, %s4730_s6 }
  0x7d   :  { %p4009_p8 = scmp.lt.s32.totalorder %s4007_s28, %s4005_s23 }
  0x7f   :  { %p4010_p9 = por %p4009_p8, %p4008_p7 }
  0x81   :  { %p4011_p10 = pnand %p4010_p9, %p4006_p6 }
  0x83   :  { %4014 = shalt.err (!%p4011_p10)
}
  0x84   :  { %s4627_s24 = smov 512   ;;  %s4628_s0 = smov 32  }
  0x85   :  { %215 = dma.hbm_to_vmem [thread:$0]  %s4860_s10, 8192, %s210_s13, [#allocation18], %s4627_s24, %s4627_s24, %s4628_s0  }
  0x86   :  { %s4629_s1 = smov [#allocation20]   ;;  %s258_s7 = sshll.u32 %s4755_s12, 4  ;;  %s259_s7 = int_to_ptr.hbm [resolvable:$true] %s258_s7 }
  0x87   :  { %s238_s2 = sshll.u32 %s4629_s1, 4  ;;  %s4027_s6 = sshra.s32 %s237_s18, 4  ;;  %s239_s2 = int_to_ptr.vmem [resolvable:$true] %s238_s2  ;;  %s4028_s6 = int_to_ptr.hbm [resolvable:$true] %s4027_s6 }
  0x88   :  { %s4029_s3 = scalar_lea.hbm %s4028_s6, 1  ;;  %s4031_s15 = scalar_lea.hbm %s4745_s27, 1 }
  0x89   :  { %p4030_p11 = scmp.ne.s32.totalorder %s4028_s6, %s4029_s3  ;;  %p4032_p12 = scmp.lt.s32.totalorder %s4028_s6, %s4745_s27 }
  0x8a   :  { %p4033_p13 = scmp.lt.s32.totalorder %s4031_s15, %s4029_s3 }
  0x8c   :  { %p4034_p0 = por %p4033_p13, %p4032_p12 }
  0x8e   :  { %p4035_p1 = pnand %p4034_p0, %p4030_p11 }
  0x90   :  { %4038 = shalt.err (!%p4035_p1)
}
  0x91   :  { %241 = dma.hbm_to_vmem [thread:$0]  %s237_s18, 16, %s239_s2, [#allocation21]  }
  0x92   :  { %s282_s10 = sshll.u32 %s4765_s14, 4  ;;  %s4630_s16 = smov [#allocation23]   ;;  %s283_s10 = int_to_ptr.hbm [resolvable:$true] %s282_s10 }
  0x93   :  { %s260_s11 = sshll.u32 %s4630_s16, 4  ;;  %s4051_s13 = sshra.s32 %s259_s7, 4  ;;  %s261_s11 = int_to_ptr.vmem [resolvable:$true] %s260_s11  ;;  %s4052_s13 = int_to_ptr.hbm [resolvable:$true] %s4051_s13 }
  0x94   :  { %s4053_s22 = scalar_lea.hbm %s4052_s13, 1  ;;  %s4055_s23 = scalar_lea.hbm %s4755_s12, 1 }
  0x95   :  { %p4054_p2 = scmp.ne.s32.totalorder %s4052_s13, %s4053_s22  ;;  %p4056_p3 = scmp.lt.s32.totalorder %s4052_s13, %s4755_s12 }
  0x96   :  { %p4057_p4 = scmp.lt.s32.totalorder %s4055_s23, %s4053_s22 }
  0x98   :  { %p4058_p5 = por %p4057_p4, %p4056_p3 }
  0x9a   :  { %p4059_p6 = pnand %p4058_p5, %p4054_p2 }
  0x9c   :  { %4062 = shalt.err (!%p4059_p6)
}
  0x9d   :  { %263 = dma.hbm_to_vmem [thread:$0]  %s259_s7, 16, %s261_s11, [#allocation24]  }
  0x9e   :  { %s4631_s27 = smov [#allocation26]   ;;  %s306_s28 = sshll.u32 %s4775_s5, 4  ;;  %s307_s28 = int_to_ptr.hbm [resolvable:$true] %s306_s28 }
  0x9f   :  { %s284_s18 = sshll.u32 %s4631_s27, 4  ;;  %s4075_s1 = sshra.s32 %s283_s10, 4  ;;  %s285_s18 = int_to_ptr.vmem [resolvable:$true] %s284_s18  ;;  %s4076_s1 = int_to_ptr.hbm [resolvable:$true] %s4075_s1 }
  0xa0   :  { %s4077_s2 = scalar_lea.hbm %s4076_s1, 3  ;;  %s4079_s6 = scalar_lea.hbm %s4765_s14, 3 }
  0xa1   :  { %p4078_p7 = scmp.ne.s32.totalorder %s4076_s1, %s4077_s2  ;;  %p4080_p8 = scmp.lt.s32.totalorder %s4076_s1, %s4765_s14 }
  0xa2   :  { %p4081_p9 = scmp.lt.s32.totalorder %s4079_s6, %s4077_s2 }
  0xa4   :  { %p4082_p10 = por %p4081_p9, %p4080_p8 }
  0xa6   :  { %p4083_p11 = pnand %p4082_p10, %p4078_p7 }
  0xa8   :  { %4086 = shalt.err (!%p4083_p11)
}
  0xa9   :  { %287 = dma.hbm_to_vmem [thread:$0]  %s283_s10, 48, %s285_s18, [#allocation27]  }
  0xaa   :  { %s328_s12 = sshll.u32 %s4785_s4, 4  ;;  %s4632_s7 = smov [#allocation29]   ;;  %s329_s12 = int_to_ptr.hbm [resolvable:$true] %s328_s12 }
  0xab   :  { %s308_s3 = sshll.u32 %s4632_s7, 4  ;;  %s4099_s15 = sshra.s32 %s307_s28, 4  ;;  %s309_s3 = int_to_ptr.vmem [resolvable:$true] %s308_s3  ;;  %s4100_s15 = int_to_ptr.hbm [resolvable:$true] %s4099_s15 }
  0xac   :  { %s4101_s16 = scalar_lea.hbm %s4100_s15, 1  ;;  %s4103_s11 = scalar_lea.hbm %s4775_s5, 1 }
  0xad   :  { %p4102_p12 = scmp.ne.s32.totalorder %s4100_s15, %s4101_s16  ;;  %p4104_p13 = scmp.lt.s32.totalorder %s4100_s15, %s4775_s5 }
  0xae   :  { %p4105_p0 = scmp.lt.s32.totalorder %s4103_s11, %s4101_s16 }
  0xb0   :  { %p4106_p1 = por %p4105_p0, %p4104_p13 }
  0xb2   :  { %p4107_p2 = pnand %p4106_p1, %p4102_p12 }
  0xb4   :  { %4110 = shalt.err (!%p4107_p2)
}
  0xb5   :  { %311 = dma.hbm_to_vmem [thread:$0]  %s307_s28, 16, %s309_s3, [#allocation30]  }
  0xb6   :  { %s4633_s14 = smov [#allocation32]   ;;  %s352_s13 = sshll.u32 %s4795_s20, 4  ;;  %s353_s13 = int_to_ptr.hbm [resolvable:$true] %s352_s13 }
  0xb7   :  { %s330_s10 = sshll.u32 %s4633_s14, 4  ;;  %s4123_s22 = sshra.s32 %s329_s12, 4  ;;  %s331_s10 = int_to_ptr.vmem [resolvable:$true] %s330_s10  ;;  %s4124_s22 = int_to_ptr.hbm [resolvable:$true] %s4123_s22 }
  0xb8   :  { %s4125_s23 = scalar_lea.hbm %s4124_s22, 1  ;;  %s4127_s27 = scalar_lea.hbm %s4785_s4, 1 }
  0xb9   :  { %p4126_p3 = scmp.ne.s32.totalorder %s4124_s22, %s4125_s23  ;;  %p4128_p4 = scmp.lt.s32.totalorder %s4124_s22, %s4785_s4 }
  0xba   :  { %p4129_p5 = scmp.lt.s32.totalorder %s4127_s27, %s4125_s23 }
  0xbc   :  { %p4130_p6 = por %p4129_p5, %p4128_p4 }
  0xbe   :  { %p4131_p7 = pnand %p4130_p6, %p4126_p3 }
  0xc0   :  { %4134 = shalt.err (!%p4131_p7)
}
  0xc1   :  { %333 = dma.hbm_to_vmem [thread:$0]  %s329_s12, 16, %s331_s10, [#allocation33]  }
  0xc2   :  { %s376_s5 = sshll.u32 %s4805_s30, 4  ;;  %s4634_s18 = smov [#allocation35]   ;;  %s377_s5 = int_to_ptr.hbm [resolvable:$true] %s376_s5 }
  0xc3   :  { %s354_s28 = sshll.u32 %s4634_s18, 4  ;;  %s4147_s1 = sshra.s32 %s353_s13, 4  ;;  %s355_s28 = int_to_ptr.vmem [resolvable:$true] %s354_s28  ;;  %s4148_s1 = int_to_ptr.hbm [resolvable:$true] %s4147_s1 }
  0xc4   :  { %s4149_s2 = scalar_lea.hbm %s4148_s1, 4  ;;  %s4151_s6 = scalar_lea.hbm %s4795_s20, 4 }
  0xc5   :  { %p4150_p8 = scmp.ne.s32.totalorder %s4148_s1, %s4149_s2  ;;  %p4152_p9 = scmp.lt.s32.totalorder %s4148_s1, %s4795_s20 }
  0xc6   :  { %p4153_p10 = scmp.lt.s32.totalorder %s4151_s6, %s4149_s2 }
  0xc8   :  { %p4154_p11 = por %p4153_p10, %p4152_p9 }
  0xca   :  { %p4155_p12 = pnand %p4154_p11, %p4150_p8 }
  0xcc   :  { %4158 = shalt.err (!%p4155_p12)
}
  0xcd   :  { %357 = dma.hbm_to_vmem [thread:$0]  %s353_s13, 64, %s355_s28, [#allocation36]  }
  0xce   :  { %s4635_s4 = smov [#allocation38]   ;;  %s98_s7 = sshll.u32 %s4670_s9, 4  ;;  %s4891_s7 = int_to_ptr.hbm [resolvable:$true] %s98_s7 }
  0xcf   :  { %s378_s12 = sshll.u32 %s4635_s4, 4  ;;  %s4171_s3 = sshra.s32 %s377_s5, 4  ;;  %s379_s12 = int_to_ptr.vmem [resolvable:$true] %s378_s12  ;;  %s4172_s3 = int_to_ptr.hbm [resolvable:$true] %s4171_s3 }
  0xd0   :  { %s4173_s15 = scalar_lea.hbm %s4172_s3, 1  ;;  %s4175_s16 = scalar_lea.hbm %s4805_s30, 1 }
  0xd1   :  { %p4174_p13 = scmp.ne.s32.totalorder %s4172_s3, %s4173_s15  ;;  %p4176_p0 = scmp.lt.s32.totalorder %s4172_s3, %s4805_s30 }
  0xd2   :  { %p4177_p1 = scmp.lt.s32.totalorder %s4175_s16, %s4173_s15 }
  0xd4   :  { %p4178_p2 = por %p4177_p1, %p4176_p0 }
  0xd6   :  { %p4179_p3 = pnand %p4178_p2, %p4174_p13 }
  0xd8   :  { %4182 = shalt.err (!%p4179_p3)
}
  0xd9   :  { %381 = dma.hbm_to_vmem [thread:$0]  %s377_s5, 16, %s379_s12, [#allocation39]  }
  0xda   :  { %s4636_s20 = smov [#allocation2]   ;;  %s123_s14 = sshll.u32 %s4680_s17, 4  ;;  %s124_s14 = int_to_ptr.hbm [resolvable:$true] %s123_s14 }
  0xdb   :  { %s100_s11 = sshll.u32 %s4636_s20, 4  ;;  %s4195_s10 = sshra.s32 %s4891_s7, 4  ;;  %s101_s11 = int_to_ptr.vmem [resolvable:$true] %s100_s11  ;;  %s4196_s10 = int_to_ptr.hbm [resolvable:$true] %s4195_s10 }
  0xdc   :  { %s4197_s13 = scalar_lea.hbm %s4196_s10, 192  ;;  %s4199_s22 = scalar_lea.hbm %s4670_s9, 192 }
  0xdd   :  { %p4198_p4 = scmp.ne.s32.totalorder %s4196_s10, %s4197_s13  ;;  %p4200_p5 = scmp.lt.s32.totalorder %s4196_s10, %s4670_s9 }
  0xde   :  { %p4201_p6 = scmp.lt.s32.totalorder %s4199_s22, %s4197_s13 }
  0xe0   :  { %p4202_p7 = por %p4201_p6, %p4200_p5 }
  0xe2   :  { %p4203_p8 = pnand %p4202_p7, %p4198_p4 }
  0xe4   :  { %4206 = shalt.err (!%p4203_p8)
}
  0xe5   :  { %s4637_s30 = smov 128   ;;  %s5645_s23 = sld [smem:[#allocation61_spill]] }
  0xe6   :  { %s4638_s27 = smov 8   ;;  %s4639_s5 = smov [#allocation7]  }
  0xe7   :  { %106 = dma.hbm_to_vmem [thread:$0]  %s4891_s7, 3072, %s101_s11, [#allocation3], %s4637_s30, %s4637_s30, %s4638_s27  }
  0xe8   :  { %s125_s18 = sshll.u32 %s4639_s5, 4  ;;  %s4219_s9 = sshra.s32 %s124_s14, 4  ;;  %s126_s18 = int_to_ptr.vmem [resolvable:$true] %s125_s18  ;;  %s4220_s9 = int_to_ptr.hbm [resolvable:$true] %s4219_s9 }
  0xe9   :  { %s4221_s1 = scalar_lea.hbm %s4220_s9, 1  ;;  %s4223_s2 = scalar_lea.hbm %s4680_s17, 1 }
  0xea   :  { %p4222_p9 = scmp.ne.s32.totalorder %s4220_s9, %s4221_s1  ;;  %p4224_p10 = scmp.lt.s32.totalorder %s4220_s9, %s4680_s17 }
  0xeb   :  { %s147_s28 = sshll.u32 %s5645_s23, 4  ;;  %p4225_p11 = scmp.lt.s32.totalorder %s4223_s2, %s4221_s1  ;;  %s148_s28 = int_to_ptr.hbm [resolvable:$true] %s147_s28 }
  0xed   :  { %p4226_p12 = por %p4225_p11, %p4224_p10 }
  0xef   :  { %p4227_p13 = pnand %p4226_p12, %p4222_p9 }
  0xf1   :  { %4230 = shalt.err (!%p4227_p13)
}
  0xf2   :  { %128 = dma.hbm_to_vmem [thread:$0]  %s124_s14, 16, %s126_s18, [#allocation6]  }
  0xf3   :  { %s5646_s6 = sld [smem:[#allocation62_spill]]  ;;  %s4640_s12 = smov [#allocation10]  }
  0xf4   :  { %s149_s7 = sshll.u32 %s4640_s12, 4  ;;  %s4243_s3 = sshra.s32 %s148_s28, 4  ;;  %s150_s7 = int_to_ptr.vmem [resolvable:$true] %s149_s7  ;;  %s4244_s3 = int_to_ptr.hbm [resolvable:$true] %s4243_s3 }
  0xf5   :  { %s4245_s15 = scalar_lea.hbm %s4244_s3, 1  ;;  %s4247_s16 = scalar_lea.hbm %s5645_s23, 1 }
  0xf6   :  { %p4246_p0 = scmp.ne.s32.totalorder %s4244_s3, %s4245_s15  ;;  %p4248_p1 = scmp.lt.s32.totalorder %s4244_s3, %s5645_s23 }
  0xf7   :  { %p4249_p2 = scmp.lt.s32.totalorder %s4247_s16, %s4245_s15 }
  0xf9   :  { %s171_s4 = sshll.u32 %s5646_s6, 4  ;;  %p4250_p3 = por %p4249_p2, %p4248_p1  ;;  %s172_s4 = int_to_ptr.hbm [resolvable:$true] %s171_s4 }
  0xfb   :  { %p4251_p4 = pnand %p4250_p3, %p4246_p0 }
  0xfd   :  { %4254 = shalt.err (!%p4251_p4)
}
  0xfe   :  { %152 = dma.hbm_to_vmem [thread:$0]  %s148_s28, 16, %s150_s7, [#allocation9]  }
  0xff   :  { %s5647_s17 = sld [smem:[#allocation65_spill]]  ;;  %s4641_s20 = smov [#allocation13]  }
 0x100   :  { %s173_s11 = sshll.u32 %s4641_s20, 4  ;;  %s4267_s10 = sshra.s32 %s172_s4, 4  ;;  %s174_s11 = int_to_ptr.vmem [resolvable:$true] %s173_s11  ;;  %s4268_s10 = int_to_ptr.hbm [resolvable:$true] %s4267_s10 }
 0x101   :  { %s4269_s13 = scalar_lea.hbm %s4268_s10, 3  ;;  %s4271_s22 = scalar_lea.hbm %s5646_s6, 3 }
 0x102   :  { %p4270_p5 = scmp.ne.s32.totalorder %s4268_s10, %s4269_s13  ;;  %p4272_p6 = scmp.lt.s32.totalorder %s4268_s10, %s5646_s6 }
 0x103   :  { %p4273_p7 = scmp.lt.s32.totalorder %s4271_s22, %s4269_s13 }
 0x105   :  { %s197_s14 = sshll.u32 %s5647_s17, 4  ;;  %p4274_p8 = por %p4273_p7, %p4272_p6  ;;  %s198_s14 = int_to_ptr.hbm [resolvable:$true] %s197_s14 }
 0x107   :  { %p4275_p9 = pnand %p4274_p8, %p4270_p5 }
 0x109   :  { %4278 = shalt.err (!%p4275_p9)
}
 0x10a   :  { %176 = dma.hbm_to_vmem [thread:$0]  %s172_s4, 48, %s174_s11, [#allocation12]  }
 0x10b   :  { %s5648_s23 = sld [smem:[#allocation67_spill]]  ;;  %s4642_s18 = smov [#allocation16]  }
 0x10c   :  { %s199_s28 = sshll.u32 %s4642_s18, 4  ;;  %s4291_s9 = sshra.s32 %s198_s14, 4  ;;  %s200_s28 = int_to_ptr.vmem [resolvable:$true] %s199_s28  ;;  %s4292_s9 = int_to_ptr.hbm [resolvable:$true] %s4291_s9 }
 0x10d   :  { %s4293_s1 = scalar_lea.hbm %s4292_s9, 1  ;;  %s4295_s2 = scalar_lea.hbm %s5647_s17, 1 }
 0x10e   :  { %p4294_p10 = scmp.ne.s32.totalorder %s4292_s9, %s4293_s1  ;;  %p4296_p11 = scmp.lt.s32.totalorder %s4292_s9, %s5647_s17 }
 0x10f   :  { %p4297_p12 = scmp.lt.s32.totalorder %s4295_s2, %s4293_s1 }
 0x111   :  { %s222_s5 = sshll.u32 %s5648_s23, 4  ;;  %p4298_p13 = por %p4297_p12, %p4296_p11  ;;  %s4913_s5 = int_to_ptr.hbm [resolvable:$true] %s222_s5 }
 0x113   :  { %p4299_p0 = pnand %p4298_p13, %p4294_p10 }
 0x115   :  { %4302 = shalt.err (!%p4299_p0)
}
 0x116   :  { %202 = dma.hbm_to_vmem [thread:$0]  %s198_s14, 16, %s200_s28, [#allocation15]  }
 0x117   :  { %s5649_s6 = sld [smem:[#allocation68_spill]]  ;;  %s4643_s4 = smov [#allocation19]  }
 0x118   :  { %s224_s12 = sshll.u32 %s4643_s4, 4  ;;  %s4315_s3 = sshra.s32 %s4913_s5, 4  ;;  %s225_s12 = int_to_ptr.vmem [resolvable:$true] %s224_s12  ;;  %s4316_s3 = int_to_ptr.hbm [resolvable:$true] %s4315_s3 }
 0x119   :  { %s4317_s15 = scalar_lea.hbm %s4316_s3, 512  ;;  %s4319_s16 = scalar_lea.hbm %s5648_s23, 512 }
 0x11a   :  { %p4318_p1 = scmp.ne.s32.totalorder %s4316_s3, %s4317_s15  ;;  %p4320_p2 = scmp.lt.s32.totalorder %s4316_s3, %s5648_s23 }
 0x11b   :  { %p4321_p3 = scmp.lt.s32.totalorder %s4319_s16, %s4317_s15 }
 0x11d   :  { %s247_s7 = sshll.u32 %s5649_s6, 4  ;;  %p4322_p4 = por %p4321_p3, %p4320_p2  ;;  %s248_s7 = int_to_ptr.hbm [resolvable:$true] %s247_s7 }
 0x11f   :  { %p4323_p5 = pnand %p4322_p4, %p4318_p1 }
 0x121   :  { %4326 = shalt.err (!%p4323_p5)
}
 0x122   :  { %s5650_s17 = sld [smem:[#allocation69_spill]]  ;;  %s4644_s11 = smov [#allocation22]  }
 0x123   :  { %230 = dma.hbm_to_vmem [thread:$0]  %s4913_s5, 8192, %s225_s12, [#allocation18], %s4637_s30, %s4637_s30, %s4638_s27  }
 0x124   :  { %s249_s14 = sshll.u32 %s4644_s11, 4  ;;  %s4339_s10 = sshra.s32 %s248_s7, 4  ;;  %s250_s14 = int_to_ptr.vmem [resolvable:$true] %s249_s14  ;;  %s4340_s10 = int_to_ptr.hbm [resolvable:$true] %s4339_s10 }
 0x125   :  { %s4341_s13 = scalar_lea.hbm %s4340_s10, 1  ;;  %s4343_s22 = scalar_lea.hbm %s5649_s6, 1 }
 0x126   :  { %p4342_p6 = scmp.ne.s32.totalorder %s4340_s10, %s4341_s13  ;;  %p4344_p7 = scmp.lt.s32.totalorder %s4340_s10, %s5649_s6 }
 0x127   :  { %p4345_p8 = scmp.lt.s32.totalorder %s4343_s22, %s4341_s13 }
 0x128   :  { %s268_s20 = sshll.u32 %s5650_s17, 4  ;;  %s4926_s20 = int_to_ptr.hbm [resolvable:$true] %s268_s20 }
 0x129   :  { %p4346_p9 = por %p4345_p8, %p4344_p7 }
 0x12b   :  { %p4347_p10 = pnand %p4346_p9, %p4342_p6 }
 0x12d   :  { %4350 = shalt.err (!%p4347_p10)
}
 0x12e   :  { %252 = dma.hbm_to_vmem [thread:$0]  %s248_s7, 16, %s250_s14, [#allocation21]  }
 0x12f   :  { %s5651_s23 = sld [smem:[#allocation70_spill]]  ;;  %s4645_s5 = smov [#allocation25]  }
 0x130   :  { %s270_s18 = sshll.u32 %s4645_s5, 4  ;;  %s4363_s9 = sshra.s32 %s4926_s20, 4  ;;  %s271_s18 = int_to_ptr.vmem [resolvable:$true] %s270_s18  ;;  %s4364_s9 = int_to_ptr.hbm [resolvable:$true] %s4363_s9 }
 0x131   :  { %s4365_s1 = scalar_lea.hbm %s4364_s9, 384  ;;  %s4367_s2 = scalar_lea.hbm %s5650_s17, 384 }
 0x132   :  { %p4366_p11 = scmp.ne.s32.totalorder %s4364_s9, %s4365_s1  ;;  %p4368_p12 = scmp.lt.s32.totalorder %s4364_s9, %s5650_s17 }
 0x133   :  { %p4369_p13 = scmp.lt.s32.totalorder %s4367_s2, %s4365_s1 }
 0x135   :  { %s292_s28 = sshll.u32 %s5651_s23, 4  ;;  %p4370_p0 = por %p4369_p13, %p4368_p12  ;;  %s4931_s28 = int_to_ptr.hbm [resolvable:$true] %s292_s28 }
 0x137   :  { %p4371_p1 = pnand %p4370_p0, %p4366_p11 }
 0x139   :  { %4374 = shalt.err (!%p4371_p1)
}
 0x13a   :  { %s5652_s6 = sld [smem:[#allocation71_spill]]  ;;  %s4646_s12 = smov [#allocation28]  }
 0x13b   :  { %276 = dma.hbm_to_vmem [thread:$0]  %s4926_s20, 6144, %s271_s18, [#allocation24], %s4623_s25, %s4623_s25, %s4624_s26  }
 0x13c   :  { %s294_s7 = sshll.u32 %s4646_s12, 4  ;;  %s4387_s3 = sshra.s32 %s4931_s28, 4  ;;  %s295_s7 = int_to_ptr.vmem [resolvable:$true] %s294_s7  ;;  %s4388_s3 = int_to_ptr.hbm [resolvable:$true] %s4387_s3 }
 0x13d   :  { %s4389_s15 = scalar_lea.hbm %s4388_s3, 128  ;;  %s4391_s16 = scalar_lea.hbm %s5651_s23, 128 }
 0x13e   :  { %p4390_p2 = scmp.ne.s32.totalorder %s4388_s3, %s4389_s15  ;;  %p4392_p3 = scmp.lt.s32.totalorder %s4388_s3, %s5651_s23 }
 0x13f   :  { %p4393_p4 = scmp.lt.s32.totalorder %s4391_s16, %s4389_s15 }
 0x140   :  { %s317_s4 = sshll.u32 %s5652_s6, 4  ;;  %s318_s4 = int_to_ptr.hbm [resolvable:$true] %s317_s4 }
 0x141   :  { %p4394_p5 = por %p4393_p4, %p4392_p3 }
 0x143   :  { %p4395_p6 = pnand %p4394_p5, %p4390_p2 }
 0x145   :  { %4398 = shalt.err (!%p4395_p6)
}
 0x146   :  { %s5653_s25 = sld [smem:[#allocation72_spill]]  ;;  %s4647_s26 = smov [#allocation31]  }
 0x147   :  { %300 = dma.hbm_to_vmem [thread:$0]  %s4931_s28, 2048, %s295_s7, [#allocation27], %s4637_s30, %s4637_s30, %s4638_s27  }
 0x148   :  { %s319_s17 = sshll.u32 %s4647_s26, 4  ;;  %s4411_s11 = sshra.s32 %s318_s4, 4  ;;  %s320_s17 = int_to_ptr.vmem [resolvable:$true] %s319_s17  ;;  %s4412_s11 = int_to_ptr.hbm [resolvable:$true] %s4411_s11 }
 0x149   :  { %s4413_s14 = scalar_lea.hbm %s4412_s11, 1  ;;  %s4415_s10 = scalar_lea.hbm %s5652_s6, 1 }
 0x14a   :  { %p4414_p7 = scmp.ne.s32.totalorder %s4412_s11, %s4413_s14  ;;  %p4416_p8 = scmp.lt.s32.totalorder %s4412_s11, %s5652_s6 }
 0x14b   :  { %p4417_p9 = scmp.lt.s32.totalorder %s4415_s10, %s4413_s14 }
 0x14c   :  { %s338_s20 = sshll.u32 %s5653_s25, 4  ;;  %s4949_s20 = int_to_ptr.hbm [resolvable:$true] %s338_s20 }
 0x14d   :  { %p4418_p10 = por %p4417_p9, %p4416_p8 }
 0x14f   :  { %p4419_p11 = pnand %p4418_p10, %p4414_p7 }
 0x151   :  { %4422 = shalt.err (!%p4419_p11)
}
 0x152   :  { %322 = dma.hbm_to_vmem [thread:$0]  %s318_s4, 16, %s320_s17, [#allocation30]  }
 0x153   :  { %s5654_s13 = sld [smem:[#allocation73_spill]]  ;;  %s4648_s23 = smov [#allocation34]  }
 0x154   :  { %s340_s5 = sshll.u32 %s4648_s23, 4  ;;  %s4435_s18 = sshra.s32 %s4949_s20, 4  ;;  %s341_s5 = int_to_ptr.vmem [resolvable:$true] %s340_s5  ;;  %s4436_s18 = int_to_ptr.hbm [resolvable:$true] %s4435_s18 }
 0x155   :  { %s4437_s28 = scalar_lea.hbm %s4436_s18, 512  ;;  %s4439_s9 = scalar_lea.hbm %s5653_s25, 512 }
 0x156   :  { %p4438_p12 = scmp.ne.s32.totalorder %s4436_s18, %s4437_s28  ;;  %p4440_p13 = scmp.lt.s32.totalorder %s4436_s18, %s5653_s25 }
 0x157   :  { %p4441_p0 = scmp.lt.s32.totalorder %s4439_s9, %s4437_s28 }
 0x159   :  { %s362_s22 = sshll.u32 %s5654_s13, 4  ;;  %p4442_p1 = por %p4441_p0, %p4440_p13  ;;  %s4954_s22 = int_to_ptr.hbm [resolvable:$true] %s362_s22 }
 0x15b   :  { %p4443_p2 = pnand %p4442_p1, %p4438_p12 }
 0x15d   :  { %4446 = shalt.err (!%p4443_p2)
}
 0x15e   :  { %s5655_s1 = sld [smem:[#allocation74_spill]]  ;;  %s4649_s2 = smov [#allocation37]  }
 0x15f   :  { %346 = dma.hbm_to_vmem [thread:$0]  %s4949_s20, 8192, %s341_s5, [#allocation33], %s4627_s24, %s4627_s24, %s4628_s0  }
 0x160   :  { %s364_s6 = sshll.u32 %s4649_s2, 4  ;;  %s4459_s12 = sshra.s32 %s4954_s22, 4  ;;  %s365_s6 = int_to_ptr.vmem [resolvable:$true] %s364_s6  ;;  %s4460_s12 = int_to_ptr.hbm [resolvable:$true] %s4459_s12 }
 0x161   :  { %s4461_s7 = scalar_lea.hbm %s4460_s12, 512  ;;  %s4463_s3 = scalar_lea.hbm %s5654_s13, 512 }
 0x162   :  { %p4462_p3 = scmp.ne.s32.totalorder %s4460_s12, %s4461_s7  ;;  %p4464_p4 = scmp.lt.s32.totalorder %s4460_s12, %s5654_s13 }
 0x163   :  { %p4465_p5 = scmp.lt.s32.totalorder %s4463_s3, %s4461_s7 }
 0x164   :  { %s387_s4 = sshll.u32 %s5655_s1, 4  ;;  %s388_s4 = int_to_ptr.hbm [resolvable:$true] %s387_s4 }
 0x165   :  { %p4466_p6 = por %p4465_p5, %p4464_p4 }
 0x167   :  { %p4467_p7 = pnand %p4466_p6, %p4462_p3 }
 0x169   :  { %4470 = shalt.err (!%p4467_p7)
}
 0x16a   :  { %s5656_s24 = sld [smem:[#allocation75_spill]]  ;;  %s4650_s16 = smov [#allocation40]  }
 0x16b   :  { %370 = dma.hbm_to_vmem [thread:$0]  %s4954_s22, 8192, %s365_s6, [#allocation36], %s4637_s30, %s4637_s30, %s4638_s27  }
 0x16c   :  { %s389_s25 = sshll.u32 %s4650_s16, 4  ;;  %s4483_s26 = sshra.s32 %s388_s4, 4  ;;  %s390_s25 = int_to_ptr.vmem [resolvable:$true] %s389_s25  ;;  %s4484_s26 = int_to_ptr.hbm [resolvable:$true] %s4483_s26 }
 0x16d   :  { %s4485_s17 = scalar_lea.hbm %s4484_s26, 1  ;;  %s4487_s20 = scalar_lea.hbm %s5655_s1, 1 }
 0x16e   :  { %p4486_p8 = scmp.ne.s32.totalorder %s4484_s26, %s4485_s17  ;;  %p4488_p9 = scmp.lt.s32.totalorder %s4484_s26, %s5655_s1 }
 0x16f   :  { %p4489_p10 = scmp.lt.s32.totalorder %s4487_s20, %s4485_s17 }
 0x170   :  { %s398_s15 = sshll.u32 %s5656_s24, 4  ;;  %s399_s15 = int_to_ptr.hbm [resolvable:$true] %s398_s15 }
 0x171   :  { %p4490_p11 = por %p4489_p10, %p4488_p9 }
 0x173   :  { %p4491_p12 = pnand %p4490_p11, %p4486_p8 }
 0x175   :  { %4494 = shalt.err (!%p4491_p12)
}
 0x176   :  { %392 = dma.hbm_to_vmem [thread:$0]  %s388_s4, 16, %s390_s25, [#allocation39]  }
 0x177   :  { %s4651_s11 = smov [#allocation41]   ;;  %s4507_s27 = sshra.s32 %s399_s15, 4  ;;  %s4508_s27 = int_to_ptr.hbm [resolvable:$true] %s4507_s27 }
 0x178   :  { %s400_s30 = sshll.u32 %s4651_s11, 4  ;;  %s4509_s14 = scalar_lea.hbm %s4508_s27, 1  ;;  %s401_s30 = int_to_ptr.vmem [resolvable:$true] %s400_s30 }
 0x179   :  { %p4510_p13 = scmp.ne.s32.totalorder %s4508_s27, %s4509_s14  ;;  %s4511_s10 = scalar_lea.hbm %s5656_s24, 1 }
 0x17a   :  { %p4512_p0 = scmp.lt.s32.totalorder %s4508_s27, %s5656_s24  ;;  %p4513_p1 = scmp.lt.s32.totalorder %s4511_s10, %s4509_s14 }
 0x17c   :  { %p4514_p2 = por %p4513_p1, %p4512_p0 }
 0x17e   :  { %p4515_p3 = pnand %p4514_p2, %p4510_p13 }
 0x180   :  { %4518 = shalt.err (!%p4515_p3)
}
 0x181   :  { %403 = dma.hbm_to_vmem [thread:$0]  %s399_s15, 16, %s401_s30, [#allocation42]  }
 0x182   :  { %4555 = dma.done.wait [#allocation3], 3072  }
 0x183   :  { %4556 = vsyncadd [#allocation3], 4294964224 }
 0x184   :  { %4557 = dma.done.wait [#allocation6], 32  }
 0x185   :  { %4558 = vsyncadd [#allocation6], 4294967264 }
 0x186   :  { %4559 = dma.done.wait [#allocation9], 32  }
 0x187   :  { %4560 = vsyncadd [#allocation9], 4294967264 }
 0x188   :  { %4561 = dma.done.wait [#allocation12], 6192  }
 0x189   :  { %4562 = vsyncadd [#allocation12], 4294961104 }
 0x18a   :  { %4563 = dma.done.wait [#allocation15], 32  }
 0x18b   :  { %4564 = vsyncadd [#allocation15], 4294967264 }
 0x18c   :  { %4565 = dma.done.wait [#allocation18], 16384  }
 0x18d   :  { %4566 = vsyncadd [#allocation18], 4294950912 }
 0x18e   :  { %4567 = dma.done.wait [#allocation21], 32  }
 0x18f   :  { %4568 = vsyncadd [#allocation21], 4294967264 }
 0x190   :  { %4569 = dma.done.wait [#allocation24], 6160  }
 0x191   :  { %4570 = vsyncadd [#allocation24], 4294961136 }
 0x192   :  { %4571 = dma.done.wait [#allocation27], 2096  }
 0x193   :  { %4572 = vsyncadd [#allocation27], 4294965200 }
 0x194   :  { %4573 = dma.done.wait [#allocation30], 32  }
 0x195   :  { %4574 = vsyncadd [#allocation30], 4294967264 }
 0x196   :  { %4575 = dma.done.wait [#allocation33], 8208  }
 0x197   :  { %4576 = vsyncadd [#allocation33], 4294959088 }
 0x198   :  { %4577 = dma.done.wait [#allocation36], 8256  }
 0x199   :  { %4578 = vsyncadd [#allocation36], 4294959040 }
 0x19a   :  { %4579 = dma.done.wait [#allocation39], 32  }
 0x19b   :  { %4580 = vsyncadd [#allocation39], 4294967264 }
 0x19c   :  { %4581 = dma.done.wait [#allocation42], 16  }
 0x19d   :  { %4582 = vsyncadd [#allocation42], 4294967280  ;;  %v529_v0 = vld [vmem:[#allocation2 + $0x78] sm:$0xff]  ;;  %v528_v1 = vld [vmem:[#allocation2 + $0x70] sm:$0xff]  ;;  %s5657_s13 = sld [smem:[#allocation59_spill]]  ;;  %vm542_vm0 = vcmask 523264  }
 0x19e   :  { %546 = vmatpush.msra.mxu0 %v529_v0  ;;  %v527_v2 = vld [vmem:[#allocation2 + $0x68] sm:$0xff]  ;;  %v537_v3 = vld [vmem:[#allocation2 + $0xb8] sm:$0xff]  ;;  %v536_v4 = vld [vmem:[#allocation2 + $0xb0] sm:$0xff]  ;;  %s5658_s22 = sld [smem:[#allocation60_spill]]  ;;  %vm615_vm1 = vcmask 1041408   ;;  %vm605_vm2 = vcmask 1040384  }
 0x19f   :  { %574 = vmatpush.msra.mxu2 %v537_v3  ;;  %v526_v5 = vld [vmem:[#allocation2 + $0x60] sm:$0xff]  ;;  %v535_v6 = vld [vmem:[#allocation2 + $0xa8] sm:$0xff]  ;;  %v525_v7 = vld [vmem:[#allocation2 + $0x58] sm:$0xff]  ;;  %vm607_vm3 = vcmask 1044480   ;;  %vm609_vm4 = vcmask 1045504   ;;  %v4652_v45 = vmov 128.0  }
 0x1a0   :  { %547 = vmatpush.msra.mxu0 %v528_v1  ;;  %v534_v8 = vld [vmem:[#allocation2 + $0xa0] sm:$0xff]  ;;  %v524_v9 = vld [vmem:[#allocation2 + $0x50] sm:$0xff]  ;;  %v523_v10 = vld [vmem:[#allocation2 + $0x48] sm:$0xff]  ;;  %3789 = vrcp.f32 %v4652_v45  ;;  %s5659_s23 = sld [smem:[#allocation63_spill]]  ;;  %vm814_vm12 = vcmask 261120   ;;  %s4653_s5 = smov 96  }
 0x1a1   :  { %575 = vmatpush.msra.mxu2 %v536_v4  ;;  %v533_v11 = vld [vmem:[#allocation2 + $0x98] sm:$0xff]  ;;  %v532_v12 = vld [vmem:[#allocation2 + $0x90] sm:$0xff]  ;;  %v522_v13 = vld [vmem:[#allocation2 + $0x40] sm:$0xff]  ;;  %vm1184_vm13 = vcmask 1042432   ;;  %vm842_vm14 = vcmask 36864   ;;  %s4654_s18 = smov 64  }
 0x1a2   :  { %548 = vmatpush.msra.mxu0 %v527_v2  ;;  %v531_v14 = vld [vmem:[#allocation2 + $0x88] sm:$0xff]  ;;  %v521_v15 = vld [vmem:[#allocation2 + $0x38] sm:$0xff]  ;;  %v530_v16 = vld [vmem:[#allocation2 + $0x80] sm:$0xff]  ;;  %vm855_vm15 = vcmask 39936   ;;  %s5660_s28 = sld [smem:[#allocation64_spill]]  ;;  %s3540_s1 = sshll.u32 %s4830_s21, 4  ;;  %s3541_s1 = int_to_ptr.hbm [resolvable:$true] %s3540_s1 }
 0x1a3   :  { %576 = vmatpush.msra.mxu2 %v535_v6  ;;  %v513_v17 = vld [vmem:[%s5657_s13 + $0x8] sm:$0xff]  ;;  %v520_v18 = vld [vmem:[#allocation2 + $0x30] sm:$0xff]  ;;  %v518_v20 = vld [vmem:[#allocation2 + $0x20] sm:$0xff]  ;;  %s4543_s2 = sshra.s32 %s3541_s1, 4  ;;  %s4547_s4 = scalar_lea.hbm %s4830_s21, 2  ;;  %s4544_s2 = int_to_ptr.hbm [resolvable:$true] %s4543_s2 }
 0x1a4   :  { %549 = vmatpush.msra.mxu0 %v526_v5  ;;  %v519_v19 = vld [vmem:[#allocation2 + $0x28] sm:$0xff]  ;;  %v517_v21 = vld [vmem:[#allocation2 + $0x18] sm:$0xff]  ;;  %v516_v22 = vld [vmem:[#allocation2 + $0x10] sm:$0xff]  ;;  %s4545_s6 = scalar_lea.hbm %s4544_s2, 2  ;;  %p4548_p5 = scmp.lt.s32.totalorder %s4544_s2, %s4830_s21 }
 0x1a5   :  { %577 = vmatpush.msra.mxu2 %v534_v8  ;;  %v515_v23 = vld [vmem:[#allocation2 + $0x8] sm:$0xff]  ;;  %v514_v24 = vld [vmem:[#allocation2] sm:$0xff]  ;;  %v718_v46 = vld [vmem:[#allocation11 + $0x168] sm:$0xff]  ;;  %p4546_p4 = scmp.ne.s32.totalorder %s4544_s2, %s4545_s6  ;;  %p4549_p6 = scmp.lt.s32.totalorder %s4547_s4, %s4545_s6 }
 0x1a6   :  { %550 = vmatpush.msra.mxu0 %v525_v7  ;;  %v512_v25 = vld [vmem:[%s5657_s13] sm:$0xff]  ;;  %v719_v47 = vld [vmem:[#allocation11 + $0x170] sm:$0xff]  ;;  %v3790_v49 = vpop.eup %3789  ;;  %v717_v2 = vld [vmem:[#allocation11 + $0x160] sm:$0xff] }
 0x1a7   :  { %578 = vmatpush.msra.mxu2 %v533_v11  ;;  %v3773_v26 = vld [vmem:[#allocation5] ss:$0 sm:$0xff]  ;;  %v587_v28 = vld [vmem:[#allocation7] sm:$0x1]  ;;  %752 = vmatpush.msra.mxu3 %v719_v47  ;;  %v620_v50 = vmul.f32 128.0, %v3790_v49  ;;  %vm624_vm5 = vweird.f32 %v3790_v49  ;;  %v715_v0 = vld [vmem:[#allocation11 + $0x150] sm:$0xff]  ;;  %p4550_p7 = por %p4549_p6, %p4548_p5 }
 0x1a8   :  { %551 = vmatpush.msra.mxu0 %v524_v9  ;;  %v586_v27 = vld [vmem:[%s5658_s22] sm:$0x1f]  ;;  %v713_v4 = vld [vmem:[#allocation11 + $0x140] sm:$0xff]  ;;  %v714_v5 = vld [vmem:[#allocation11 + $0x148] sm:$0xff] }
 0x1a9   :  { %579 = vmatpush.msra.mxu2 %v532_v12  ;;  %v590_v32 = vrot.slane %v586_v27, 1  ;;  %v593_v33 = vrot.slane %v586_v27, 5  ;;  %v588_v34 = vadd.f32 %v587_v28, %v586_v27  ;;  %v720_v48 = vld [vmem:[#allocation11 + $0x178] sm:$0xff]  ;;  %v621_v51 = vsub.f32 1.0, %v620_v50  ;;  %v709_v6 = vld [vmem:[#allocation11 + $0x120] sm:$0xff]  ;;  %v710_v7 = vld [vmem:[#allocation11 + $0x128] sm:$0xff]  ;;  %p4551_p8 = pnand %p4550_p7, %p4546_p4 }
 0x1aa   :  { %552 = vmatpush.msra.mxu0 %v523_v10  ;;  %775 = vmatpush.msra.mxu1 %v720_v48  ;;  %v716_v1 = vld [vmem:[#allocation11 + $0x158] sm:$0xff]  ;;  %v711_v8 = vld [vmem:[#allocation11 + $0x130] sm:$0xff]  ;;  %v706_v9 = vld [vmem:[#allocation11 + $0x108] sm:$0xff] }
 0x1ab   :  { %580 = vmatpush.msra.mxu2 %v531_v14  ;;  %v600_v38 = vperm.slane %v588_v34, 0  ;;  %v622_v52 = vmul.f32 %v3790_v49, %v621_v51  ;;  %753 = vmatpush.msra.mxu3 %v716_v1  ;;  %v712_v3 = vld [vmem:[#allocation11 + $0x138] sm:$0xff]  ;;  %v707_v10 = vld [vmem:[#allocation11 + $0x110] sm:$0xff]  ;;  %v705_v14 = vld [vmem:[#allocation11 + $0x100] sm:$0xff] }
 0x1ac   :  { %553 = vmatpush.msra.mxu0 %v522_v13  ;;  %776 = vmatpush.msra.mxu1 %v717_v2  ;;  %v708_v11 = vld [vmem:[#allocation11 + $0x118] sm:$0xff]  ;;  %v703_v12 = vld [vmem:[#allocation11 + $0xf0] sm:$0xff]  ;;  %v689_v28 = vld [vmem:[#allocation11 + $0x80] sm:$0xff] }
 0x1ad   :  { %581 = vmatpush.msra.mxu2 %v530_v16  ;;  %v623_v53 = vadd.f32 %v3790_v49, %v622_v52  ;;  %754 = vmatpush.msra.mxu3 %v713_v4  ;;  %v704_v13 = vld [vmem:[#allocation11 + $0xf8] sm:$0xff]  ;;  %v701_v16 = vld [vmem:[#allocation11 + $0xe0] sm:$0xff]  ;;  %v674_v45 = vld [vmem:[#allocation11 + $0x8] sm:$0xff] }
 0x1ae   :  { %554 = vmatpush.msra.mxu0 %v521_v15  ;;  %3606 = vmatmul.msk.f32.vlgmr.msra.gmra.mxu2 %vm542_vm0, %v513_v17  ;;  %v700_v15 = vld [vmem:[#allocation11 + $0xd8] sm:$0xff]  ;;  %v702_v17 = vld [vmem:[#allocation11 + $0xe8] sm:$0xff] }
 0x1af   :  { %729 = vmatpush.msrb.mxu2 %v718_v46  ;;  %v4989_v54 = vsel %vm624_vm5, %v3790_v49, %v623_v53  ;;  %777 = vmatpush.msra.mxu1 %v714_v5  ;;  %v688_v27 = vld [vmem:[#allocation11 + $0x78] sm:$0xff]  ;;  %v675_v46 = vld [vmem:[#allocation11 + $0x10] sm:$0xff] }
 0x1b0   :  { %555 = vmatpush.msra.mxu0 %v520_v18  ;;  %755 = vmatpush.msra.mxu3 %v710_v7  ;;  %v697_v18 = vld [vmem:[#allocation11 + $0xc0] sm:$0xff]  ;;  %v3774_v4 = vld [vmem:[#allocation8] ss:$0 sm:$0xff]  ;;  %v3775_v7 = vld [vmem:[#allocation10] ss:$0 sm:$0xff] }
 0x1b1   :  { %730 = vmatpush.msrb.mxu2 %v715_v0  ;;  %778 = vmatpush.msra.mxu1 %v711_v8 }
 0x1b2   :  { %556 = vmatpush.msra.mxu0 %v519_v19  ;;  %756 = vmatpush.msra.mxu3 %v707_v10  ;;  %v698_v19 = vld [vmem:[#allocation11 + $0xc8] sm:$0xff] }
 0x1b3   :  { %731 = vmatpush.msrb.mxu2 %v712_v3  ;;  %779 = vmatpush.msra.mxu1 %v708_v11 }
 0x1b4   :  { %557 = vmatpush.msra.mxu0 %v518_v20  ;;  %757 = vmatpush.msra.mxu3 %v704_v13  ;;  %v699_v20 = vld [vmem:[#allocation11 + $0xd0] sm:$0xff] }
 0x1b5   :  { %732 = vmatpush.msrb.mxu2 %v709_v6  ;;  %780 = vmatpush.msra.mxu1 %v705_v14  ;;  %v5009_v14 = vld [vmem:[%s5659_s23 + $0x58] sm:$0xff] }
 0x1b6   :  { %558 = vmatpush.msra.mxu0 %v517_v21  ;;  %758 = vmatpush.msra.mxu3 %v701_v16  ;;  %v694_v21 = vld [vmem:[#allocation11 + $0xa8] sm:$0xff]  ;;  %v5024_v16 = vld [vmem:[#allocation13] sm:$0x7] }
 0x1b7   :  { %733 = vmatpush.msrb.mxu2 %v706_v9  ;;  %781 = vmatpush.msra.mxu1 %v702_v17  ;;  %v724_v17 = vperm.slane %v5024_v16, 1 }
 0x1b8   :  { %559 = vmatpush.msra.mxu0 %v516_v22  ;;  %759 = vmatpush.msra.mxu3 %v698_v19  ;;  %v695_v22 = vld [vmem:[#allocation11 + $0xb0] sm:$0xff] }
 0x1b9   :  { %734 = vmatpush.msrb.mxu2 %v703_v12  ;;  %782 = vmatpush.msra.mxu1 %v699_v20  ;;  %v723_v20 = vperm.slane %v5024_v16, 0 }
 0x1ba   :  { %560 = vmatpush.msra.mxu0 %v515_v23  ;;  %v696_v23 = vld [vmem:[#allocation11 + $0xb8] sm:$0xff]  ;;  %760 = vmatpush.msra.mxu3 %v695_v22 }
 0x1bb   :  { %735 = vmatpush.msrb.mxu2 %v700_v15  ;;  %783 = vmatpush.msra.mxu1 %v696_v23  ;;  %v5017_v15 = vld [vmem:[%s5659_s23 + $0x48] sm:$0xff] }
 0x1bc   :  { %561 = vmatpush.msra.mxu0 %v514_v24  ;;  %v691_v24 = vld [vmem:[#allocation11 + $0x90] sm:$0xff] }
 0x1bd   :  { %562 = vmatmul.f32.vlgmr.msra.gmra.mxu0 %v512_v25  ;;  %736 = vmatpush.msrb.mxu2 %v697_v18  ;;  %v692_v25 = vld [vmem:[#allocation11 + $0x98] sm:$0xff]  ;;  %v725_v18 = vperm.slane %v5024_v16, 2 }
 0x1be   :  { %761 = vmatpush.msra.mxu3 %v692_v25 }
 0x1bf   :  { %737 = vmatpush.msrb.mxu2 %v694_v21 }
 0x1c0   :  { %762 = vmatpush.msra.mxu3 %v689_v28 }
 0x1c1   :  { %738 = vmatpush.msrb.mxu2 %v691_v24 }
 0x1c3   :  { %739 = vmatpush.msrb.mxu2 %v688_v27 }
 0x231   :  { %v583_v30 = vpop.f32.mrf.mxu2 }
 0x23a   :  { %v563_v29 = vpop.f32.mrf.mxu0 }
 0x23b   :  { %v564_v31 = vadd.f32 %v3773_v26, %v563_v29  ;;  %v693_v26 = vld [vmem:[#allocation11 + $0xa0] sm:$0xff]  ;;  %v690_v29 = vld [vmem:[#allocation11 + $0x88] sm:$0xff] }
 0x23c   :  { %784 = vmatpush.msra.mxu1 %v693_v26 }
 0x23d   :  { %v584_v35 = vadd.f32 %v583_v30, %v564_v31  ;;  %v685_v30 = vld [vmem:[#allocation11 + $0x60] sm:$0xff]  ;;  %v686_v31 = vld [vmem:[#allocation11 + $0x68] sm:$0xff] }
 0x23e   :  { %785 = vmatpush.msra.mxu1 %v690_v29  ;;  %740 = vmatpush.msrb.mxu2 %v685_v30 }
 0x23f   :  { %v592_v36 = vadd.f32 %v590_v32, %v584_v35  ;;  %v595_v37 = vadd.f32 %v593_v33, %v584_v35  ;;  %v687_v32 = vld [vmem:[#allocation11 + $0x70] sm:$0xff]  ;;  %763 = vmatpush.msra.mxu3 %v686_v31  ;;  %v682_v33 = vld [vmem:[#allocation11 + $0x48] sm:$0xff]  ;;  %v684_v35 = vld [vmem:[#allocation11 + $0x58] sm:$0xff] }
 0x240   :  { %786 = vmatpush.msra.mxu1 %v687_v32  ;;  %741 = vmatpush.msrb.mxu2 %v682_v33 }
 0x241   :  { %v597_v39 = vrot.slane %v592_v36, 7  ;;  %v4979_v40 = vrot.slane %v595_v37, 6  ;;  %v679_v36 = vld [vmem:[#allocation11 + $0x30] sm:$0xff]  ;;  %v680_v37 = vld [vmem:[#allocation11 + $0x38] sm:$0xff] }
 0x242   :  { %787 = vmatpush.msra.mxu1 %v684_v35  ;;  %742 = vmatpush.msrb.mxu2 %v679_v36 }
 0x243   :  { %v616_v41 = vsel %vm615_vm1, %v4979_v40, 0.0  ;;  %v606_v42 = vsel %vm605_vm2, %v588_v34, %v597_v39  ;;  %v683_v34 = vld [vmem:[#allocation11 + $0x50] sm:$0xff]  ;;  %v676_v39 = vld [vmem:[#allocation11 + $0x18] sm:$0xff] }
 0x244   :  { %617 = vadd.xlane.f32.xlu1 %v616_v41  ;;  %v608_v43 = vsel %vm607_vm3, %v606_v42, %v600_v38  ;;  %764 = vmatpush.msra.mxu3 %v683_v34  ;;  %v681_v38 = vld [vmem:[#allocation11 + $0x40] sm:$0xff]  ;;  %v678_v42 = vld [vmem:[#allocation11 + $0x28] sm:$0xff] }
 0x245   :  { %v4986_v44 = vsel %vm609_vm4, %v608_v43, %v4979_v40  ;;  %v677_v41 = vld [vmem:[#allocation11 + $0x20] sm:$0xff]  ;;  %788 = vmatpush.msra.mxu1 %v681_v38  ;;  %743 = vmatpush.msrb.mxu2 %v676_v39 }
 0x246   :  { %613 = vadd.xlane.f32.xlu0 %v4986_v44  ;;  %765 = vmatpush.msra.mxu3 %v680_v37  ;;  %v673_v43 = vld [vmem:[#allocation11] sm:$0xff] }
 0x247   :  { %789 = vmatpush.msra.mxu1 %v678_v42  ;;  %744 = vmatpush.msrb.mxu2 %v673_v43 }
 0x248   :  { %766 = vmatpush.msra.mxu3 %v677_v41 }
 0x249   :  { %790 = vmatpush.msra.mxu1 %v675_v46 }
 0x24a   :  { %767 = vmatpush.msra.mxu3 %v674_v45 }
 0x24b   :  { %1081 = vmatpush.msrb.mxu1 %v5009_v14 }
 0x2b7   :  { %v618_v55 = vpop.xlane.xlu1 %617 }
 0x2b8   :  { %v627_v56 = vmul.f32 %v4989_v54, %v618_v55 }
 0x2b9   :  { %v614_v57 = vpop.xlane.xlu0 %613 }
 0x2ba   :  { %v4993_v58 = vsub.f32 %v4979_v40, %v627_v56  ;;  %v626_v59 = vmul.f32 %v4989_v54, %v614_v57 }
 0x2bc   :  { %v4997_v60 = vsub.f32 %v4986_v44, %v626_v59  ;;  %v631_v61 = vmul.f32 %v4993_v58, %v4993_v58 }
 0x2be   :  { %v634_v62 = vsel %vm615_vm1, %v631_v61, 0.0  ;;  %v630_v63 = vmul.f32 %v4997_v60, %v4997_v60 }
 0x2bf   :  { %635 = vadd.xlane.f32.xlu1 %v634_v62 }
 0x2c0   :  { %632 = vadd.xlane.f32.xlu0 %v630_v63 }
 0x332   :  { %v636_v47 = vpop.xlane.xlu1 %635 }
 0x333   :  { %v638_v48 = vmul.f32 %v636_v47, %v4989_v54  ;;  %v633_v49 = vpop.xlane.xlu0 %632 }
 0x334   :  { %v637_v50 = vmul.f32 %v633_v49, %v4989_v54 }
 0x335   :  { %v640_v51 = vadd.f32 1e-05, %v638_v48 }
 0x336   :  { %v639_v52 = vadd.f32 1e-05, %v637_v50 }
 0x337   :  { %3791 = vrsqrt.f32 %v640_v51  ;;  %vm657_vm10 = vweird.f32 %v640_v51 }
 0x338   :  { %3793 = vrsqrt.f32 %v639_v52  ;;  %vm647_vm8 = vweird.f32 %v639_v52 }
 0x33d   :  { %v3792_v53 = vpop.eup %3791 }
 0x33e   :  { %v3794_v55 = vpop.eup %3793  ;;  %v652_v56 = vmul.f32 %v3792_v53, %v640_v51  ;;  %vm658_vm7 = vweird.f32 %v3792_v53 }
 0x33f   :  { %v642_v57 = vmul.f32 %v3794_v55, %v639_v52  ;;  %vm648_vm6 = vweird.f32 %v3794_v55  ;;  %vm659_vm11 = vmor %vm657_vm10, %vm658_vm7 }
 0x340   :  { %v653_v59 = vmul.f32 %v3792_v53, %v652_v56  ;;  %vm649_vm9 = vmor %vm647_vm8, %vm648_vm6 }
 0x341   :  { %v643_v61 = vmul.f32 %v3794_v55, %v642_v57 }
 0x342   :  { %v654_v62 = vmul.f32 0.5, %v653_v59  ;;  %v5076_v59 = vld [vmem:[%s5659_s23 + $0x38] sm:$0xff] }
 0x343   :  { %v644_v63 = vmul.f32 0.5, %v643_v61  ;;  %v5079_v61 = vld [vmem:[%s5659_s23 + $0x30] sm:$0xff] }
 0x344   :  { %v655_v0 = vsub.f32 1.5, %v654_v62  ;;  %v5083_v62 = vld [vmem:[%s5659_s23 + $0x28] sm:$0xff] }
 0x345   :  { %v645_v1 = vsub.f32 1.5, %v644_v63 }
 0x346   :  { %v656_v2 = vmul.f32 %v3792_v53, %v655_v0 }
 0x347   :  { %v646_v3 = vmul.f32 %v3794_v55, %v645_v1 }
 0x348   :  { %v660_v8 = vsel %vm659_vm11, %v3792_v53, %v656_v2  ;;  %v5091_v2 = vld [vmem:[%s5659_s23 + $0x20] sm:$0xff] }
 0x349   :  { %v650_v5 = vsel %vm649_vm9, %v3794_v55, %v646_v3  ;;  %v662_v11 = vmul.f32 %v660_v8, %v4993_v58  ;;  %v5021_v58 = vld [vmem:[%s5659_s23 + $0x40] sm:$0xff] }
 0x34a   :  { %v661_v6 = vmul.f32 %v650_v5, %v4997_v60  ;;  %v5013_v60 = vld [vmem:[%s5659_s23 + $0x50] sm:$0xff] }
 0x34b   :  { %v667_v12 = vmul.f32 %v3774_v4, %v662_v11  ;;  %1082 = vmatpush.msrb.mxu1 %v5013_v60  ;;  %v800_v5 = vld [vmem:[%s5659_s23 + $0x10] sm:$0xff] }
 0x34c   :  { %v666_v9 = vmul.f32 %v3774_v4, %v661_v6  ;;  %v801_v4 = vld [vmem:[%s5659_s23 + $0x18] sm:$0xff]  ;;  %v799_v6 = vld [vmem:[%s5659_s23 + $0x8] sm:$0xff] }
 0x34d   :  { %v672_v13 = vadd.f32 %v3775_v7, %v667_v12  ;;  %1083 = vmatpush.msrb.mxu1 %v5017_v15  ;;  %989 = vmatpush.msra.mxu2 %v801_v4 }
 0x34e   :  { %v671_v10 = vadd.f32 %v3775_v7, %v666_v9 }
 0x34f   :  { %1084 = vmatpush.msrb.mxu1 %v5021_v58  ;;  %990 = vmatpush.msra.mxu2 %v800_v5 }
 0x350   :  { %745 = vmatmul.f32.vlgmr.msrb.gmra.mxu2 %v671_v10  ;;  %768 = vmatmul.f32.vlgmr.msra.gmra.mxu3 %v671_v10 }
 0x351   :  { %791 = vmatmul.f32.vlgmr.msra.gmra.mxu1 %v671_v10  ;;  %991 = vmatpush.msra.mxu2 %v799_v6  ;;  %v798_v10 = vld [vmem:[%s5659_s23] sm:$0xff] }
 0x353   :  { %992 = vmatpush.msra.mxu2 %v798_v10 }
 0x358   :  { %748 = vmatmul.f32.gmra.mxu2 %v672_v13  ;;  %771 = vmatmul.f32.gmra.mxu3 %v672_v13 }
 0x359   :  { %794 = vmatmul.f32.gmra.mxu1 %v672_v13 }
 0x3ce   :  { %v792_v19 = vpop.f32.mrf.mxu1 }
 0x3cf   :  { %v5033_v24 = vadd.f32 %v792_v19, %v725_v18 }
 0x3d3   :  { %v769_v21 = vpop.f32.mrf.mxu3  ;;  %v746_v22 = vpop.f32.mrf.mxu2 }
 0x3d4   :  { %v5029_v23 = vadd.f32 %v769_v21, %v724_v17  ;;  %v5041_v25 = vadd.f32 %v746_v22, %v723_v20 }
 0x3d6   :  { %884 = vrot.lane.b32.xlu2 %v5029_v23, %s4653_s5  ;;  %3607 = vmatpush.xpose.msk.msrb.mxu0 %vm814_vm12, %v5029_v23  ;;  %v1189_v28 = vrot.slane %v5029_v23, 5  ;;  %v795_v19 = vpop.f32.mrf.mxu1 }
 0x3d7   :  { %v796_v22 = vadd.f32 %v795_v19, %v725_v18 }
 0x3d9   :  { %3608 = vmatmul.msk.f32.vlgmr.msrb.gmra.mxu0 %vm814_vm12, %v5041_v25 }
 0x3da   :  { %3609 = vmatpush.msk.msra.mxu0 %vm607_vm3, %v5033_v24 }
 0x3db   :  { %v772_v26 = vpop.f32.mrf.mxu3 }
 0x3dc   :  { %v773_v27 = vadd.f32 %v772_v26, %v724_v17  ;;  %966 = vmatpush.msrb.mxu0 %v5076_v59 }
 0x3de   :  { %v1190_v29 = vrot.slane %v773_v27, 5  ;;  %882 = vrot.lane.b32.xlu2 %v5041_v25, %s4653_s5  ;;  %967 = vmatpush.msrb.mxu0 %v5079_v61  ;;  %v1232_v27 = vrot.slane %v796_v22, 5 }
 0x3e0   :  { %v5051_v30 = vsel %vm1184_vm13, %v1189_v28, %v1190_v29  ;;  %968 = vmatpush.msrb.mxu0 %v5083_v62  ;;  %v1231_v28 = vrot.slane %v5033_v24, 5 }
 0x3e1   :  { %3630 = vmatpush.xpose.msk.msra.mxu1 %vm814_vm12, %v5051_v30 }
 0x3e2   :  { %969 = vmatpush.msrb.mxu0 %v5091_v2 }
 0x3e6   :  { %924 = vrot.lane.b32.xlu2 %v5033_v24, %s4653_s5 }
 0x430   :  { %v885_v31 = vpop.permute.xlu2 %884 }
 0x431   :  { %3611 = vmatpush.xpose.msk.msrb.mxu3 %vm814_vm12, %v885_v31 }
 0x438   :  { %v883_v32 = vpop.permute.xlu2 %882 }
 0x439   :  { %3612 = vmatmul.msk.f32.vlgmr.msrb.gmra.mxu3 %vm814_vm12, %v883_v32 }
 0x440   :  { %v925_v33 = vpop.permute.xlu2 %924 }
 0x441   :  { %3614 = vmatpush.msk.msra.mxu3 %vm607_vm3, %v925_v33 }
 0x456   :  { %v838_v34 = vpop.f32.mrf.mxu0 }
 0x457   :  { %v841_v35 = vmul.f32 0.17677669, %v838_v34 }
 0x459   :  { %v843_v36 = vsel %vm842_vm14, %v841_v35, -inf }
 0x45a   :  { %844 = vmax.xlane.f32.xlu2 %v843_v36 }
 0x4bc   :  { %v907_v37 = vpop.f32.mrf.mxu3 }
 0x4bd   :  { %v910_v38 = vmul.f32 0.17677669, %v907_v37 }
 0x4bf   :  { %v911_v39 = vsel %vm842_vm14, %v910_v38, -inf }
 0x4c0   :  { %912 = vmax.xlane.f32.xlu0 %v911_v39 }
 0x4cd   :  { %v845_v48 = vpop.xlane.xlu2 %844 }
 0x4ce   :  { %v846_v49 = vsub.f32 %v841_v35, %v845_v48  ;;  %v749_v35 = vpop.f32.mrf.mxu2 }
 0x4d0   :  { %v847_v50 = vmul.f32 1.442695, %v846_v49 }
 0x4d4   :  { %999 = vrot.lane.b32.xlu0 %v5029_v23, %s4654_s18 }
 0x533   :  { %v913_v41 = vpop.xlane.xlu0 %912 }
 0x534   :  { %v914_v42 = vsub.f32 %v910_v38, %v913_v41  ;;  %v750_v41 = vadd.f32 %v749_v35, %v723_v20 }
 0x536   :  { %v915_v43 = vmul.f32 1.442695, %v914_v42  ;;  %v1186_v42 = vrot.slane %v750_v41, 5 }
 0x538   :  { %3795 = vpow2.f32 %v915_v43  ;;  %v1185_v43 = vrot.slane %v5041_v25, 5 }
 0x539   :  { %3797 = vpow2.f32 %v847_v50 }
 0x53e   :  { %v3796_v45 = vpop.eup %3795 }
 0x53f   :  { %v917_v46 = vsel %vm842_vm14, %v3796_v45, 0.0  ;;  %v3798_v51 = vpop.eup %3797 }
 0x540   :  { %918 = vadd.xlane.f32.xlu1 %v917_v46  ;;  %v849_v52 = vsel %vm842_vm14, %v3798_v51, 0.0 }
 0x546   :  { %v1000_v47 = vpop.permute.xlu0 %999 }
 0x547   :  { %3618 = vmatpush.xpose.msk.msrb.mxu3 %vm814_vm12, %v1000_v47 }
 0x559   :  { %997 = vrot.lane.b32.xlu1 %v5041_v25, %s4654_s18 }
 0x583   :  { %850 = vadd.xlane.f32.xlu1 %v849_v52 }
 0x59c   :  { %1090 = vrot.lane.b32.xlu1 %v5041_v25, %s4628_s0 }
 0x5b3   :  { %v919_v53 = vpop.xlane.xlu1 %918 }
 0x5b4   :  { %3799 = vrcp.f32 %v919_v53 }
 0x5ba   :  { %v3800_v55 = vpop.eup %3799 }
 0x5bb   :  { %v921_v56 = vmul.f32 %v3800_v55, %v3796_v45  ;;  %v1187_v45 = vsel %vm1184_vm13, %v1185_v43, %v1186_v42 }
 0x5bd   :  { %3613 = vst.msk [vmem:[%s4835_s8 + $0x8] sm:$0x1f] %vm842_vm14, %v921_v56  ;;  %3615 = vmatmul.msk.f32.vlgmr.msra.gmra.mxu3 %vm855_vm15, %v921_v56 }
 0x5cb   :  { %v998_v57 = vpop.permute.xlu1 %997 }
 0x5cc   :  { %3619 = vmatmul.msk.f32.vlgmr.msrb.gmra.mxu3 %vm814_vm12, %v998_v57 }
 0x5f6   :  { %v851_v63 = vpop.xlane.xlu1 %850 }
 0x5f7   :  { %3801 = vrcp.f32 %v851_v63  ;;  %v5167_v63 = vld [vmem:[%s5659_s23 + $0x68] sm:$0xff] }
 0x5fd   :  { %v3802_v0 = vpop.eup %3801 }
 0x5fe   :  { %v853_v1 = vmul.f32 %v3802_v0, %v3798_v51  ;;  %v5172_v0 = vld [vmem:[%s5659_s23 + $0x60] sm:$0xff] }
 0x600   :  { %854 = vst.msk [vmem:[%s4835_s8] sm:$0x1f] %vm842_vm14, %v853_v1  ;;  %3610 = vmatmul.msk.f32.vlgmr.msra.gmra.mxu0 %vm855_vm15, %v853_v1 }
 0x60e   :  { %v1091_v31 = vpop.permute.xlu1 %1090 }
 0x640   :  { %v948_v3 = vpop.f32.mrf.mxu3 }
 0x641   :  { %3616 = vmatmul.msk.f32.vlgmr.msrb.gmra.mxu0 %vm814_vm12, %v948_v3 }
 0x64f   :  { %v1022_v7 = vpop.f32.mrf.mxu3 }
 0x650   :  { %v1025_v8 = vmul.f32 0.17677669, %v1022_v7 }
 0x652   :  { %v1026_v9 = vsel %vm842_vm14, %v1025_v8, -inf }
 0x653   :  { %1027 = vmax.xlane.f32.xlu0 %v1026_v9 }
 0x667   :  { %1092 = vrot.lane.b32.xlu0 %v5029_v23, %s4628_s0  ;;  %v5108_v23 = vsel %vm1184_vm13, %v1231_v28, %v1232_v27 }
 0x67d   :  { %v879_v11 = vpop.f32.mrf.mxu0 }
 0x67e   :  { %3617 = vmatmul.msk.f32.vlgmr.msra.gmra.mxu2 %vm814_vm12, %v879_v11 }
 0x6be   :  { %v5128_v46 = vpop.f32.mrf.mxu0 }
 0x6c6   :  { %v1028_v12 = vpop.xlane.xlu0 %1027 }
 0x6c7   :  { %v1029_v13 = vsub.f32 %v1025_v8, %v1028_v12 }
 0x6c9   :  { %v1030_v17 = vmul.f32 1.442695, %v1029_v13 }
 0x6cb   :  { %3803 = vpow2.f32 %v1030_v17 }
 0x6d1   :  { %v3804_v21 = vpop.eup %3803 }
 0x6d2   :  { %v1032_v26 = vsel %vm842_vm14, %v3804_v21, 0.0 }
 0x6d3   :  { %1033 = vadd.xlane.f32.xlu2 %v1032_v26 }
 0x6d9   :  { %v1093_v29 = vpop.permute.xlu0 %1092 }
 0x6da   :  { %3624 = vmatpush.xpose.msk.msrb.mxu2 %vm814_vm12, %v1093_v29 }
 0x6dd   :  { %3625 = vmatmul.msk.f32.vlgmr.msrb.gmra.mxu2 %vm814_vm12, %v1091_v31 }
 0x6de   :  { %3633 = vmatpush.msk.msra.mxu2 %vm607_vm3, %v5108_v23 }
 0x6e0   :  { %1366 = vmatpush.msrb.mxu2 %v801_v4 }
 0x6e2   :  { %1367 = vmatpush.msrb.mxu2 %v800_v5 }
 0x6e4   :  { %1368 = vmatpush.msrb.mxu2 %v799_v6 }
 0x6e6   :  { %1369 = vmatpush.msrb.mxu2 %v798_v10 }
 0x6eb   :  { %1039 = vrot.lane.b32.xlu2 %v5033_v24, %s4654_s18 }
 0x701   :  { %v5120_v36 = vpop.f32.mrf.mxu2 }
 0x746   :  { %v1034_v18 = vpop.xlane.xlu2 %1033 }
 0x747   :  { %3805 = vrcp.f32 %v1034_v18 }
 0x74d   :  { %v3806_v32 = vpop.eup %3805 }
 0x74e   :  { %v1036_v33 = vmul.f32 %v3806_v32, %v3804_v21  ;;  %v1040_v34 = vpop.permute.xlu2 %1039 }
 0x74f   :  { %3621 = vmatpush.msk.msra.mxu0 %vm607_vm3, %v1040_v34 }
 0x750   :  { %3620 = vst.msk [vmem:[%s4835_s8 + $0x10] sm:$0x1f] %vm842_vm14, %v1036_v33  ;;  %3622 = vmatmul.msk.f32.vlgmr.msra.gmra.mxu0 %vm855_vm15, %v1036_v33 }
 0x760   :  { %v1115_v37 = vpop.f32.mrf.mxu2 }
 0x761   :  { %v1118_v38 = vmul.f32 0.17677669, %v1115_v37 }
 0x763   :  { %v1119_v39 = vsel %vm842_vm14, %v1118_v38, -inf }
 0x764   :  { %1120 = vmax.xlane.f32.xlu1 %v1119_v39 }
 0x77d   :  { %1259 = vrot.lane.b32.xlu1 %v1187_v45, %s4653_s5 }
 0x7cd   :  { %v1063_v47 = vpop.f32.mrf.mxu0 }
 0x7ce   :  { %3623 = vmatmul.msk.f32.vlgmr.msrb.gmra.mxu1 %vm814_vm12, %v1063_v47 }
 0x7cf   :  { %1343 = vmatpush.msrb.mxu1 %v5076_v59 }
 0x7d1   :  { %1344 = vmatpush.msrb.mxu1 %v5079_v61  ;;  %v5160_v61 = vld [vmem:[%s5659_s23 + $0x78] sm:$0xff] }
 0x7d2   :  { %1174 = vmatpush.msrb.mxu0 %v5160_v61 }
 0x7d3   :  { %1345 = vmatpush.msrb.mxu1 %v5083_v62  ;;  %v5163_v62 = vld [vmem:[%s5659_s23 + $0x70] sm:$0xff] }
 0x7d4   :  { %1175 = vmatpush.msrb.mxu0 %v5163_v62 }
 0x7d5   :  { %1346 = vmatpush.msrb.mxu1 %v5091_v2 }
 0x7d6   :  { %3631 = vmatmul.msk.f32.vlgmr.msra.gmra.mxu1 %vm814_vm12, %v1187_v45  ;;  %1176 = vmatpush.msrb.mxu0 %v5167_v63 }
 0x7d7   :  { %1458 = vmatpush.msra.mxu1 %v5009_v14  ;;  %v1121_v16 = vpop.xlane.xlu1 %1120 }
 0x7d8   :  { %v1122_v25 = vsub.f32 %v1118_v38, %v1121_v16  ;;  %1177 = vmatpush.msrb.mxu0 %v5172_v0 }
 0x7d9   :  { %1459 = vmatpush.msra.mxu1 %v5013_v60 }
 0x7da   :  { %v1123_v48 = vmul.f32 1.442695, %v1122_v25 }
 0x7db   :  { %1460 = vmatpush.msra.mxu1 %v5017_v15 }
 0x7dc   :  { %3807 = vpow2.f32 %v1123_v48 }
 0x7dd   :  { %1461 = vmatpush.msra.mxu1 %v5021_v58 }
 0x7e2   :  { %v3808_v52 = vpop.eup %3807 }
 0x7e3   :  { %v1125_v14 = vsel %vm842_vm14, %v3808_v52, 0.0 }
 0x7ef   :  { %v1260_v5 = vpop.permute.xlu1 %1259 }
 0x84b   :  { %v5140_v20 = vpop.f32.mrf.mxu1 }
 0x853   :  { %v1213_v49 = vpop.f32.mrf.mxu1 }
 0x854   :  { %v1216_v50 = vmul.f32 0.17677669, %v1213_v49 }
 0x856   :  { %v1217_v51 = vsel %vm842_vm14, %v1216_v50, -inf }
 0x857   :  { %1218 = vmax.xlane.f32.xlu2 %v1217_v51 }
 0x85f   :  { %1126 = vadd.xlane.f32.xlu2 %v1125_v14 }
 0x877   :  { %1132 = vrot.lane.b32.xlu2 %v5033_v24, %s4628_s0 }
 0x87f   :  { %1467 = vrot.lane.b32.xlu2 %v1187_v45, %s4628_s0 }
 0x887   :  { %1374 = vrot.lane.b32.xlu2 %v1187_v45, %s4654_s18 }
 0x8ca   :  { %v1219_v60 = vpop.xlane.xlu2 %1218 }
 0x8cb   :  { %v1220_v15 = vsub.f32 %v1216_v50, %v1219_v60 }
 0x8cd   :  { %v1221_v58 = vmul.f32 1.442695, %v1220_v15 }
 0x8cf   :  { %3809 = vpow2.f32 %v1221_v58 }
 0x8d2   :  { %v1127_v53 = vpop.xlane.xlu2 %1126 }
 0x8d3   :  { %3811 = vrcp.f32 %v1127_v53 }
 0x8d5   :  { %v3810_v55 = vpop.eup %3809 }
 0x8d6   :  { %v1223_v56 = vsel %vm842_vm14, %v3810_v55, 0.0 }
 0x8d7   :  { %1224 = vadd.xlane.f32.xlu0 %v1223_v56 }
 0x8d9   :  { %v3812_v24 = vpop.eup %3811 }
 0x8da   :  { %v1129_v57 = vmul.f32 %v3812_v24, %v3808_v52  ;;  %v1133_v59 = vpop.permute.xlu2 %1132 }
 0x8db   :  { %3627 = vmatpush.msk.msra.mxu3 %vm607_vm3, %v1133_v59 }
 0x8dc   :  { %3626 = vst.msk [vmem:[%s4835_s8 + $0x18] sm:$0x1f] %vm842_vm14, %v1129_v57  ;;  %3628 = vmatmul.msk.f32.vlgmr.msra.gmra.mxu3 %vm855_vm15, %v1129_v57 }
 0x8e2   :  { %v1468_v7 = vpop.permute.xlu2 %1467 }
 0x8ea   :  { %v1375_v9 = vpop.permute.xlu2 %1374 }
 0x8eb   :  { %1261 = vrot.lane.b32.xlu0 %v5051_v30, %s4653_s5 }
 0x8f3   :  { %1469 = vrot.lane.b32.xlu0 %v5051_v30, %s4628_s0 }
 0x8fb   :  { %1376 = vrot.lane.b32.xlu0 %v5051_v30, %s4654_s18 }
 0x94a   :  { %v1225_v1 = vpop.xlane.xlu0 %1224 }
 0x94b   :  { %3813 = vrcp.f32 %v1225_v1 }
 0x951   :  { %v3814_v2 = vpop.eup %3813 }
 0x952   :  { %v1227_v30 = vmul.f32 %v3814_v2, %v3810_v55 }
 0x954   :  { %3632 = vst.msk [vmem:[%s4835_s8 + $0x20] sm:$0x1f] %vm842_vm14, %v1227_v30  ;;  %3634 = vmatmul.msk.f32.vlgmr.msra.gmra.mxu2 %vm855_vm15, %v1227_v30  ;;  %v3776_v30 = vld [vmem:[%s5660_s28] ss:$0 sm:$0xff] }
 0x95d   :  { %v1262_v3 = vpop.permute.xlu0 %1261 }
 0x95e   :  { %3635 = vmatpush.xpose.msk.msrb.mxu3 %vm814_vm12, %v1262_v3 }
 0x95f   :  { %v1156_v4 = vpop.f32.mrf.mxu3 }
 0x960   :  { %3629 = vmatmul.msk.f32.vlgmr.msrb.gmra.mxu0 %vm814_vm12, %v1156_v4 }
 0x961   :  { %3636 = vmatmul.msk.f32.vlgmr.msrb.gmra.mxu3 %vm814_vm12, %v1260_v5 }
 0x965   :  { %v1470_v6 = vpop.permute.xlu0 %1469 }
 0x966   :  { %3648 = vmatpush.xpose.msk.msra.mxu2 %vm814_vm12, %v1470_v6 }
 0x96d   :  { %v1377_v8 = vpop.permute.xlu0 %1376 }
 0x96e   :  { %3642 = vmatpush.xpose.msk.msra.mxu3 %vm814_vm12, %v1377_v8 }
 0x971   :  { %3643 = vmatmul.msk.f32.vlgmr.msra.gmra.mxu3 %vm814_vm12, %v1375_v9 }
 0x9d7   :  { %v1256_v10 = vpop.f32.mrf.mxu2 }
 0x9d8   :  { %3641 = vmatmul.msk.f32.vlgmr.msrb.gmra.mxu2 %vm814_vm12, %v1256_v10  ;;  %v1688_v10 = vld [vmem:[#allocation17 + $0x1f0] sm:$0xff] }
 0x9dd   :  { %v1179_v53 = vpop.f32.mrf.mxu0 }
 0x9e0   :  { %3649 = vmatmul.msk.f32.vlgmr.msra.gmra.mxu2 %vm814_vm12, %v1468_v7 }
 0x9e4   :  { %v1284_v11 = vpop.f32.mrf.mxu3 }
 0x9e5   :  { %v1287_v12 = vmul.f32 0.17677669, %v1284_v11  ;;  %v1689_v11 = vld [vmem:[#allocation17 + $0x1f8] sm:$0xff] }
 0x9e7   :  { %v1288_v13 = vsel %vm842_vm14, %v1287_v12, -inf }
 0x9e8   :  { %1289 = vmax.xlane.f32.xlu1 %v1288_v13  ;;  %v1683_v13 = vld [vmem:[#allocation17 + $0x1c8] sm:$0xff] }
 0x9f4   :  { %v1399_v17 = vpop.f32.mrf.mxu3 }
 0x9f5   :  { %v1402_v19 = vmul.f32 0.17677669, %v1399_v17  ;;  %v1685_v17 = vld [vmem:[#allocation17 + $0x1d8] sm:$0xff] }
 0x9f7   :  { %v1403_v21 = vsel %vm842_vm14, %v1402_v19, -inf }
 0x9f8   :  { %1404 = vmax.xlane.f32.xlu2 %v1403_v21 }
 0xa5b   :  { %v5188_v22 = vpop.f32.mrf.mxu2  ;;  %v1290_v26 = vpop.xlane.xlu1 %1289 }
 0xa5c   :  { %v1291_v27 = vsub.f32 %v1287_v12, %v1290_v26  ;;  %v1682_v12 = vld [vmem:[#allocation17 + $0x1c0] sm:$0xff] }
 0xa5e   :  { %v1292_v28 = vmul.f32 1.442695, %v1291_v27 }
 0xa60   :  { %3815 = vpow2.f32 %v1292_v28 }
 0xa63   :  { %v1492_v29 = vpop.f32.mrf.mxu2 }
 0xa64   :  { %v1495_v31 = vmul.f32 0.17677669, %v1492_v29 }
 0xa66   :  { %v3816_v18 = vpop.eup %3815  ;;  %v1496_v32 = vsel %vm842_vm14, %v1495_v31, -inf }
 0xa67   :  { %1497 = vmax.xlane.f32.xlu0 %v1496_v32  ;;  %v1294_v33 = vsel %vm842_vm14, %v3816_v18, 0.0  ;;  %v1679_v32 = vld [vmem:[#allocation17 + $0x1a8] sm:$0xff] }
 0xa68   :  { %1295 = vadd.xlane.f32.xlu1 %v1294_v33  ;;  %v1680_v33 = vld [vmem:[#allocation17 + $0x1b0] sm:$0xff] }
 0xa6b   :  { %v1405_v34 = vpop.xlane.xlu2 %1404 }
 0xa6c   :  { %v1406_v35 = vsub.f32 %v1402_v19, %v1405_v34  ;;  %v1681_v34 = vld [vmem:[#allocation17 + $0x1b8] sm:$0xff] }
 0xa6e   :  { %v1407_v37 = vmul.f32 1.442695, %v1406_v35  ;;  %v1674_v35 = vld [vmem:[#allocation17 + $0x180] sm:$0xff] }
 0xa70   :  { %3817 = vpow2.f32 %v1407_v37  ;;  %v1675_v37 = vld [vmem:[#allocation17 + $0x188] sm:$0xff] }
 0xa76   :  { %v3818_v38 = vpop.eup %3817 }
 0xa77   :  { %v1409_v39 = vsel %vm842_vm14, %v3818_v38, 0.0 }
 0xa78   :  { %1410 = vadd.xlane.f32.xlu2 %v1409_v39  ;;  %v1677_v39 = vld [vmem:[#allocation17 + $0x198] sm:$0xff] }
 0xa81   :  { %1301 = vrot.lane.b32.xlu1 %v5108_v23, %s4653_s5 }
 0xa90   :  { %1416 = vrot.lane.b32.xlu2 %v5108_v23, %s4654_s18 }
 0xada   :  { %v1498_v41 = vpop.xlane.xlu0 %1497 }
 0xadb   :  { %v1499_v42 = vsub.f32 %v1495_v31, %v1498_v41  ;;  %v1296_v43 = vpop.xlane.xlu1 %1295  ;;  %v1670_v41 = vld [vmem:[#allocation17 + $0x160] sm:$0xff] }
 0xadc   :  { %3819 = vrcp.f32 %v1296_v43  ;;  %v1672_v43 = vld [vmem:[#allocation17 + $0x170] sm:$0xff] }
 0xadd   :  { %v1500_v45 = vmul.f32 1.442695, %v1499_v42  ;;  %v1671_v42 = vld [vmem:[#allocation17 + $0x168] sm:$0xff] }
 0xadf   :  { %3821 = vpow2.f32 %v1500_v45  ;;  %v1673_v45 = vld [vmem:[#allocation17 + $0x178] sm:$0xff] }
 0xae2   :  { %v3820_v47 = vpop.eup %3819 }
 0xae3   :  { %v1298_v16 = vmul.f32 %v3820_v47, %v3816_v18  ;;  %v1678_v18 = vld [vmem:[#allocation17 + $0x1a0] sm:$0xff] }
 0xae4   :  { %v1666_v47 = vld [vmem:[#allocation17 + $0x140] sm:$0xff] }
 0xae5   :  { %v3822_v25 = vpop.eup %3821  ;;  %3637 = vst.msk [vmem:[%s4835_s8 + $0x28] sm:$0x1f] %vm842_vm14, %v1298_v16 }
 0xae6   :  { %v1502_v48 = vsel %vm842_vm14, %v3822_v25, 0.0 }
 0xae7   :  { %1503 = vadd.xlane.f32.xlu0 %v1502_v48  ;;  %v1669_v48 = vld [vmem:[#allocation17 + $0x158] sm:$0xff] }
 0xaeb   :  { %v1411_v49 = vpop.xlane.xlu2 %1410 }
 0xaec   :  { %3823 = vrcp.f32 %v1411_v49  ;;  %v1662_v49 = vld [vmem:[#allocation17 + $0x120] sm:$0xff] }
 0xaf2   :  { %v3824_v50 = vpop.eup %3823 }
 0xaf3   :  { %v1413_v51 = vmul.f32 %v3824_v50, %v3818_v38  ;;  %v1302_v52 = vpop.permute.xlu1 %1301  ;;  %v1417_v14 = vpop.permute.xlu2 %1416  ;;  %v1676_v38 = vld [vmem:[#allocation17 + $0x190] sm:$0xff]  ;;  %v1663_v50 = vld [vmem:[#allocation17 + $0x128] sm:$0xff] }
 0xaf4   :  { %3638 = vmatpush.msk.msra.mxu0 %vm607_vm3, %v1302_v52  ;;  %v1665_v52 = vld [vmem:[#allocation17 + $0x138] sm:$0xff] }
 0xaf5   :  { %3644 = vst.msk [vmem:[%s4835_s8 + $0x30] sm:$0x1f] %vm842_vm14, %v1413_v51  ;;  %3639 = vmatmul.msk.f32.vlgmr.msra.gmra.mxu0 %vm855_vm15, %v1298_v16  ;;  %v1667_v16 = vld [vmem:[#allocation17 + $0x148] sm:$0xff] }
 0xaf6   :  { %3645 = vmatpush.msk.msrb.mxu0 %vm607_vm3, %v1417_v14  ;;  %v1658_v14 = vld [vmem:[#allocation17 + $0x100] sm:$0xff] }
 0xaf8   :  { %1551 = vmatpush.msra.mxu0 %v5160_v61 }
 0xafa   :  { %1552 = vmatpush.msra.mxu0 %v5163_v62  ;;  %v995_v62 = vadd.f32 %v5120_v36, %v5128_v46  ;;  %v1686_v46 = vld [vmem:[#allocation17 + $0x1e0] sm:$0xff] }
 0xafb   :  { %1509 = vrot.lane.b32.xlu0 %v5108_v23, %s4628_s0 }
 0xafc   :  { %1553 = vmatpush.msra.mxu0 %v5167_v63  ;;  %v1089_v1 = vadd.f32 %v5140_v20, %v995_v62  ;;  %v1687_v20 = vld [vmem:[#allocation17 + $0x1e8] sm:$0xff]  ;;  %v1646_v62 = vld [vmem:[#allocation17 + $0xa0] sm:$0xff] }
 0xafd   :  { %3646 = vmatmul.msk.f32.vlgmr.msrb.gmra.mxu0 %vm855_vm15, %v1413_v51  ;;  %1723 = vmatpush.msrb.mxu2 %v1687_v20  ;;  %v1664_v51 = vld [vmem:[#allocation17 + $0x130] sm:$0xff]  ;;  %v1635_v20 = vld [vmem:[#allocation17 + $0x48] sm:$0xff] }
 0xafe   :  { %1554 = vmatpush.msra.mxu0 %v5172_v0  ;;  %v1182_v3 = vadd.f32 %v1179_v53, %v1089_v1  ;;  %v1654_v53 = vld [vmem:[#allocation17 + $0xe0] sm:$0xff]  ;;  %v1649_v1 = vld [vmem:[#allocation17 + $0xb8] sm:$0xff] }
 0xaff   :  { %1724 = vmatpush.msrb.mxu2 %v1683_v13  ;;  %v1631_v13 = vld [vmem:[#allocation17 + $0x28] sm:$0xff] }
 0xb00   :  { %1769 = vmatpush.msrb.mxu0 %v1689_v11  ;;  %v1637_v11 = vld [vmem:[#allocation17 + $0x58] sm:$0xff] }
 0xb01   :  { %1725 = vmatpush.msrb.mxu2 %v1679_v32 }
 0xb02   :  { %1770 = vmatpush.msrb.mxu0 %v1685_v17  ;;  %v1633_v17 = vld [vmem:[#allocation17 + $0x38] sm:$0xff] }
 0xb03   :  { %1726 = vmatpush.msrb.mxu2 %v1675_v37  ;;  %v1878_v37 = vld [vmem:[#allocation19 + $0x70] sm:$0xff] }
 0xb04   :  { %1771 = vmatpush.msrb.mxu0 %v1681_v34  ;;  %v1879_v34 = vld [vmem:[#allocation19 + $0x78] sm:$0xff] }
 0xb05   :  { %1727 = vmatpush.msrb.mxu2 %v1671_v42 }
 0xb06   :  { %1772 = vmatpush.msrb.mxu0 %v1677_v39  ;;  %v1877_v39 = vld [vmem:[#allocation19 + $0x68] sm:$0xff] }
 0xb07   :  { %1728 = vmatpush.msrb.mxu2 %v1667_v16 }
 0xb08   :  { %1773 = vmatpush.msrb.mxu0 %v1673_v45 }
 0xb09   :  { %1729 = vmatpush.msrb.mxu2 %v1663_v50 }
 0xb0a   :  { %1774 = vmatpush.msrb.mxu0 %v1669_v48 }
 0xb0c   :  { %1775 = vmatpush.msrb.mxu0 %v1665_v52 }
 0xb5a   :  { %v1504_v60 = vpop.xlane.xlu0 %1503 }
 0xb5b   :  { %3825 = vrcp.f32 %v1504_v60  ;;  %v1659_v60 = vld [vmem:[#allocation17 + $0x108] sm:$0xff] }
 0xb5c   :  { %1730 = vmatpush.msrb.mxu2 %v1659_v60  ;;  %v3777_v60 = vld [vmem:[#allocation14] ss:$0 sm:$0xff] }
 0xb61   :  { %v3826_v15 = vpop.eup %3825 }
 0xb62   :  { %v1506_v58 = vmul.f32 %v3826_v15, %v3822_v25  ;;  %v1668_v25 = vld [vmem:[#allocation17 + $0x150] sm:$0xff] }
 0xb63   :  { %v1660_v15 = vld [vmem:[#allocation17 + $0x110] sm:$0xff] }
 0xb64   :  { %3650 = vst.msk [vmem:[%s4835_s8 + $0x38] sm:$0x1f] %vm842_vm14, %v1506_v58  ;;  %s5661_s8 = sld [smem:[#allocation66_spill]] }
 0xb6d   :  { %v1510_v55 = vpop.permute.xlu0 %1509 }
 0xb6e   :  { %3651 = vmatpush.msk.msrb.mxu3 %vm607_vm3, %v1510_v55  ;;  %v1655_v55 = vld [vmem:[#allocation17 + $0xe8] sm:$0xff] }
 0xb6f   :  { %3652 = vmatmul.msk.f32.vlgmr.msrb.gmra.mxu3 %vm855_vm15, %v1506_v58  ;;  %v1661_v58 = vld [vmem:[#allocation17 + $0x118] sm:$0xff]  ;;  %1731 = vmatpush.msrb.mxu2 %v1655_v55 }
 0xb70   :  { %1746 = vmatpush.msra.mxu3 %v1688_v10  ;;  %1776 = vmatpush.msrb.mxu0 %v1661_v58  ;;  %v1636_v10 = vld [vmem:[#allocation17 + $0x50] sm:$0xff] }
 0xb72   :  { %v1325_v23 = vpop.f32.mrf.mxu0 }
 0xb73   :  { %3640 = vmatmul.msk.f32.vlgmr.msrb.gmra.mxu1 %vm814_vm12, %v1325_v23  ;;  %v1656_v23 = vld [vmem:[#allocation17 + $0xf0] sm:$0xff] }
 0xb74   :  { %1700 = vmatpush.msrb.mxu1 %v1686_v46  ;;  %v1634_v46 = vld [vmem:[#allocation17 + $0x40] sm:$0xff] }
 0xb76   :  { %1701 = vmatpush.msrb.mxu1 %v1682_v12  ;;  %v1630_v12 = vld [vmem:[#allocation17 + $0x20] sm:$0xff] }
 0xb78   :  { %1702 = vmatpush.msrb.mxu1 %v1678_v18 }
 0xb7a   :  { %v1440_v56 = vpop.f32.mrf.mxu0  ;;  %1703 = vmatpush.msrb.mxu1 %v1674_v35  ;;  %v1927_v35 = vld [vmem:[#allocation19 + $0x1f8] sm:$0xff] }
 0xb7b   :  { %3647 = vmatmul.msk.f32.vlgmr.msra.gmra.mxu1 %vm814_vm12, %v1440_v56  ;;  %v1657_v56 = vld [vmem:[#allocation17 + $0xf8] sm:$0xff] }
 0xb7c   :  { %1704 = vmatpush.msrb.mxu1 %v1670_v41  ;;  %1777 = vmatpush.msrb.mxu0 %v1657_v56  ;;  %v1925_v41 = vld [vmem:[#allocation19 + $0x1e8] sm:$0xff] }
 0xb7e   :  { %1705 = vmatpush.msrb.mxu1 %v1666_v47 }
 0xb80   :  { %1706 = vmatpush.msrb.mxu1 %v1662_v49 }
 0xb82   :  { %1707 = vmatpush.msrb.mxu1 %v1658_v14 }
 0xb84   :  { %1708 = vmatpush.msrb.mxu1 %v1654_v53  ;;  %v3778_v53 = vld [vmem:[#allocation16] ss:$0 sm:$0xff] }
 0xbf0   :  { %v1348_v57 = vpop.f32.mrf.mxu1 }
 0xbf1   :  { %v1372_v61 = vadd.f32 %v5188_v22, %v1348_v57  ;;  %v1651_v57 = vld [vmem:[#allocation17 + $0xc8] sm:$0xff] }
 0xbf2   :  { %v1533_v24 = vpop.f32.mrf.mxu3  ;;  %1732 = vmatpush.msrb.mxu2 %v1651_v57 }
 0xbf3   :  { %3653 = vmatmul.msk.f32.vlgmr.msra.gmra.mxu0 %vm814_vm12, %v1533_v24  ;;  %v1650_v24 = vld [vmem:[#allocation17 + $0xc0] sm:$0xff] }
 0xbf4   :  { %1709 = vmatpush.msrb.mxu1 %v1650_v24 }
 0xbf6   :  { %1710 = vmatpush.msrb.mxu1 %v1646_v62  ;;  %v1895_v62 = vld [vmem:[#allocation19 + $0xf8] sm:$0xff] }
 0xbf8   :  { %v1463_v59 = vpop.f32.mrf.mxu1 }
 0xbf9   :  { %v1466_v63 = vadd.f32 %v1463_v59, %v1372_v61  ;;  %v1652_v59 = vld [vmem:[#allocation17 + $0xd0] sm:$0xff]  ;;  %v1653_v61 = vld [vmem:[#allocation17 + $0xd8] sm:$0xff] }
 0xbfa   :  { %1778 = vmatpush.msrb.mxu0 %v1653_v61  ;;  %v1876_v61 = vld [vmem:[#allocation19 + $0x60] sm:$0xff] }
 0xbfc   :  { %1779 = vmatpush.msrb.mxu0 %v1649_v1  ;;  %v1910_v1 = vld [vmem:[#allocation19 + $0x170] sm:$0xff] }
 0xc70   :  { %v1556_v0 = vpop.f32.mrf.mxu0 }
 0xc71   :  { %v1559_v2 = vadd.f32 %v1556_v0, %v1466_v63  ;;  %v1647_v63 = vld [vmem:[#allocation17 + $0xa8] sm:$0xff]  ;;  %v1648_v0 = vld [vmem:[#allocation17 + $0xb0] sm:$0xff] }
 0xc72   :  { %1733 = vmatpush.msrb.mxu2 %v1647_v63  ;;  %v1924_v63 = vld [vmem:[#allocation19 + $0x1e0] sm:$0xff] }
 0xc73   :  { %v1561_v4 = vrot.slane %v1559_v2, 3  ;;  %v1642_v2 = vld [vmem:[#allocation17 + $0x80] sm:$0xff] }
 0xc74   :  { %1711 = vmatpush.msrb.mxu1 %v1642_v2  ;;  %v1923_v2 = vld [vmem:[#allocation19 + $0x1d8] sm:$0xff] }
 0xc75   :  { %v1563_v5 = vsel %vm607_vm3, %v1182_v3, %v1561_v4  ;;  %v1569_v6 = vadd.f32 %v3776_v30, %v1561_v4  ;;  %v1644_v3 = vld [vmem:[#allocation17 + $0x90] sm:$0xff]  ;;  %v1645_v4 = vld [vmem:[#allocation17 + $0x98] sm:$0xff] }
 0xc76   :  { %v1568_v7 = vadd.f32 %v3776_v30, %v1563_v5  ;;  %v1643_v30 = vld [vmem:[#allocation17 + $0x88] sm:$0xff]  ;;  %1780 = vmatpush.msrb.mxu0 %v1645_v4  ;;  %v1638_v5 = vld [vmem:[#allocation17 + $0x60] sm:$0xff] }
 0xc77   :  { %v5226_v8 = vadd.f32 %v1569_v6, %v4979_v40  ;;  %v1684_v40 = vld [vmem:[#allocation17 + $0x1d0] sm:$0xff]  ;;  %1734 = vmatpush.msrb.mxu2 %v1643_v30  ;;  %v1639_v6 = vld [vmem:[#allocation17 + $0x68] sm:$0xff]  ;;  %1712 = vmatpush.msrb.mxu1 %v1638_v5 }
 0xc78   :  { %v5229_v9 = vadd.f32 %v1568_v7, %v4986_v44  ;;  %1747 = vmatpush.msra.mxu3 %v1684_v40  ;;  %v1640_v7 = vld [vmem:[#allocation17 + $0x70] sm:$0xff]  ;;  %v1909_v4 = vld [vmem:[#allocation19 + $0x168] sm:$0xff] }
 0xc79   :  { %v1576_v36 = vsel %vm615_vm1, %v5226_v8, 0.0  ;;  %1735 = vmatpush.msrb.mxu2 %v1639_v6  ;;  %1713 = vmatpush.msrb.mxu1 %v1634_v46  ;;  %v1632_v40 = vld [vmem:[#allocation17 + $0x30] sm:$0xff]  ;;  %v1873_v6 = vld [vmem:[#allocation19 + $0x48] sm:$0xff] }
 0xc7a   :  { %1577 = vadd.xlane.f32.xlu2 %v1576_v36  ;;  %1574 = vadd.xlane.f32.xlu0 %v5229_v9  ;;  %v1641_v36 = vld [vmem:[#allocation17 + $0x78] sm:$0xff]  ;;  %v1874_v30 = vld [vmem:[#allocation19 + $0x50] sm:$0xff]  ;;  %v1921_v46 = vld [vmem:[#allocation19 + $0x1c8] sm:$0xff] }
 0xc7b   :  { %1748 = vmatpush.msra.mxu3 %v1680_v33  ;;  %1781 = vmatpush.msrb.mxu0 %v1641_v36  ;;  %v1922_v5 = vld [vmem:[#allocation19 + $0x1d0] sm:$0xff]  ;;  %v1908_v36 = vld [vmem:[#allocation19 + $0x160] sm:$0xff] }
 0xc7c   :  { %1736 = vmatpush.msrb.mxu2 %v1635_v20  ;;  %1714 = vmatpush.msrb.mxu1 %v1630_v12  ;;  %v1872_v20 = vld [vmem:[#allocation19 + $0x40] sm:$0xff] }
 0xc7d   :  { %1749 = vmatpush.msra.mxu3 %v1676_v38  ;;  %1782 = vmatpush.msrb.mxu0 %v1637_v11  ;;  %v1926_v38 = vld [vmem:[#allocation19 + $0x1f0] sm:$0xff]  ;;  %v1907_v11 = vld [vmem:[#allocation19 + $0x158] sm:$0xff]  ;;  %v1920_v12 = vld [vmem:[#allocation19 + $0x1c0] sm:$0xff] }
 0xc7e   :  { %1737 = vmatpush.msrb.mxu2 %v1631_v13  ;;  %v1871_v13 = vld [vmem:[#allocation19 + $0x38] sm:$0xff] }
 0xc7f   :  { %1750 = vmatpush.msra.mxu3 %v1672_v43  ;;  %1783 = vmatpush.msrb.mxu0 %v1633_v17  ;;  %v1906_v17 = vld [vmem:[#allocation19 + $0x150] sm:$0xff] }
 0xc81   :  { %1751 = vmatpush.msra.mxu3 %v1668_v25 }
 0xc83   :  { %1752 = vmatpush.msra.mxu3 %v1664_v51 }
 0xc85   :  { %1753 = vmatpush.msra.mxu3 %v1660_v15 }
 0xc87   :  { %1754 = vmatpush.msra.mxu3 %v1656_v23 }
 0xc89   :  { %1755 = vmatpush.msra.mxu3 %v1652_v59 }
 0xc8b   :  { %1756 = vmatpush.msra.mxu3 %v1648_v0  ;;  %v1894_v0 = vld [vmem:[#allocation19 + $0xf0] sm:$0xff] }
 0xc8d   :  { %1757 = vmatpush.msra.mxu3 %v1644_v3  ;;  %v1893_v3 = vld [vmem:[#allocation19 + $0xe8] sm:$0xff] }
 0xc8f   :  { %1758 = vmatpush.msra.mxu3 %v1640_v7  ;;  %v1892_v7 = vld [vmem:[#allocation19 + $0xe0] sm:$0xff] }
 0xc91   :  { %1759 = vmatpush.msra.mxu3 %v1636_v10  ;;  %v1891_v10 = vld [vmem:[#allocation19 + $0xd8] sm:$0xff] }
 0xc93   :  { %1760 = vmatpush.msra.mxu3 %v1632_v40  ;;  %v1890_v40 = vld [vmem:[#allocation19 + $0xd0] sm:$0xff] }
 0xced   :  { %v1578_v44 = vpop.xlane.xlu2 %1577  ;;  %v1575_v19 = vpop.xlane.xlu0 %1574 }
 0xcee   :  { %v1580_v21 = vmul.f32 %v1578_v44, %v4989_v54  ;;  %v1579_v22 = vmul.f32 %v1575_v19, %v4989_v54  ;;  %v1626_v44 = vld [vmem:[#allocation17] sm:$0xff]  ;;  %v1627_v19 = vld [vmem:[#allocation17 + $0x8] sm:$0xff] }
 0xcef   :  { %1715 = vmatpush.msrb.mxu1 %v1626_v44  ;;  %1738 = vmatpush.msrb.mxu2 %v1627_v19  ;;  %v1919_v44 = vld [vmem:[#allocation19 + $0x1b8] sm:$0xff]  ;;  %v1870_v19 = vld [vmem:[#allocation19 + $0x30] sm:$0xff] }
 0xcf0   :  { %v5237_v26 = vsub.f32 %v5226_v8, %v1580_v21  ;;  %v5240_v27 = vsub.f32 %v5229_v9, %v1579_v22  ;;  %v1628_v21 = vld [vmem:[#allocation17 + $0x10] sm:$0xff]  ;;  %v1629_v22 = vld [vmem:[#allocation17 + $0x18] sm:$0xff] }
 0xcf1   :  { %1761 = vmatpush.msra.mxu3 %v1628_v21  ;;  %1784 = vmatpush.msrb.mxu0 %v1629_v22  ;;  %v1889_v21 = vld [vmem:[#allocation19 + $0xc8] sm:$0xff] }
 0xcf2   :  { %v1583_v28 = vmul.f32 %v5240_v27, %v5240_v27  ;;  %v1584_v29 = vmul.f32 %v5237_v26, %v5237_v26  ;;  %1932 = vmatpush.msra.mxu1 %v1879_v34  ;;  %1955 = vmatpush.msra.mxu2 %v1895_v62  ;;  %v1905_v22 = vld [vmem:[#allocation19 + $0x148] sm:$0xff]  ;;  %v1887_v34 = vld [vmem:[#allocation19 + $0xb8] sm:$0xff] }
 0xcf3   :  { %2001 = vmatpush.msra.mxu0 %v1927_v35  ;;  %v1903_v35 = vld [vmem:[#allocation19 + $0x138] sm:$0xff] }
 0xcf4   :  { %1585 = vadd.xlane.f32.xlu1 %v1583_v28  ;;  %v1587_v31 = vsel %vm615_vm1, %v1584_v29, 0.0  ;;  %1933 = vmatpush.msra.mxu1 %v1878_v37  ;;  %v1916_v37 = vld [vmem:[#allocation19 + $0x1a0] sm:$0xff] }
 0xcf5   :  { %1588 = vadd.xlane.f32.xlu0 %v1587_v31  ;;  %2002 = vmatpush.msra.mxu0 %v1926_v38  ;;  %v1867_v38 = vld [vmem:[#allocation19 + $0x18] sm:$0xff] }
 0xcf6   :  { %1934 = vmatpush.msra.mxu1 %v1877_v39  ;;  %1956 = vmatpush.msra.mxu2 %v1894_v0  ;;  %v1886_v39 = vld [vmem:[#allocation19 + $0xb0] sm:$0xff] }
 0xcf7   :  { %2003 = vmatpush.msra.mxu0 %v1925_v41  ;;  %v1902_v41 = vld [vmem:[#allocation19 + $0x130] sm:$0xff] }
 0xcf8   :  { %1935 = vmatpush.msra.mxu1 %v1876_v61  ;;  %1957 = vmatpush.msra.mxu2 %v1893_v3 }
 0xcf9   :  { %2004 = vmatpush.msra.mxu0 %v1924_v63 }
 0xcfa   :  { %1958 = vmatpush.msra.mxu2 %v1892_v7 }
 0xcfb   :  { %2005 = vmatpush.msra.mxu0 %v1923_v2 }
 0xcfc   :  { %1959 = vmatpush.msra.mxu2 %v1891_v10 }
 0xcfd   :  { %2006 = vmatpush.msra.mxu0 %v1922_v5 }
 0xcfe   :  { %1960 = vmatpush.msra.mxu2 %v1890_v40 }
 0xcff   :  { %2007 = vmatpush.msra.mxu0 %v1921_v46 }
 0xd00   :  { %1961 = vmatpush.msra.mxu2 %v1889_v21 }
 0xd01   :  { %2008 = vmatpush.msra.mxu0 %v1920_v12 }
 0xd03   :  { %2009 = vmatpush.msra.mxu0 %v1919_v44 }
 0xd67   :  { %v1586_v28 = vpop.xlane.xlu1 %1585 }
 0xd68   :  { %v1590_v29 = vmul.f32 %v1586_v28, %v4989_v54  ;;  %v1589_v31 = vpop.xlane.xlu0 %1588  ;;  %v1918_v28 = vld [vmem:[#allocation19 + $0x1b0] sm:$0xff] }
 0xd69   :  { %v1591_v18 = vmul.f32 %v1589_v31, %v4989_v54  ;;  %2010 = vmatpush.msra.mxu0 %v1918_v28  ;;  %v1888_v31 = vld [vmem:[#allocation19 + $0xc0] sm:$0xff] }
 0xd6a   :  { %v1592_v32 = vadd.f32 1e-05, %v1590_v29  ;;  %v1869_v29 = vld [vmem:[#allocation19 + $0x28] sm:$0xff]  ;;  %1962 = vmatpush.msra.mxu2 %v1888_v31 }
 0xd6b   :  { %v1593_v33 = vadd.f32 1e-05, %v1591_v18  ;;  %v1904_v18 = vld [vmem:[#allocation19 + $0x140] sm:$0xff] }
 0xd6c   :  { %3827 = vrsqrt.f32 %v1592_v32  ;;  %vm1600_vm4 = vweird.f32 %v1592_v32  ;;  %1963 = vmatpush.msra.mxu2 %v1887_v34 }
 0xd6d   :  { %3829 = vrsqrt.f32 %v1593_v33  ;;  %vm1610_vm7 = vweird.f32 %v1593_v33 }
 0xd6e   :  { %1964 = vmatpush.msra.mxu2 %v1886_v39 }
 0xd72   :  { %v3828_v42 = vpop.eup %3827 }
 0xd73   :  { %v3830_v43 = vpop.eup %3829  ;;  %v1595_v45 = vmul.f32 %v3828_v42, %v1592_v32  ;;  %vm1601_vm0 = vweird.f32 %v3828_v42  ;;  %v1917_v32 = vld [vmem:[#allocation19 + $0x1a8] sm:$0xff] }
 0xd74   :  { %v1605_v47 = vmul.f32 %v3830_v43, %v1593_v33  ;;  %vm1611_vm5 = vweird.f32 %v3830_v43  ;;  %vm1602_vm6 = vmor %vm1600_vm4, %vm1601_vm0  ;;  %2011 = vmatpush.msra.mxu0 %v1917_v32  ;;  %v1868_v33 = vld [vmem:[#allocation19 + $0x20] sm:$0xff] }
 0xd75   :  { %v1596_v16 = vmul.f32 %v3828_v42, %v1595_v45  ;;  %vm1612_vm8 = vmor %vm1610_vm7, %vm1611_vm5  ;;  %v1885_v45 = vld [vmem:[#allocation19 + $0xa8] sm:$0xff] }
 0xd76   :  { %v1606_v25 = vmul.f32 %v3830_v43, %v1605_v47  ;;  %2012 = vmatpush.msra.mxu0 %v1916_v37  ;;  %v1901_v47 = vld [vmem:[#allocation19 + $0x128] sm:$0xff]  ;;  %1965 = vmatpush.msra.mxu2 %v1885_v45 }
 0xd77   :  { %v1597_v48 = vmul.f32 0.5, %v1596_v16  ;;  %v1914_v16 = vld [vmem:[#allocation19 + $0x190] sm:$0xff] }
 0xd78   :  { %v1607_v49 = vmul.f32 0.5, %v1606_v25  ;;  %v1865_v25 = vld [vmem:[#allocation19 + $0x8] sm:$0xff] }
 0xd79   :  { %v1598_v50 = vsub.f32 1.5, %v1597_v48  ;;  %v1884_v48 = vld [vmem:[#allocation19 + $0xa0] sm:$0xff] }
 0xd7a   :  { %v1608_v51 = vsub.f32 1.5, %v1607_v49  ;;  %v1900_v49 = vld [vmem:[#allocation19 + $0x120] sm:$0xff]  ;;  %1966 = vmatpush.msra.mxu2 %v1884_v48 }
 0xd7b   :  { %v1599_v52 = vmul.f32 %v3828_v42, %v1598_v50  ;;  %v1913_v50 = vld [vmem:[#allocation19 + $0x188] sm:$0xff] }
 0xd7c   :  { %v1609_v14 = vmul.f32 %v3830_v43, %v1608_v51  ;;  %v1864_v51 = vld [vmem:[#allocation19] sm:$0xff] }
 0xd7d   :  { %v1603_v15 = vsel %vm1602_vm6, %v3828_v42, %v1599_v52  ;;  %v1915_v42 = vld [vmem:[#allocation19 + $0x198] sm:$0xff] }
 0xd7e   :  { %v1614_v58 = vmul.f32 %v1603_v15, %v5240_v27  ;;  %v1613_v55 = vsel %vm1612_vm8, %v3830_v43, %v1609_v14  ;;  %v1911_v27 = vld [vmem:[#allocation19 + $0x178] sm:$0xff]  ;;  %v1866_v43 = vld [vmem:[#allocation19 + $0x10] sm:$0xff]  ;;  %2013 = vmatpush.msra.mxu0 %v1915_v42 }
 0xd7f   :  { %v1615_v56 = vmul.f32 %v1613_v55, %v5237_v26  ;;  %1978 = vmatpush.msrb.mxu3 %v1911_v27  ;;  %v1875_v26 = vld [vmem:[#allocation19 + $0x58] sm:$0xff]  ;;  %v1690_v15 = vld [vmem:[%s5661_s8] sm:$0xf]  ;;  %v1881_v55 = vld [vmem:[#allocation19 + $0x88] sm:$0xff] }
 0xd80   :  { %v1619_v23 = vmul.f32 %v3777_v60, %v1614_v58  ;;  %1936 = vmatpush.msra.mxu1 %v1875_v26  ;;  %2014 = vmatpush.msra.mxu0 %v1914_v16  ;;  %v1883_v52 = vld [vmem:[#allocation19 + $0x98] sm:$0xff]  ;;  %v1882_v58 = vld [vmem:[#allocation19 + $0x90] sm:$0xff]  ;;  %v1693_v0 = vperm.slane %v1690_v15, 1  ;;  %v1694_v2 = vperm.slane %v1690_v15, 2 }
 0xd81   :  { %v1620_v57 = vmul.f32 %v3777_v60, %v1615_v56  ;;  %1979 = vmatpush.msrb.mxu3 %v1910_v1  ;;  %v1899_v14 = vld [vmem:[#allocation19 + $0x118] sm:$0xff]  ;;  %v1912_v60 = vld [vmem:[#allocation19 + $0x180] sm:$0xff]  ;;  %1967 = vmatpush.msra.mxu2 %v1883_v52  ;;  %v1692_v56 = vperm.slane %v1690_v15, 0 }
 0xd82   :  { %v1624_v24 = vadd.f32 %v3778_v53, %v1619_v23  ;;  %1937 = vmatpush.msra.mxu1 %v1874_v30  ;;  %2015 = vmatpush.msra.mxu0 %v1913_v50  ;;  %v1897_v23 = vld [vmem:[#allocation19 + $0x108] sm:$0xff] }
 0xd83   :  { %v1625_v59 = vadd.f32 %v3778_v53, %v1620_v57  ;;  %1980 = vmatpush.msrb.mxu3 %v1909_v4  ;;  %v1898_v53 = vld [vmem:[#allocation19 + $0x110] sm:$0xff]  ;;  %1968 = vmatpush.msra.mxu2 %v1882_v58  ;;  %v1695_v57 = vperm.slane %v1690_v15, 3 }
 0xd84   :  { %1716 = vmatmul.f32.vlgmr.msrb.gmra.mxu1 %v1624_v24  ;;  %1739 = vmatmul.f32.vlgmr.msrb.gmra.mxu2 %v1624_v24 }
 0xd85   :  { %1762 = vmatmul.f32.vlgmr.msra.gmra.mxu3 %v1624_v24  ;;  %1785 = vmatmul.f32.vlgmr.msrb.gmra.mxu0 %v1624_v24  ;;  %v1880_v24 = vld [vmem:[#allocation19 + $0x80] sm:$0xff] }
 0xd86   :  { %1938 = vmatpush.msra.mxu1 %v1873_v6  ;;  %1981 = vmatpush.msrb.mxu3 %v1908_v36 }
 0xd87   :  { %2016 = vmatpush.msra.mxu0 %v1912_v60  ;;  %1969 = vmatpush.msra.mxu2 %v1881_v55 }
 0xd88   :  { %1939 = vmatpush.msra.mxu1 %v1872_v20  ;;  %1982 = vmatpush.msrb.mxu3 %v1907_v11 }
 0xd89   :  { %1970 = vmatpush.msra.mxu2 %v1880_v24 }
 0xd8a   :  { %1940 = vmatpush.msra.mxu1 %v1871_v13  ;;  %1983 = vmatpush.msrb.mxu3 %v1906_v17 }
 0xd8c   :  { %1719 = vmatmul.f32.gmra.mxu1 %v1625_v59  ;;  %1742 = vmatmul.f32.gmra.mxu2 %v1625_v59 }
 0xd8d   :  { %1765 = vmatmul.f32.gmra.mxu3 %v1625_v59  ;;  %1788 = vmatmul.f32.gmra.mxu0 %v1625_v59  ;;  %v1896_v59 = vld [vmem:[#allocation19 + $0x100] sm:$0xff] }
 0xd8e   :  { %1941 = vmatpush.msra.mxu1 %v1870_v19  ;;  %1984 = vmatpush.msrb.mxu3 %v1905_v22 }
 0xd90   :  { %1942 = vmatpush.msra.mxu1 %v1869_v29  ;;  %1985 = vmatpush.msrb.mxu3 %v1904_v18 }
 0xd92   :  { %1943 = vmatpush.msra.mxu1 %v1868_v33  ;;  %1986 = vmatpush.msrb.mxu3 %v1903_v35 }
 0xd94   :  { %1944 = vmatpush.msra.mxu1 %v1867_v38  ;;  %1987 = vmatpush.msrb.mxu3 %v1902_v41 }
 0xd96   :  { %1945 = vmatpush.msra.mxu1 %v1866_v43  ;;  %1988 = vmatpush.msrb.mxu3 %v1901_v47 }
 0xd98   :  { %1946 = vmatpush.msra.mxu1 %v1865_v25  ;;  %1989 = vmatpush.msrb.mxu3 %v1900_v49 }
 0xd9a   :  { %1947 = vmatpush.msra.mxu1 %v1864_v51  ;;  %1990 = vmatpush.msrb.mxu3 %v1899_v14 }
 0xd9c   :  { %1991 = vmatpush.msrb.mxu3 %v1898_v53 }
 0xd9e   :  { %1992 = vmatpush.msrb.mxu3 %v1897_v23 }
 0xda0   :  { %1993 = vmatpush.msrb.mxu3 %v1896_v59 }
 0xe01   :  { %v1717_v61 = vpop.f32.mrf.mxu1 }
 0xe02   :  { %v5252_v62 = vadd.f32 %v1717_v61, %v1692_v56  ;;  %v1786_v27 = vpop.f32.mrf.mxu0 }
 0xe03   :  { %v5254_v63 = vadd.f32 %v1786_v27, %v1695_v57 }
 0xe04   :  { %v1792_v26 = vmul.f32 %v5252_v62, %v5252_v62 }
 0xe05   :  { %v1795_v1 = vmul.f32 %v5254_v63, %v5254_v63 }
 0xe06   :  { %v1800_v30 = vmul.f32 %v1792_v26, %v5252_v62 }
 0xe07   :  { %v1803_v3 = vmul.f32 %v1795_v1, %v5254_v63  ;;  %v1740_v4 = vpop.f32.mrf.mxu2 }
 0xe08   :  { %v1808_v5 = vmul.f32 0.044715, %v1800_v30  ;;  %v5262_v6 = vadd.f32 %v1740_v4, %v1693_v0  ;;  %v1763_v7 = vpop.f32.mrf.mxu3 }
 0xe09   :  { %v1811_v36 = vmul.f32 0.044715, %v1803_v3  ;;  %v5264_v46 = vadd.f32 %v1763_v7, %v1694_v2  ;;  %v1720_v20 = vpop.f32.mrf.mxu1 }
 0xe0a   :  { %v1816_v10 = vadd.f32 %v1808_v5, %v5252_v62  ;;  %v1793_v11 = vmul.f32 %v5262_v6, %v5262_v6  ;;  %v5269_v12 = vadd.f32 %v1720_v20, %v1692_v56  ;;  %v1789_v13 = vpop.f32.mrf.mxu0 }
 0xe0b   :  { %v1819_v40 = vadd.f32 %v1811_v36, %v5254_v63  ;;  %v1794_v17 = vmul.f32 %v5264_v46, %v5264_v46  ;;  %v5274_v44 = vadd.f32 %v1789_v13, %v1695_v57 }
 0xe0c   :  { %v1824_v19 = vmul.f32 0.7978846, %v1816_v10  ;;  %v1801_v21 = vmul.f32 %v1793_v11, %v5262_v6  ;;  %v1796_v22 = vmul.f32 %v5269_v12, %v5269_v12 }
 0xe0d   :  { %v1827_v28 = vmul.f32 0.7978846, %v1819_v40  ;;  %v1802_v29 = vmul.f32 %v1794_v17, %v5264_v46  ;;  %v1799_v31 = vmul.f32 %v5274_v44, %v5274_v44 }
 0xe0e   :  { %3831 = vtanh.f32 %v1824_v19  ;;  %v1809_v18 = vmul.f32 0.044715, %v1801_v21  ;;  %v1804_v32 = vmul.f32 %v1796_v22, %v5269_v12 }
 0xe0f   :  { %3833 = vtanh.f32 %v1827_v28  ;;  %v1810_v33 = vmul.f32 0.044715, %v1802_v29  ;;  %v1807_v34 = vmul.f32 %v1799_v31, %v5274_v44  ;;  %v1743_v35 = vpop.f32.mrf.mxu2 }
 0xe10   :  { %v1817_v37 = vadd.f32 %v1809_v18, %v5262_v6  ;;  %v5285_v38 = vadd.f32 %v1743_v35, %v1693_v0  ;;  %v1766_v39 = vpop.f32.mrf.mxu3  ;;  %v1812_v41 = vmul.f32 0.044715, %v1804_v32 }
 0xe11   :  { %v1818_v42 = vadd.f32 %v1810_v33, %v5264_v46  ;;  %v1767_v43 = vadd.f32 %v1766_v39, %v1694_v2  ;;  %v1815_v45 = vmul.f32 0.044715, %v1807_v34  ;;  %v3779_v33 = vld [vmem:[#allocation20] ss:$0 sm:$0xff] }
 0xe12   :  { %v1825_v47 = vmul.f32 0.7978846, %v1817_v37  ;;  %v1797_v16 = vmul.f32 %v5285_v38, %v5285_v38  ;;  %v1820_v25 = vadd.f32 %v1812_v41, %v5269_v12 }
 0xe13   :  { %v1826_v48 = vmul.f32 0.7978846, %v1818_v42  ;;  %v1798_v49 = vmul.f32 %v1767_v43, %v1767_v43  ;;  %v1823_v50 = vadd.f32 %v1815_v45, %v5274_v44 }
 0xe14   :  { %v3832_v51 = vpop.eup %3831  ;;  %3835 = vtanh.f32 %v1825_v47  ;;  %v1805_v52 = vmul.f32 %v1797_v16, %v5285_v38  ;;  %v1828_v14 = vmul.f32 0.7978846, %v1820_v25 }
 0xe15   :  { %v3834_v60 = vpop.eup %3833  ;;  %3837 = vtanh.f32 %v1826_v48  ;;  %v1806_v15 = vmul.f32 %v1798_v49, %v1767_v43  ;;  %v1840_v58 = vadd.f32 1.0, %v3832_v51  ;;  %v1831_v53 = vmul.f32 0.7978846, %v1823_v50 }
 0xe16   :  { %v1843_v55 = vadd.f32 1.0, %v3834_v60  ;;  %3839 = vtanh.f32 %v1828_v14  ;;  %v1813_v23 = vmul.f32 0.044715, %v1805_v52  ;;  %v2125_v52 = vld [vmem:[#allocation25 + $0x168] sm:$0xff]  ;;  %v2126_v14 = vld [vmem:[#allocation25 + $0x170] sm:$0xff]  ;;  %v2127_v60 = vld [vmem:[#allocation25 + $0x178] sm:$0xff] }
 0xe17   :  { %v1848_v56 = vmul.f32 0.5, %v1840_v58  ;;  %3841 = vtanh.f32 %v1831_v53  ;;  %v1814_v24 = vmul.f32 0.044715, %v1806_v15  ;;  %2136 = vmatpush.msrb.mxu1 %v2125_v52  ;;  %2159 = vmatpush.msrb.mxu2 %v2126_v14  ;;  %v2123_v15 = vld [vmem:[#allocation25 + $0x158] sm:$0xff]  ;;  %v2124_v58 = vld [vmem:[#allocation25 + $0x160] sm:$0xff] }
 0xe18   :  { %v1851_v57 = vmul.f32 0.5, %v1843_v55  ;;  %v1821_v59 = vadd.f32 %v1813_v23, %v5285_v38  ;;  %2182 = vmatpush.msra.mxu3 %v2127_v60 }
 0xe19   :  { %v1856_v61 = vmul.f32 %v1848_v56, %v5252_v62  ;;  %v1822_v27 = vadd.f32 %v1814_v24, %v1767_v43  ;;  %2160 = vmatpush.msrb.mxu2 %v2123_v15 }
 0xe1a   :  { %v3836_v26 = vpop.eup %3835  ;;  %v1859_v0 = vmul.f32 %v1851_v57, %v5254_v63  ;;  %v1829_v1 = vmul.f32 0.7978846, %v1821_v59  ;;  %2183 = vmatpush.msra.mxu3 %v2124_v58 }
 0xe1b   :  { %v3838_v2 = vpop.eup %3837  ;;  %1948 = vmatmul.f32.vlgmr.msra.gmra.mxu1 %v1856_v61  ;;  %v1841_v30 = vadd.f32 1.0, %v3836_v26  ;;  %v1830_v3 = vmul.f32 0.7978846, %v1822_v27  ;;  %v2119_v27 = vld [vmem:[#allocation25 + $0x138] sm:$0xff]  ;;  %v2120_v26 = vld [vmem:[#allocation25 + $0x140] sm:$0xff] }
 0xe1c   :  { %v3840_v4 = vpop.eup %3839  ;;  %2017 = vmatmul.f32.vlgmr.msra.gmra.mxu0 %v1859_v0  ;;  %v1842_v5 = vadd.f32 1.0, %v3838_v2  ;;  %3843 = vtanh.f32 %v1829_v1  ;;  %v2121_v0 = vld [vmem:[#allocation25 + $0x148] sm:$0xff]  ;;  %2161 = vmatpush.msrb.mxu2 %v2120_v26  ;;  %v2116_v1 = vld [vmem:[#allocation25 + $0x120] sm:$0xff] }
 0xe1d   :  { %v3842_v7 = vpop.eup %3841  ;;  %v1849_v36 = vmul.f32 0.5, %v1841_v30  ;;  %v1844_v20 = vadd.f32 1.0, %v3840_v4  ;;  %3845 = vtanh.f32 %v1830_v3  ;;  %2184 = vmatpush.msra.mxu3 %v2121_v0  ;;  %v2117_v2 = vld [vmem:[#allocation25 + $0x128] sm:$0xff]  ;;  %v2118_v30 = vld [vmem:[#allocation25 + $0x130] sm:$0xff] }
 0xe1e   :  { %v1850_v10 = vmul.f32 0.5, %v1842_v5  ;;  %v1847_v11 = vadd.f32 1.0, %v3842_v7  ;;  %2162 = vmatpush.msrb.mxu2 %v2117_v2  ;;  %v2113_v3 = vld [vmem:[#allocation25 + $0x108] sm:$0xff]  ;;  %v2114_v4 = vld [vmem:[#allocation25 + $0x110] sm:$0xff]  ;;  %v2115_v5 = vld [vmem:[#allocation25 + $0x118] sm:$0xff] }
 0xe1f   :  { %v1857_v62 = vmul.f32 %v1849_v36, %v5262_v6  ;;  %v1852_v13 = vmul.f32 0.5, %v1844_v20  ;;  %2185 = vmatpush.msra.mxu3 %v2118_v30  ;;  %v2110_v7 = vld [vmem:[#allocation25 + $0xf0] sm:$0xff]  ;;  %v2111_v36 = vld [vmem:[#allocation25 + $0xf8] sm:$0xff]  ;;  %v2112_v20 = vld [vmem:[#allocation25 + $0x100] sm:$0xff] }
 0xe20   :  { %v1858_v63 = vmul.f32 %v1850_v10, %v5264_v46  ;;  %v1855_v40 = vmul.f32 0.5, %v1847_v11  ;;  %2163 = vmatpush.msrb.mxu2 %v2114_v4  ;;  %v2107_v10 = vld [vmem:[#allocation25 + $0xd8] sm:$0xff]  ;;  %v2108_v11 = vld [vmem:[#allocation25 + $0xe0] sm:$0xff] }
 0xe21   :  { %1971 = vmatmul.f32.vlgmr.msra.gmra.mxu2 %v1857_v62  ;;  %v1860_v17 = vmul.f32 %v1852_v13, %v5269_v12  ;;  %2186 = vmatpush.msra.mxu3 %v2115_v5  ;;  %v2109_v62 = vld [vmem:[#allocation25 + $0xe8] sm:$0xff]  ;;  %v2104_v13 = vld [vmem:[#allocation25 + $0xc0] sm:$0xff] }
 0xe22   :  { %v3844_v19 = vpop.eup %3843  ;;  %1994 = vmatmul.f32.vlgmr.msrb.gmra.mxu3 %v1858_v63  ;;  %v1863_v21 = vmul.f32 %v1855_v40, %v5274_v44  ;;  %2164 = vmatpush.msrb.mxu2 %v2111_v36  ;;  %v2105_v63 = vld [vmem:[#allocation25 + $0xc8] sm:$0xff]  ;;  %v2106_v40 = vld [vmem:[#allocation25 + $0xd0] sm:$0xff] }
 0xe23   :  { %v3846_v22 = vpop.eup %3845  ;;  %1951 = vmatmul.f32.gmra.mxu1 %v1860_v17  ;;  %v1845_v28 = vadd.f32 1.0, %v3844_v19  ;;  %2187 = vmatpush.msra.mxu3 %v2112_v20  ;;  %v2101_v17 = vld [vmem:[#allocation25 + $0xa8] sm:$0xff]  ;;  %v2102_v19 = vld [vmem:[#allocation25 + $0xb0] sm:$0xff] }
 0xe24   :  { %2020 = vmatmul.f32.gmra.mxu0 %v1863_v21  ;;  %v1846_v29 = vadd.f32 1.0, %v3846_v22  ;;  %2165 = vmatpush.msrb.mxu2 %v2108_v11  ;;  %v2103_v21 = vld [vmem:[#allocation25 + $0xb8] sm:$0xff]  ;;  %v2098_v22 = vld [vmem:[#allocation25 + $0x90] sm:$0xff] }
 0xe25   :  { %v1853_v31 = vmul.f32 0.5, %v1845_v28  ;;  %2188 = vmatpush.msra.mxu3 %v2109_v62  ;;  %v2099_v28 = vld [vmem:[#allocation25 + $0x98] sm:$0xff] }
 0xe26   :  { %v1854_v18 = vmul.f32 0.5, %v1846_v29  ;;  %2166 = vmatpush.msrb.mxu2 %v2105_v63  ;;  %v2100_v29 = vld [vmem:[#allocation25 + $0xa0] sm:$0xff] }
 0xe27   :  { %v1861_v6 = vmul.f32 %v1853_v31, %v5285_v38  ;;  %2189 = vmatpush.msra.mxu3 %v2106_v40  ;;  %v2095_v31 = vld [vmem:[#allocation25 + $0x78] sm:$0xff] }
 0xe28   :  { %v1862_v32 = vmul.f32 %v1854_v18, %v1767_v43  ;;  %2167 = vmatpush.msrb.mxu2 %v2102_v19  ;;  %v2096_v18 = vld [vmem:[#allocation25 + $0x80] sm:$0xff] }
 0xe29   :  { %1974 = vmatmul.f32.gmra.mxu2 %v1861_v6  ;;  %2190 = vmatpush.msra.mxu3 %v2103_v21  ;;  %v2097_v6 = vld [vmem:[#allocation25 + $0x88] sm:$0xff] }
 0xe2a   :  { %1997 = vmatmul.f32.gmra.mxu3 %v1862_v32  ;;  %2168 = vmatpush.msrb.mxu2 %v2099_v28  ;;  %v2092_v32 = vld [vmem:[#allocation25 + $0x60] sm:$0xff] }
 0xe2b   :  { %2191 = vmatpush.msra.mxu3 %v2100_v29 }
 0xe2c   :  { %2169 = vmatpush.msrb.mxu2 %v2096_v18 }
 0xe2d   :  { %2192 = vmatpush.msra.mxu3 %v2097_v6 }
 0xe98   :  { %v1949_v46 = vpop.f32.mrf.mxu1 }
 0xe99   :  { %v1950_v34 = vadd.f32 %v3779_v33, %v1949_v46  ;;  %v2018_v39 = vpop.f32.mrf.mxu0  ;;  %v2093_v46 = vld [vmem:[#allocation25 + $0x68] sm:$0xff] }
 0xe9a   :  { %2170 = vmatpush.msrb.mxu2 %v2093_v46 }
 0xea0   :  { %v1952_v41 = vpop.f32.mrf.mxu1 }
 0xea1   :  { %v1953_v45 = vadd.f32 %v3779_v33, %v1952_v41  ;;  %v2021_v48 = vpop.f32.mrf.mxu0  ;;  %v2094_v33 = vld [vmem:[#allocation25 + $0x70] sm:$0xff]  ;;  %v2083_v41 = vld [vmem:[#allocation25 + $0x18] sm:$0xff] }
 0xea2   :  { %2193 = vmatpush.msra.mxu3 %v2094_v33  ;;  %v5362_v33 = vld [vmem:[#allocation28 + $0x18] sm:$0xff] }
 0xea4   :  { %v1972_v12 = vpop.f32.mrf.mxu2 }
 0xea5   :  { %v1973_v35 = vadd.f32 %v1972_v12, %v1950_v34  ;;  %v1995_v37 = vpop.f32.mrf.mxu3  ;;  %v2089_v34 = vld [vmem:[#allocation25 + $0x48] sm:$0xff]  ;;  %v2090_v12 = vld [vmem:[#allocation25 + $0x50] sm:$0xff] }
 0xea6   :  { %2171 = vmatpush.msrb.mxu2 %v2090_v12  ;;  %v5367_v12 = vld [vmem:[#allocation28 + $0x8] sm:$0xff] }
 0xea7   :  { %v1996_v44 = vadd.f32 %v1995_v37, %v1973_v35  ;;  %v2091_v35 = vld [vmem:[#allocation25 + $0x58] sm:$0xff]  ;;  %v2086_v37 = vld [vmem:[#allocation25 + $0x30] sm:$0xff] }
 0xea8   :  { %2194 = vmatpush.msra.mxu3 %v2091_v35 }
 0xea9   :  { %v2019_v42 = vadd.f32 %v2018_v39, %v1996_v44  ;;  %v2087_v39 = vld [vmem:[#allocation25 + $0x38] sm:$0xff]  ;;  %v2088_v44 = vld [vmem:[#allocation25 + $0x40] sm:$0xff] }
 0xeaa   :  { %2172 = vmatpush.msrb.mxu2 %v2087_v39  ;;  %2195 = vmatpush.msra.mxu3 %v2088_v44 }
 0xeab   :  { %v5302_v47 = vadd.f32 %v2019_v42, %v5229_v9  ;;  %v2122_v9 = vld [vmem:[#allocation25 + $0x150] sm:$0xff]  ;;  %v2084_v42 = vld [vmem:[#allocation25 + $0x20] sm:$0xff] }
 0xeac   :  { %v1975_v16 = vpop.f32.mrf.mxu2  ;;  %2137 = vmatpush.msrb.mxu1 %v2122_v9  ;;  %2173 = vmatpush.msrb.mxu2 %v2084_v42  ;;  %v5376_v42 = vld [vmem:[#allocation28] sm:$0xff] }
 0xead   :  { %v1976_v25 = vadd.f32 %v1975_v16, %v1953_v45  ;;  %2028 = vadd.xlane.f32.xlu1 %v5302_v47  ;;  %v1998_v38 = vpop.f32.mrf.mxu3  ;;  %v2085_v45 = vld [vmem:[#allocation25 + $0x28] sm:$0xff]  ;;  %v2080_v16 = vld [vmem:[#allocation25] sm:$0xff] }
 0xeae   :  { %2138 = vmatpush.msrb.mxu1 %v2119_v27  ;;  %2196 = vmatpush.msra.mxu3 %v2085_v45  ;;  %v3781_v27 = vld [vmem:[#allocation23] ss:$0 sm:$0xff] }
 0xeaf   :  { %v1999_v43 = vadd.f32 %v1998_v38, %v1976_v25  ;;  %v2081_v25 = vld [vmem:[#allocation25 + $0x8] sm:$0xff]  ;;  %v2082_v38 = vld [vmem:[#allocation25 + $0x10] sm:$0xff] }
 0xeb0   :  { %2139 = vmatpush.msrb.mxu1 %v2116_v1  ;;  %2174 = vmatpush.msrb.mxu2 %v2081_v25 }
 0xeb1   :  { %v2022_v49 = vadd.f32 %v2021_v48, %v1999_v43  ;;  %2197 = vmatpush.msra.mxu3 %v2082_v38 }
 0xeb2   :  { %2140 = vmatpush.msrb.mxu1 %v2113_v3  ;;  %2393 = vmatpush.msra.mxu2 %v5362_v33 }
 0xeb3   :  { %v5306_v50 = vadd.f32 %v2022_v49, %v5226_v8 }
 0xeb4   :  { %2141 = vmatpush.msrb.mxu1 %v2110_v7 }
 0xeb5   :  { %v2030_v51 = vsel %vm615_vm1, %v5306_v50, 0.0 }
 0xeb6   :  { %2031 = vadd.xlane.f32.xlu0 %v2030_v51  ;;  %2142 = vmatpush.msrb.mxu1 %v2107_v10 }
 0xeb8   :  { %2143 = vmatpush.msrb.mxu1 %v2104_v13 }
 0xeba   :  { %2144 = vmatpush.msrb.mxu1 %v2101_v17 }
 0xebc   :  { %2145 = vmatpush.msrb.mxu1 %v2098_v22 }
 0xebe   :  { %2146 = vmatpush.msrb.mxu1 %v2095_v31 }
 0xec0   :  { %2147 = vmatpush.msrb.mxu1 %v2092_v32 }
 0xec2   :  { %2148 = vmatpush.msrb.mxu1 %v2089_v34  ;;  %v5364_v34 = vld [vmem:[#allocation28 + $0x10] sm:$0xff] }
 0xec3   :  { %2394 = vmatpush.msra.mxu2 %v5364_v34 }
 0xec4   :  { %2149 = vmatpush.msrb.mxu1 %v2086_v37 }
 0xec5   :  { %2395 = vmatpush.msra.mxu2 %v5367_v12 }
 0xec6   :  { %2150 = vmatpush.msrb.mxu1 %v2083_v41 }
 0xec7   :  { %2396 = vmatpush.msra.mxu2 %v5376_v42 }
 0xec8   :  { %2151 = vmatpush.msrb.mxu1 %v2080_v16 }
 0xf20   :  { %v2029_v53 = vpop.xlane.xlu1 %2028 }
 0xf21   :  { %v2033_v8 = vmul.f32 %v2029_v53, %v4989_v54 }
 0xf23   :  { %v5312_v55 = vsub.f32 %v5302_v47, %v2033_v8 }
 0xf25   :  { %v2037_v23 = vmul.f32 %v5312_v55, %v5312_v55 }
 0xf27   :  { %2039 = vadd.xlane.f32.xlu2 %v2037_v23 }
 0xf29   :  { %v2032_v56 = vpop.xlane.xlu0 %2031 }
 0xf2a   :  { %v2034_v24 = vmul.f32 %v2032_v56, %v4989_v54  ;;  %v3780_v56 = vld [vmem:[#allocation22] ss:$0 sm:$0xff] }
 0xf2c   :  { %v5318_v57 = vsub.f32 %v5306_v50, %v2034_v24 }
 0xf2e   :  { %v2038_v59 = vmul.f32 %v5318_v57, %v5318_v57 }
 0xf30   :  { %v2041_v61 = vsel %vm615_vm1, %v2038_v59, 0.0 }
 0xf31   :  { %2042 = vadd.xlane.f32.xlu2 %v2041_v61 }
 0xf9a   :  { %v2040_v43 = vpop.xlane.xlu2 %2039 }
 0xf9b   :  { %v2044_v48 = vmul.f32 %v2040_v43, %v4989_v54 }
 0xf9d   :  { %v2046_v49 = vadd.f32 1e-05, %v2044_v48 }
 0xf9f   :  { %3847 = vrsqrt.f32 %v2046_v49  ;;  %vm2054_vm10 = vweird.f32 %v2046_v49 }
 0xfa4   :  { %v2043_v51 = vpop.xlane.xlu2 %2042 }
 0xfa5   :  { %v3848_v52 = vpop.eup %3847  ;;  %v2045_v14 = vmul.f32 %v2043_v51, %v4989_v54 }
 0xfa6   :  { %v2049_v60 = vmul.f32 %v3848_v52, %v2046_v49  ;;  %vm2055_vm9 = vweird.f32 %v3848_v52 }
 0xfa7   :  { %v2047_v9 = vadd.f32 1e-05, %v2045_v14  ;;  %vm2056_vm11 = vmor %vm2054_vm10, %vm2055_vm9 }
 0xfa8   :  { %v2050_v15 = vmul.f32 %v3848_v52, %v2049_v60 }
 0xfa9   :  { %3849 = vrsqrt.f32 %v2047_v9  ;;  %vm2064_vm4 = vweird.f32 %v2047_v9 }
 0xfaa   :  { %v2051_v58 = vmul.f32 0.5, %v2050_v15 }
 0xfac   :  { %v2052_v53 = vsub.f32 1.5, %v2051_v58 }
 0xfae   :  { %v2053_v8 = vmul.f32 %v3848_v52, %v2052_v53 }
 0xfaf   :  { %v3850_v23 = vpop.eup %3849 }
 0xfb0   :  { %v2057_v24 = vsel %vm2056_vm11, %v3848_v52, %v2053_v8  ;;  %v2059_v59 = vmul.f32 %v3850_v23, %v2047_v9  ;;  %vm2065_vm0 = vweird.f32 %v3850_v23 }
 0xfb1   :  { %v2068_v61 = vmul.f32 %v2057_v24, %v5312_v55  ;;  %vm2066_vm5 = vmor %vm2064_vm4, %vm2065_vm0  ;;  %v5327_v55 = vld [vmem:[#allocation26] sm:$0x7] }
 0xfb2   :  { %v2060_v26 = vmul.f32 %v3850_v23, %v2059_v59  ;;  %v2130_v20 = vperm.slane %v5327_v55, 0  ;;  %v2131_v62 = vperm.slane %v5327_v55, 1  ;;  %v2212_v59 = vld [vmem:[#allocation28 + $0x38] sm:$0xff] }
 0xfb3   :  { %v2073_v0 = vmul.f32 %v3780_v56, %v2068_v61  ;;  %v2211_v61 = vld [vmem:[#allocation28 + $0x30] sm:$0xff]  ;;  %2370 = vmatpush.msra.mxu1 %v2212_v59 }
 0xfb4   :  { %v2061_v1 = vmul.f32 0.5, %v2060_v26  ;;  %v2209_v26 = vld [vmem:[#allocation28 + $0x20] sm:$0xff] }
 0xfb5   :  { %v2078_v2 = vadd.f32 %v3781_v27, %v2073_v0  ;;  %2371 = vmatpush.msra.mxu1 %v2211_v61  ;;  %v2216_v0 = vld [vmem:[#allocation28 + $0x58] sm:$0xff] }
 0xfb6   :  { %v2062_v30 = vsub.f32 1.5, %v2061_v1  ;;  %v2215_v1 = vld [vmem:[#allocation28 + $0x50] sm:$0xff] }
 0xfb7   :  { %2152 = vmatmul.f32.vlgmr.msrb.gmra.mxu1 %v2078_v2  ;;  %2175 = vmatmul.f32.vlgmr.msrb.gmra.mxu2 %v2078_v2 }
 0xfb8   :  { %v2063_v3 = vmul.f32 %v3850_v23, %v2062_v30  ;;  %2198 = vmatmul.f32.vlgmr.msra.gmra.mxu3 %v2078_v2  ;;  %v2214_v30 = vld [vmem:[#allocation28 + $0x48] sm:$0xff] }
 0xfba   :  { %v2067_v4 = vsel %vm2066_vm5, %v3850_v23, %v2063_v3 }
 0xfbb   :  { %v2069_v5 = vmul.f32 %v2067_v4, %v5318_v57  ;;  %v2132_v57 = vperm.slane %v5327_v55, 2 }
 0xfbd   :  { %v2074_v7 = vmul.f32 %v3780_v56, %v2069_v5 }
 0xfbf   :  { %v2079_v36 = vadd.f32 %v3781_v27, %v2074_v7  ;;  %v2210_v27 = vld [vmem:[#allocation28 + $0x28] sm:$0xff] }
 0xfc0   :  { %2372 = vmatpush.msra.mxu1 %v2210_v27 }
 0xfc1   :  { %2155 = vmatmul.f32.gmra.mxu1 %v2079_v36  ;;  %2178 = vmatmul.f32.gmra.mxu2 %v2079_v36 }
 0xfc2   :  { %2201 = vmatmul.f32.gmra.mxu3 %v2079_v36  ;;  %2373 = vmatpush.msra.mxu1 %v2209_v26 }
 0xfc4   :  { %2485 = vmatpush.msrb.mxu1 %v2216_v0 }
 0xfc6   :  { %2486 = vmatpush.msrb.mxu1 %v2215_v1 }
 0xfc8   :  { %2487 = vmatpush.msrb.mxu1 %v2214_v30 }
0x1034   :  { %v2153_v10 = vpop.f32.mrf.mxu1 }
0x1035   :  { %v5332_v11 = vadd.f32 %v2153_v10, %v2130_v20 }
0x1037   :  { %2286 = vrot.lane.b32.xlu0 %v5332_v11, %s4653_s5 }
0x103a   :  { %v2176_v13 = vpop.f32.mrf.mxu2 }
0x103b   :  { %v5340_v63 = vadd.f32 %v2176_v13, %v2131_v62  ;;  %v2199_v40 = vpop.f32.mrf.mxu3 }
0x103c   :  { %v5344_v17 = vadd.f32 %v2199_v40, %v2132_v57 }
0x103d   :  { %3654 = vmatpush.xpose.msk.msrb.mxu0 %vm814_vm12, %v5340_v63  ;;  %2403 = vrot.lane.b32.xlu2 %v5340_v63, %s4654_s18 }
0x1040   :  { %3655 = vmatmul.msk.f32.vlgmr.msrb.gmra.mxu0 %vm814_vm12, %v5332_v11 }
0x1041   :  { %3656 = vmatpush.msk.msra.mxu0 %vm607_vm3, %v5344_v17 }
0x1045   :  { %v2202_v16 = vpop.f32.mrf.mxu3 }
0x1046   :  { %v2203_v7 = vadd.f32 %v2202_v16, %v2132_v57 }
0x1048   :  { %v2635_v10 = vrot.slane %v2203_v7, 5 }
0x1097   :  { %v2404_v19 = vpop.permute.xlu2 %2403 }
0x1098   :  { %3665 = vmatpush.xpose.msk.msrb.mxu3 %vm814_vm12, %v2404_v19  ;;  %v2634_v19 = vrot.slane %v5344_v17, 5 }
0x10a9   :  { %v2287_v35 = vpop.permute.xlu0 %2286 }
0x10bd   :  { %v2244_v21 = vpop.f32.mrf.mxu0 }
0x10be   :  { %v2247_v22 = vmul.f32 0.17677669, %v2244_v21 }
0x10c0   :  { %v2248_v28 = vsel %vm842_vm14, %v2247_v22, -inf }
0x10c1   :  { %2249 = vmax.xlane.f32.xlu1 %v2248_v28  ;;  %v2213_v28 = vld [vmem:[#allocation28 + $0x40] sm:$0xff] }
0x10c2   :  { %2488 = vmatpush.msrb.mxu1 %v2213_v28 }
0x10da   :  { %2288 = vrot.lane.b32.xlu1 %v5340_v63, %s4653_s5 }
0x1134   :  { %v2250_v29 = vpop.xlane.xlu1 %2249 }
0x1135   :  { %v2251_v31 = vsub.f32 %v2247_v22, %v2250_v29  ;;  %v5404_v22 = vsel %vm1184_vm13, %v2634_v19, %v2635_v10  ;;  %v2179_v29 = vpop.f32.mrf.mxu2 }
0x1137   :  { %v2252_v18 = vmul.f32 1.442695, %v2251_v31  ;;  %v2180_v31 = vadd.f32 %v2179_v29, %v2131_v62 }
0x1139   :  { %3851 = vpow2.f32 %v2252_v18  ;;  %v2593_v18 = vrot.slane %v2180_v31, 5 }
0x113f   :  { %v3852_v6 = vpop.eup %3851 }
0x1140   :  { %v2254_v32 = vsel %vm842_vm14, %v3852_v6, 0.0 }
0x1141   :  { %2255 = vadd.xlane.f32.xlu0 %v2254_v32 }
0x114c   :  { %v2289_v46 = vpop.permute.xlu1 %2288 }
0x114d   :  { %3658 = vmatpush.xpose.msk.msrb.mxu0 %vm814_vm12, %v2289_v46 }
0x1155   :  { %2401 = vrot.lane.b32.xlu0 %v5332_v11, %s4654_s18 }
0x11b4   :  { %v2256_v37 = vpop.xlane.xlu0 %2255 }
0x11b5   :  { %3853 = vrcp.f32 %v2256_v37 }
0x11bb   :  { %v3854_v39 = vpop.eup %3853 }
0x11bc   :  { %v2258_v44 = vmul.f32 %v3854_v39, %v3852_v6  ;;  %v2592_v6 = vrot.slane %v5340_v63, 5 }
0x11be   :  { %2259 = vst.msk [vmem:[%s4840_s19] sm:$0x1f] %vm842_vm14, %v2258_v44  ;;  %3657 = vmatmul.msk.f32.vlgmr.msra.gmra.mxu0 %vm855_vm15, %v2258_v44  ;;  %v2594_v46 = vsel %vm1184_vm13, %v2592_v6, %v2593_v18 }
0x11c6   :  { %3659 = vmatmul.msk.f32.vlgmr.msrb.gmra.mxu0 %vm814_vm12, %v2287_v35 }
0x11c7   :  { %v2402_v41 = vpop.permute.xlu0 %2401 }
0x11c8   :  { %3666 = vmatmul.msk.f32.vlgmr.msrb.gmra.mxu3 %vm814_vm12, %v2402_v41 }
0x123b   :  { %v2283_v45 = vpop.f32.mrf.mxu0 }
0x123c   :  { %3664 = vmatmul.msk.f32.vlgmr.msra.gmra.mxu2 %vm814_vm12, %v2283_v45 }
0x1243   :  { %v2311_v25 = vpop.f32.mrf.mxu0 }
0x1244   :  { %v2314_v38 = vmul.f32 0.17677669, %v2311_v25 }
0x1246   :  { %v2315_v43 = vsel %vm842_vm14, %v2314_v38, -inf }
0x1247   :  { %2316 = vmax.xlane.f32.xlu2 %v2315_v43 }
0x124b   :  { %v2426_v48 = vpop.f32.mrf.mxu3 }
0x124c   :  { %v2429_v49 = vmul.f32 0.17677669, %v2426_v48 }
0x124e   :  { %v2430_v51 = vsel %vm842_vm14, %v2429_v49, -inf }
0x124f   :  { %2431 = vmax.xlane.f32.xlu1 %v2430_v51 }
0x1268   :  { %2328 = vrot.lane.b32.xlu1 %v5344_v17, %s4653_s5 }
0x1270   :  { %2494 = vrot.lane.b32.xlu1 %v5332_v11, %s4628_s0 }
0x12ba   :  { %v2317_v52 = vpop.xlane.xlu2 %2316 }
0x12bb   :  { %v2318_v14 = vsub.f32 %v2314_v38, %v2317_v52 }
0x12bd   :  { %v2319_v60 = vmul.f32 1.442695, %v2318_v14 }
0x12bf   :  { %3855 = vpow2.f32 %v2319_v60  ;;  %v2398_v35 = vpop.f32.mrf.mxu2 }
0x12c2   :  { %v2432_v9 = vpop.xlane.xlu1 %2431 }
0x12c3   :  { %v2433_v15 = vsub.f32 %v2429_v49, %v2432_v9 }
0x12c5   :  { %v3856_v58 = vpop.eup %3855  ;;  %v2434_v53 = vmul.f32 1.442695, %v2433_v15 }
0x12c6   :  { %v2321_v8 = vsel %vm842_vm14, %v3856_v58, 0.0 }
0x12c7   :  { %3857 = vpow2.f32 %v2434_v53  ;;  %2322 = vadd.xlane.f32.xlu0 %v2321_v8 }
0x12cd   :  { %v3858_v23 = vpop.eup %3857 }
0x12ce   :  { %v2436_v56 = vsel %vm842_vm14, %v3858_v23, 0.0 }
0x12cf   :  { %2437 = vadd.xlane.f32.xlu2 %v2436_v56  ;;  %v5444_v56 = vld [vmem:[#allocation28 + $0x70] sm:$0xff] }
0x12da   :  { %v2329_v24 = vpop.permute.xlu1 %2328 }
0x12db   :  { %2496 = vrot.lane.b32.xlu0 %v5340_v63, %s4628_s0  ;;  %3661 = vmatpush.msk.msra.mxu0 %vm607_vm3, %v2329_v24  ;;  %v2588_v63 = vrot.slane %v5332_v11, 5  ;;  %v5447_v24 = vld [vmem:[#allocation28 + $0x68] sm:$0xff] }
0x12e2   :  { %v2495_v57 = vpop.permute.xlu1 %2494 }
0x12e7   :  { %2443 = vrot.lane.b32.xlu2 %v5344_v17, %s4654_s18 }
0x133a   :  { %v2323_v2 = vpop.xlane.xlu0 %2322 }
0x133b   :  { %3859 = vrcp.f32 %v2323_v2 }
0x1341   :  { %v3860_v3 = vpop.eup %3859 }
0x1342   :  { %v2325_v4 = vmul.f32 %v3860_v3, %v3856_v58  ;;  %v2438_v5 = vpop.xlane.xlu2 %2437  ;;  %v5461_v3 = vld [vmem:[#allocation28 + $0x60] sm:$0xff] }
0x1343   :  { %3861 = vrcp.f32 %v2438_v5 }
0x1344   :  { %3660 = vst.msk [vmem:[%s4840_s19 + $0x8] sm:$0x1f] %vm842_vm14, %v2325_v4  ;;  %3662 = vmatmul.msk.f32.vlgmr.msra.gmra.mxu0 %vm855_vm15, %v2325_v4 }
0x1349   :  { %v3862_v36 = vpop.eup %3861 }
0x134a   :  { %v2440_v13 = vmul.f32 %v3862_v36, %v3858_v23  ;;  %v2444_v40 = vpop.permute.xlu2 %2443  ;;  %v5442_v23 = vld [vmem:[#allocation28 + $0x78] sm:$0xff] }
0x134b   :  { %3668 = vmatpush.msk.msrb.mxu0 %vm607_vm3, %v2444_v40 }
0x134c   :  { %3667 = vst.msk [vmem:[%s4840_s19 + $0x10] sm:$0x1f] %vm842_vm14, %v2440_v13  ;;  %3669 = vmatmul.msk.f32.vlgmr.msrb.gmra.mxu0 %vm855_vm15, %v2440_v13 }
0x134d   :  { %v2497_v21 = vpop.permute.xlu0 %2496  ;;  %2578 = vmatpush.msra.mxu0 %v5442_v23 }
0x134e   :  { %3671 = vmatpush.xpose.msk.msrb.mxu2 %vm814_vm12, %v2497_v21 }
0x134f   :  { %2579 = vmatpush.msra.mxu0 %v5444_v56 }
0x1351   :  { %3672 = vmatmul.msk.f32.vlgmr.msrb.gmra.mxu2 %vm814_vm12, %v2495_v57  ;;  %2580 = vmatpush.msra.mxu0 %v5447_v24 }
0x1352   :  { %3680 = vmatpush.msk.msra.mxu2 %vm607_vm3, %v5404_v22 }
0x1353   :  { %2581 = vmatpush.msra.mxu0 %v5461_v3 }
0x1354   :  { %2769 = vmatpush.msrb.mxu2 %v5362_v33  ;;  %v2156_v33 = vpop.f32.mrf.mxu1 }
0x1356   :  { %2770 = vmatpush.msrb.mxu2 %v5364_v34  ;;  %v2157_v34 = vadd.f32 %v2156_v33, %v2130_v20 }
0x1358   :  { %2771 = vmatpush.msrb.mxu2 %v5367_v12  ;;  %v2589_v62 = vrot.slane %v2157_v34, 5 }
0x135a   :  { %2772 = vmatpush.msrb.mxu2 %v5376_v42  ;;  %v2590_v37 = vsel %vm1184_vm13, %v2588_v63, %v2589_v62 }
0x13c1   :  { %v2352_v32 = vpop.f32.mrf.mxu0 }
0x13c2   :  { %3663 = vmatmul.msk.f32.vlgmr.msra.gmra.mxu1 %vm814_vm12, %v2352_v32 }
0x13c3   :  { %3677 = vmatpush.xpose.msk.msra.mxu1 %vm814_vm12, %v2594_v46 }
0x13c9   :  { %v2467_v12 = vpop.f32.mrf.mxu0 }
0x13ca   :  { %3670 = vmatmul.msk.f32.vlgmr.msrb.gmra.mxu1 %vm814_vm12, %v2467_v12 }
0x13cb   :  { %2746 = vmatpush.msrb.mxu1 %v2212_v59 }
0x13cd   :  { %2747 = vmatpush.msrb.mxu1 %v2211_v61 }
0x13cf   :  { %2748 = vmatpush.msrb.mxu1 %v2210_v27 }
0x13d1   :  { %2749 = vmatpush.msrb.mxu1 %v2209_v26 }
0x13d2   :  { %3678 = vmatmul.msk.f32.vlgmr.msra.gmra.mxu1 %vm814_vm12, %v2590_v37 }
0x13d3   :  { %2861 = vmatpush.msra.mxu1 %v2216_v0 }
0x13d4   :  { %v2519_v39 = vpop.f32.mrf.mxu2 }
0x13d5   :  { %v2522_v44 = vmul.f32 0.17677669, %v2519_v39  ;;  %2862 = vmatpush.msra.mxu1 %v2215_v1 }
0x13d7   :  { %v2523_v55 = vsel %vm842_vm14, %v2522_v44, -inf  ;;  %2863 = vmatpush.msra.mxu1 %v2214_v30 }
0x13d8   :  { %2524 = vmax.xlane.f32.xlu1 %v2523_v55 }
0x13d9   :  { %2864 = vmatpush.msra.mxu1 %v2213_v28 }
0x13f1   :  { %2664 = vrot.lane.b32.xlu1 %v2594_v46, %s4653_s5 }
0x13f9   :  { %2779 = vrot.lane.b32.xlu1 %v2594_v46, %s4654_s18 }
0x143f   :  { %v2375_v20 = vpop.f32.mrf.mxu1 }
0x1440   :  { %v2399_v11 = vadd.f32 %v2398_v35, %v2375_v20 }
0x1447   :  { %v2490_v41 = vpop.f32.mrf.mxu1 }
0x1448   :  { %v5429_v42 = vadd.f32 %v2490_v41, %v2399_v11 }
0x144b   :  { %v2525_v45 = vpop.xlane.xlu1 %2524 }
0x144c   :  { %v2526_v16 = vsub.f32 %v2522_v44, %v2525_v45 }
0x144e   :  { %v2527_v25 = vmul.f32 1.442695, %v2526_v16 }
0x144f   :  { %v2616_v38 = vpop.f32.mrf.mxu1 }
0x1450   :  { %v2619_v43 = vmul.f32 0.17677669, %v2616_v38  ;;  %3863 = vpow2.f32 %v2527_v25 }
0x1452   :  { %v2620_v48 = vsel %vm842_vm14, %v2619_v43, -inf }
0x1453   :  { %2621 = vmax.xlane.f32.xlu0 %v2620_v48 }
0x1456   :  { %v3864_v49 = vpop.eup %3863 }
0x1457   :  { %v2529_v51 = vsel %vm842_vm14, %v3864_v49, 0.0 }
0x145b   :  { %2530 = vadd.xlane.f32.xlu0 %v2529_v51 }
0x1463   :  { %v2665_v61 = vpop.permute.xlu1 %2664 }
0x146b   :  { %v2780_v0 = vpop.permute.xlu1 %2779 }
0x146f   :  { %2662 = vrot.lane.b32.xlu0 %v2590_v37, %s4653_s5 }
0x1477   :  { %2870 = vrot.lane.b32.xlu0 %v2590_v37, %s4628_s0 }
0x14c6   :  { %v2622_v52 = vpop.xlane.xlu0 %2621 }
0x14c7   :  { %v2623_v14 = vsub.f32 %v2619_v43, %v2622_v52 }
0x14c9   :  { %v2624_v60 = vmul.f32 1.442695, %v2623_v14 }
0x14cb   :  { %3865 = vpow2.f32 %v2624_v60 }
0x14ce   :  { %v2531_v9 = vpop.xlane.xlu0 %2530 }
0x14cf   :  { %3867 = vrcp.f32 %v2531_v9 }
0x14d1   :  { %v3866_v15 = vpop.eup %3865 }
0x14d2   :  { %v2626_v58 = vsel %vm842_vm14, %v3866_v15, 0.0 }
0x14d3   :  { %2627 = vadd.xlane.f32.xlu2 %v2626_v58 }
0x14d5   :  { %v3868_v53 = vpop.eup %3867 }
0x14d6   :  { %v2533_v8 = vmul.f32 %v3868_v53, %v3864_v49 }
0x14d8   :  { %3673 = vst.msk [vmem:[%s4840_s19 + $0x18] sm:$0x1f] %vm842_vm14, %v2533_v8 }
0x14e1   :  { %v2663_v2 = vpop.permute.xlu0 %2662 }
0x14e9   :  { %v2871_v7 = vpop.permute.xlu0 %2870 }
0x14eb   :  { %2536 = vrot.lane.b32.xlu2 %v5344_v17, %s4628_s0 }
0x14f3   :  { %2872 = vrot.lane.b32.xlu2 %v2594_v46, %s4628_s0 }
0x14fb   :  { %2777 = vrot.lane.b32.xlu2 %v2590_v37, %s4654_s18 }
0x1546   :  { %v2628_v59 = vpop.xlane.xlu2 %2627 }
0x1547   :  { %3869 = vrcp.f32 %v2628_v59  ;;  %v3782_v59 = vld [vmem:[#allocation29] ss:$0 sm:$0xff] }
0x154d   :  { %v3870_v17 = vpop.eup %3869 }
0x154e   :  { %v2630_v27 = vmul.f32 %v3870_v17, %v3866_v15  ;;  %v2537_v26 = vpop.permute.xlu2 %2536 }
0x154f   :  { %3674 = vmatpush.msk.msra.mxu3 %vm607_vm3, %v2537_v26 }
0x1550   :  { %3679 = vst.msk [vmem:[%s4840_s19 + $0x20] sm:$0x1f] %vm842_vm14, %v2630_v27  ;;  %3675 = vmatmul.msk.f32.vlgmr.msra.gmra.mxu3 %vm855_vm15, %v2533_v8  ;;  %3681 = vmatmul.msk.f32.vlgmr.msra.gmra.mxu2 %vm855_vm15, %v2630_v27 }
0x1551   :  { %3682 = vmatpush.xpose.msk.msrb.mxu3 %vm814_vm12, %v2665_v61 }
0x1555   :  { %3689 = vmatpush.xpose.msk.msra.mxu3 %vm814_vm12, %v2780_v0 }
0x1556   :  { %v2873_v1 = vpop.permute.xlu2 %2872 }
0x1557   :  { %3695 = vmatpush.xpose.msk.msra.mxu2 %vm814_vm12, %v2873_v1 }
0x1558   :  { %3683 = vmatmul.msk.f32.vlgmr.msrb.gmra.mxu3 %vm814_vm12, %v2663_v2 }
0x155e   :  { %v2778_v30 = vpop.permute.xlu2 %2777 }
0x1560   :  { %3690 = vmatmul.msk.f32.vlgmr.msra.gmra.mxu3 %vm814_vm12, %v2778_v30 }
0x15d3   :  { %v2560_v4 = vpop.f32.mrf.mxu3  ;;  %v2659_v5 = vpop.f32.mrf.mxu2 }
0x15d4   :  { %3676 = vmatmul.msk.f32.vlgmr.msra.gmra.mxu0 %vm814_vm12, %v2560_v4  ;;  %3688 = vmatmul.msk.f32.vlgmr.msrb.gmra.mxu2 %vm814_vm12, %v2659_v5  ;;  %v3090_v4 = vld [vmem:[#allocation34 + $0x1e8] sm:$0xff]  ;;  %v3092_v5 = vld [vmem:[#allocation34 + $0x1f8] sm:$0xff] }
0x15d5   :  { %3126 = vmatpush.msrb.mxu2 %v3090_v4  ;;  %v3038_v4 = vld [vmem:[#allocation34 + $0x48] sm:$0xff] }
0x15db   :  { %v2687_v36 = vpop.f32.mrf.mxu3 }
0x15dc   :  { %v2690_v10 = vmul.f32 0.17677669, %v2687_v36  ;;  %3696 = vmatmul.msk.f32.vlgmr.msra.gmra.mxu2 %vm814_vm12, %v2871_v7  ;;  %v3085_v7 = vld [vmem:[#allocation34 + $0x1c0] sm:$0xff]  ;;  %v3086_v36 = vld [vmem:[#allocation34 + $0x1c8] sm:$0xff] }
0x15dd   :  { %3127 = vmatpush.msrb.mxu2 %v3086_v36  ;;  %v3034_v36 = vld [vmem:[#allocation34 + $0x28] sm:$0xff] }
0x15de   :  { %v2691_v13 = vsel %vm842_vm14, %v2690_v10, -inf }
0x15df   :  { %2692 = vmax.xlane.f32.xlu0 %v2691_v13 }
0x15e3   :  { %v2802_v40 = vpop.f32.mrf.mxu3 }
0x15e4   :  { %v2805_v19 = vmul.f32 0.17677669, %v2802_v40 }
0x15e6   :  { %v2806_v21 = vsel %vm842_vm14, %v2805_v19, -inf }
0x15e7   :  { %2807 = vmax.xlane.f32.xlu2 %v2806_v21 }
0x1651   :  { %v2583_v51 = vpop.f32.mrf.mxu0 }
0x1652   :  { %v2693_v57 = vpop.xlane.xlu0 %2692  ;;  %v2586_v61 = vadd.f32 %v2583_v51, %v5429_v42  ;;  %v3091_v42 = vld [vmem:[#allocation34 + $0x1f0] sm:$0xff]  ;;  %v3057_v51 = vld [vmem:[#allocation34 + $0xe0] sm:$0xff] }
0x1653   :  { %v2694_v28 = vsub.f32 %v2690_v10, %v2693_v57  ;;  %v3088_v10 = vld [vmem:[#allocation34 + $0x1d8] sm:$0xff] }
0x1655   :  { %v2695_v29 = vmul.f32 1.442695, %v2694_v28 }
0x1657   :  { %3871 = vpow2.f32 %v2695_v29  ;;  %v2774_v31 = vpop.f32.mrf.mxu2 }
0x165a   :  { %v2808_v18 = vpop.xlane.xlu2 %2807 }
0x165b   :  { %v2809_v6 = vsub.f32 %v2805_v19, %v2808_v18  ;;  %v3081_v18 = vld [vmem:[#allocation34 + $0x1a0] sm:$0xff] }
0x165d   :  { %v3872_v32 = vpop.eup %3871  ;;  %v2810_v46 = vmul.f32 1.442695, %v2809_v6  ;;  %v3082_v6 = vld [vmem:[#allocation34 + $0x1a8] sm:$0xff] }
0x165e   :  { %v2697_v33 = vsel %vm842_vm14, %v3872_v32, 0.0  ;;  %3128 = vmatpush.msrb.mxu2 %v3082_v6 }
0x165f   :  { %3873 = vpow2.f32 %v2810_v46  ;;  %v2895_v34 = vpop.f32.mrf.mxu2  ;;  %2698 = vadd.xlane.f32.xlu0 %v2697_v33  ;;  %v3084_v46 = vld [vmem:[#allocation34 + $0x1b8] sm:$0xff]  ;;  %v3077_v33 = vld [vmem:[#allocation34 + $0x180] sm:$0xff] }
0x1660   :  { %v2898_v12 = vmul.f32 0.17677669, %v2895_v34  ;;  %v3078_v34 = vld [vmem:[#allocation34 + $0x188] sm:$0xff] }
0x1661   :  { %3129 = vmatpush.msrb.mxu2 %v3078_v34  ;;  %v3281_v34 = vld [vmem:[#allocation37 + $0x70] sm:$0xff] }
0x1662   :  { %v2899_v35 = vsel %vm842_vm14, %v2898_v12, -inf }
0x1663   :  { %2900 = vmax.xlane.f32.xlu1 %v2899_v35  ;;  %v3080_v35 = vld [vmem:[#allocation34 + $0x198] sm:$0xff] }
0x1665   :  { %v3874_v62 = vpop.eup %3873 }
0x1666   :  { %v2812_v63 = vsel %vm842_vm14, %v3874_v62, 0.0 }
0x1667   :  { %2813 = vadd.xlane.f32.xlu2 %v2812_v63  ;;  %v3074_v63 = vld [vmem:[#allocation34 + $0x168] sm:$0xff] }
0x1668   :  { %3130 = vmatpush.msrb.mxu2 %v3074_v63 }
0x1673   :  { %2704 = vrot.lane.b32.xlu0 %v5404_v22, %s4653_s5 }
0x167f   :  { %2819 = vrot.lane.b32.xlu2 %v5404_v22, %s4654_s18 }
0x16d2   :  { %v2699_v37 = vpop.xlane.xlu0 %2698 }
0x16d3   :  { %3875 = vrcp.f32 %v2699_v37  ;;  %v3075_v37 = vld [vmem:[#allocation34 + $0x170] sm:$0xff] }
0x16d6   :  { %v2901_v39 = vpop.xlane.xlu1 %2900 }
0x16d7   :  { %v2902_v44 = vsub.f32 %v2898_v12, %v2901_v39  ;;  %v3079_v12 = vld [vmem:[#allocation34 + $0x190] sm:$0xff]  ;;  %v3076_v39 = vld [vmem:[#allocation34 + $0x178] sm:$0xff] }
0x16d9   :  { %v3876_v55 = vpop.eup %3875  ;;  %v2903_v20 = vmul.f32 1.442695, %v2902_v44  ;;  %v3069_v44 = vld [vmem:[#allocation34 + $0x140] sm:$0xff] }
0x16da   :  { %v2701_v11 = vmul.f32 %v3876_v55, %v3872_v32  ;;  %v2814_v41 = vpop.xlane.xlu2 %2813  ;;  %v3083_v32 = vld [vmem:[#allocation34 + $0x1b0] sm:$0xff]  ;;  %v3070_v55 = vld [vmem:[#allocation34 + $0x148] sm:$0xff] }
0x16db   :  { %3877 = vpow2.f32 %v2903_v20  ;;  %v3071_v20 = vld [vmem:[#allocation34 + $0x150] sm:$0xff]  ;;  %3131 = vmatpush.msrb.mxu2 %v3070_v55 }
0x16dc   :  { %3684 = vst.msk [vmem:[%s4840_s19 + $0x28] sm:$0x1f] %vm842_vm14, %v2701_v11  ;;  %3879 = vrcp.f32 %v2814_v41  ;;  %v3065_v41 = vld [vmem:[#allocation34 + $0x120] sm:$0xff] }
0x16e1   :  { %v3878_v45 = vpop.eup %3877 }
0x16e2   :  { %v3880_v16 = vpop.eup %3879  ;;  %v2905_v25 = vsel %vm842_vm14, %v3878_v45, 0.0  ;;  %v2820_v48 = vpop.permute.xlu2 %2819 }
0x16e3   :  { %v2816_v38 = vmul.f32 %v3880_v16, %v3874_v62  ;;  %2906 = vadd.xlane.f32.xlu1 %v2905_v25  ;;  %v3073_v62 = vld [vmem:[#allocation34 + $0x160] sm:$0xff]  ;;  %v3067_v16 = vld [vmem:[#allocation34 + $0x130] sm:$0xff]  ;;  %v3068_v25 = vld [vmem:[#allocation34 + $0x138] sm:$0xff] }
0x16e5   :  { %3691 = vst.msk [vmem:[%s4840_s19 + $0x30] sm:$0x1f] %vm842_vm14, %v2816_v38  ;;  %v2705_v43 = vpop.permute.xlu0 %2704 }
0x16e6   :  { %3685 = vmatpush.msk.msrb.mxu0 %vm607_vm3, %v2705_v43  ;;  %v3062_v43 = vld [vmem:[#allocation34 + $0x108] sm:$0xff] }
0x16e7   :  { %3686 = vmatmul.msk.f32.vlgmr.msrb.gmra.mxu0 %vm855_vm15, %v2701_v11  ;;  %v3072_v11 = vld [vmem:[#allocation34 + $0x158] sm:$0xff] }
0x16e8   :  { %3692 = vmatpush.msk.msra.mxu0 %vm607_vm3, %v2820_v48  ;;  %v3063_v48 = vld [vmem:[#allocation34 + $0x110] sm:$0xff] }
0x16ea   :  { %2954 = vmatpush.msrb.mxu0 %v5442_v23 }
0x16ec   :  { %2955 = vmatpush.msrb.mxu0 %v5444_v56 }
0x16ee   :  { %2956 = vmatpush.msrb.mxu0 %v5447_v24 }
0x16ef   :  { %3693 = vmatmul.msk.f32.vlgmr.msra.gmra.mxu0 %vm855_vm15, %v2816_v38  ;;  %v3061_v38 = vld [vmem:[#allocation34 + $0x100] sm:$0xff] }
0x16f0   :  { %2957 = vmatpush.msrb.mxu0 %v5461_v3  ;;  %v3089_v3 = vld [vmem:[#allocation34 + $0x1e0] sm:$0xff] }
0x16f2   :  { %3172 = vmatpush.msra.mxu0 %v3092_v5  ;;  %v3040_v5 = vld [vmem:[#allocation34 + $0x58] sm:$0xff] }
0x16f4   :  { %3173 = vmatpush.msra.mxu0 %v3088_v10  ;;  %v3036_v10 = vld [vmem:[#allocation34 + $0x38] sm:$0xff] }
0x16f6   :  { %3174 = vmatpush.msra.mxu0 %v3084_v46  ;;  %v3282_v46 = vld [vmem:[#allocation37 + $0x78] sm:$0xff] }
0x16f8   :  { %3175 = vmatpush.msra.mxu0 %v3080_v35  ;;  %v3280_v35 = vld [vmem:[#allocation37 + $0x68] sm:$0xff] }
0x16fa   :  { %3176 = vmatpush.msra.mxu0 %v3076_v39 }
0x16fc   :  { %2912 = vrot.lane.b32.xlu1 %v5404_v22, %s4628_s0  ;;  %3177 = vmatpush.msra.mxu0 %v3072_v11  ;;  %s4656_s0 = smov [#allocation43]  }
0x16fd   :  { %s3538_s9 = sshll.u32 %s4656_s0, 4  ;;  %s3539_s9 = int_to_ptr.vmem [resolvable:$true] %s3538_s9 }
0x16fe   :  { %3178 = vmatpush.msra.mxu0 %v3068_v25 }
0x1756   :  { %v2907_v49 = vpop.xlane.xlu1 %2906 }
0x1757   :  { %3881 = vrcp.f32 %v2907_v49  ;;  %v3064_v49 = vld [vmem:[#allocation34 + $0x118] sm:$0xff] }
0x1758   :  { %3179 = vmatpush.msra.mxu0 %v3064_v49 }
0x175d   :  { %v3882_v52 = vpop.eup %3881 }
0x175e   :  { %v2909_v14 = vmul.f32 %v3882_v52, %v3878_v45  ;;  %v3066_v45 = vld [vmem:[#allocation34 + $0x128] sm:$0xff] }
0x175f   :  { %3132 = vmatpush.msrb.mxu2 %v3066_v45  ;;  %v3058_v52 = vld [vmem:[#allocation34 + $0xe8] sm:$0xff] }
0x1760   :  { %3697 = vst.msk [vmem:[%s4840_s19 + $0x38] sm:$0x1f] %vm842_vm14, %v2909_v14  ;;  %s5662_s19 = sld [smem:[#allocation76_spill]] }
0x1761   :  { %3133 = vmatpush.msrb.mxu2 %v3062_v43  ;;  %v3783_v43 = vld [vmem:[#allocation31] ss:$0 sm:$0xff] }
0x1763   :  { %3134 = vmatpush.msrb.mxu2 %v3058_v52 }
0x1764   :  { %v2728_v60 = vpop.f32.mrf.mxu0 }
0x1765   :  { %3687 = vmatmul.msk.f32.vlgmr.msrb.gmra.mxu1 %vm814_vm12, %v2728_v60  ;;  %v3060_v60 = vld [vmem:[#allocation34 + $0xf8] sm:$0xff] }
0x1766   :  { %3103 = vmatpush.msrb.mxu1 %v3089_v3  ;;  %3180 = vmatpush.msra.mxu0 %v3060_v60  ;;  %v3037_v3 = vld [vmem:[#allocation34 + $0x40] sm:$0xff] }
0x1768   :  { %3104 = vmatpush.msrb.mxu1 %v3085_v7  ;;  %v3033_v7 = vld [vmem:[#allocation34 + $0x20] sm:$0xff] }
0x176a   :  { %3105 = vmatpush.msrb.mxu1 %v3081_v18 }
0x176c   :  { %v2843_v9 = vpop.f32.mrf.mxu0  ;;  %3106 = vmatpush.msrb.mxu1 %v3077_v33  ;;  %v3330_v33 = vld [vmem:[#allocation37 + $0x1f8] sm:$0xff] }
0x176d   :  { %3694 = vmatmul.msk.f32.vlgmr.msra.gmra.mxu1 %vm814_vm12, %v2843_v9  ;;  %v3053_v9 = vld [vmem:[#allocation34 + $0xc0] sm:$0xff] }
0x176e   :  { %v2913_v15 = vpop.permute.xlu1 %2912  ;;  %3107 = vmatpush.msrb.mxu1 %v3073_v62  ;;  %v3328_v62 = vld [vmem:[#allocation37 + $0x1e8] sm:$0xff] }
0x176f   :  { %3698 = vmatpush.msk.msrb.mxu3 %vm607_vm3, %v2913_v15  ;;  %v3054_v15 = vld [vmem:[#allocation34 + $0xc8] sm:$0xff] }
0x1770   :  { %3699 = vmatmul.msk.f32.vlgmr.msrb.gmra.mxu3 %vm855_vm15, %v2909_v14  ;;  %3108 = vmatpush.msrb.mxu1 %v3069_v44  ;;  %v3059_v14 = vld [vmem:[#allocation34 + $0xf0] sm:$0xff] }
0x1771   :  { %3149 = vmatpush.msra.mxu3 %v3091_v42  ;;  %3135 = vmatpush.msrb.mxu2 %v3054_v15  ;;  %v3039_v42 = vld [vmem:[#allocation34 + $0x50] sm:$0xff] }
0x1772   :  { %3109 = vmatpush.msrb.mxu1 %v3065_v41 }
0x1774   :  { %3110 = vmatpush.msrb.mxu1 %v3061_v38 }
0x1776   :  { %3111 = vmatpush.msrb.mxu1 %v3057_v51  ;;  %v3784_v51 = vld [vmem:[#allocation32] ss:$0 sm:$0xff] }
0x1778   :  { %3112 = vmatpush.msrb.mxu1 %v3053_v9 }
0x17e2   :  { %v2751_v22 = vpop.f32.mrf.mxu1 }
0x17e3   :  { %v2775_v8 = vadd.f32 %v2774_v31, %v2751_v22  ;;  %v3056_v22 = vld [vmem:[#allocation34 + $0xd8] sm:$0xff] }
0x17e4   :  { %3181 = vmatpush.msra.mxu0 %v3056_v22  ;;  %v3279_v22 = vld [vmem:[#allocation37 + $0x60] sm:$0xff] }
0x17ea   :  { %v2866_v53 = vpop.f32.mrf.mxu1 }
0x17eb   :  { %v2869_v23 = vadd.f32 %v2866_v53, %v2775_v8  ;;  %v3049_v53 = vld [vmem:[#allocation34 + $0xa0] sm:$0xff]  ;;  %v3050_v8 = vld [vmem:[#allocation34 + $0xa8] sm:$0xff] }
0x17ec   :  { %3113 = vmatpush.msrb.mxu1 %v3049_v53  ;;  %3136 = vmatpush.msrb.mxu2 %v3050_v8  ;;  %v3298_v53 = vld [vmem:[#allocation37 + $0xf8] sm:$0xff]  ;;  %v3327_v8 = vld [vmem:[#allocation37 + $0x1e0] sm:$0xff] }
0x17f3   :  { %v2936_v58 = vpop.f32.mrf.mxu3 }
0x17f4   :  { %3700 = vmatmul.msk.f32.vlgmr.msrb.gmra.mxu0 %vm814_vm12, %v2936_v58  ;;  %v3055_v58 = vld [vmem:[#allocation34 + $0xd0] sm:$0xff] }
0x1871   :  { %v2959_v56 = vpop.f32.mrf.mxu0 }
0x1872   :  { %v2962_v24 = vadd.f32 %v2959_v56, %v2869_v23  ;;  %v3051_v23 = vld [vmem:[#allocation34 + $0xb0] sm:$0xff]  ;;  %v3052_v56 = vld [vmem:[#allocation34 + $0xb8] sm:$0xff] }
0x1873   :  { %3182 = vmatpush.msra.mxu0 %v3052_v56  ;;  %v3313_v56 = vld [vmem:[#allocation37 + $0x170] sm:$0xff] }
0x1874   :  { %v2964_v17 = vrot.slane %v2962_v24, 3  ;;  %v3045_v24 = vld [vmem:[#allocation34 + $0x80] sm:$0xff] }
0x1875   :  { %3114 = vmatpush.msrb.mxu1 %v3045_v24  ;;  %v3326_v24 = vld [vmem:[#allocation37 + $0x1d8] sm:$0xff] }
0x1876   :  { %v2966_v27 = vsel %vm607_vm3, %v2586_v61, %v2964_v17  ;;  %v2972_v26 = vadd.f32 %v3782_v59, %v2964_v17  ;;  %v3047_v61 = vld [vmem:[#allocation34 + $0x90] sm:$0xff]  ;;  %v3048_v17 = vld [vmem:[#allocation34 + $0x98] sm:$0xff] }
0x1877   :  { %v2971_v0 = vadd.f32 %v3782_v59, %v2966_v27  ;;  %v3046_v59 = vld [vmem:[#allocation34 + $0x88] sm:$0xff]  ;;  %3183 = vmatpush.msra.mxu0 %v3048_v17  ;;  %v3041_v27 = vld [vmem:[#allocation34 + $0x60] sm:$0xff] }
0x1878   :  { %v5501_v1 = vadd.f32 %v2972_v26, %v5306_v50  ;;  %v3087_v50 = vld [vmem:[#allocation34 + $0x1d0] sm:$0xff]  ;;  %3137 = vmatpush.msrb.mxu2 %v3046_v59  ;;  %v3042_v26 = vld [vmem:[#allocation34 + $0x68] sm:$0xff]  ;;  %3115 = vmatpush.msrb.mxu1 %v3041_v27 }
0x1879   :  { %v5504_v2 = vadd.f32 %v2971_v0, %v5302_v47  ;;  %3150 = vmatpush.msra.mxu3 %v3087_v50  ;;  %v3043_v0 = vld [vmem:[#allocation34 + $0x70] sm:$0xff] }
0x187a   :  { %v2979_v30 = vsel %vm615_vm1, %v5501_v1, 0.0  ;;  %3138 = vmatpush.msrb.mxu2 %v3042_v26  ;;  %3116 = vmatpush.msrb.mxu1 %v3037_v3  ;;  %v3035_v50 = vld [vmem:[#allocation34 + $0x30] sm:$0xff] }
0x187b   :  { %2980 = vadd.xlane.f32.xlu1 %v2979_v30  ;;  %2977 = vadd.xlane.f32.xlu0 %v5504_v2  ;;  %v3044_v30 = vld [vmem:[#allocation34 + $0x78] sm:$0xff]  ;;  %v3312_v17 = vld [vmem:[#allocation37 + $0x168] sm:$0xff] }
0x187c   :  { %3151 = vmatpush.msra.mxu3 %v3083_v32  ;;  %3184 = vmatpush.msra.mxu0 %v3044_v30  ;;  %v3277_v59 = vld [vmem:[#allocation37 + $0x50] sm:$0xff]  ;;  %v3276_v26 = vld [vmem:[#allocation37 + $0x48] sm:$0xff]  ;;  %v3311_v30 = vld [vmem:[#allocation37 + $0x160] sm:$0xff] }
0x187d   :  { %3139 = vmatpush.msrb.mxu2 %v3038_v4  ;;  %3117 = vmatpush.msrb.mxu1 %v3033_v7  ;;  %v3325_v27 = vld [vmem:[#allocation37 + $0x1d0] sm:$0xff]  ;;  %v3324_v3 = vld [vmem:[#allocation37 + $0x1c8] sm:$0xff]  ;;  %v3275_v4 = vld [vmem:[#allocation37 + $0x40] sm:$0xff] }
0x187e   :  { %3152 = vmatpush.msra.mxu3 %v3079_v12  ;;  %3185 = vmatpush.msra.mxu0 %v3040_v5  ;;  %v3329_v12 = vld [vmem:[#allocation37 + $0x1f0] sm:$0xff]  ;;  %v3310_v5 = vld [vmem:[#allocation37 + $0x158] sm:$0xff]  ;;  %v3323_v7 = vld [vmem:[#allocation37 + $0x1c0] sm:$0xff] }
0x187f   :  { %3140 = vmatpush.msrb.mxu2 %v3034_v36  ;;  %v3274_v36 = vld [vmem:[#allocation37 + $0x38] sm:$0xff] }
0x1880   :  { %3153 = vmatpush.msra.mxu3 %v3075_v37  ;;  %3186 = vmatpush.msra.mxu0 %v3036_v10  ;;  %v3309_v10 = vld [vmem:[#allocation37 + $0x150] sm:$0xff] }
0x1882   :  { %3154 = vmatpush.msra.mxu3 %v3071_v20 }
0x1884   :  { %3155 = vmatpush.msra.mxu3 %v3067_v16 }
0x1886   :  { %3156 = vmatpush.msra.mxu3 %v3063_v48 }
0x1888   :  { %3157 = vmatpush.msra.mxu3 %v3059_v14 }
0x188a   :  { %3158 = vmatpush.msra.mxu3 %v3055_v58 }
0x188c   :  { %3159 = vmatpush.msra.mxu3 %v3051_v23  ;;  %v3297_v23 = vld [vmem:[#allocation37 + $0xf0] sm:$0xff] }
0x188e   :  { %3160 = vmatpush.msra.mxu3 %v3047_v61  ;;  %v3296_v61 = vld [vmem:[#allocation37 + $0xe8] sm:$0xff] }
0x1890   :  { %3161 = vmatpush.msra.mxu3 %v3043_v0  ;;  %v3295_v0 = vld [vmem:[#allocation37 + $0xe0] sm:$0xff] }
0x1892   :  { %3162 = vmatpush.msra.mxu3 %v3039_v42  ;;  %v3294_v42 = vld [vmem:[#allocation37 + $0xd8] sm:$0xff] }
0x1894   :  { %3163 = vmatpush.msra.mxu3 %v3035_v50  ;;  %v3293_v50 = vld [vmem:[#allocation37 + $0xd0] sm:$0xff] }
0x18ee   :  { %v2981_v47 = vpop.xlane.xlu1 %2980  ;;  %v2978_v13 = vpop.xlane.xlu0 %2977 }
0x18ef   :  { %v2983_v40 = vmul.f32 %v2981_v47, %v4989_v54  ;;  %v2982_v19 = vmul.f32 %v2978_v13, %v4989_v54  ;;  %v3029_v47 = vld [vmem:[#allocation34] sm:$0xff]  ;;  %v3030_v13 = vld [vmem:[#allocation34 + $0x8] sm:$0xff] }
0x18f0   :  { %3118 = vmatpush.msrb.mxu1 %v3029_v47  ;;  %3141 = vmatpush.msrb.mxu2 %v3030_v13  ;;  %v3322_v47 = vld [vmem:[#allocation37 + $0x1b8] sm:$0xff]  ;;  %v3273_v13 = vld [vmem:[#allocation37 + $0x30] sm:$0xff] }
0x18f1   :  { %v5512_v21 = vsub.f32 %v5501_v1, %v2983_v40  ;;  %v5515_v57 = vsub.f32 %v5504_v2, %v2982_v19  ;;  %v3031_v40 = vld [vmem:[#allocation34 + $0x10] sm:$0xff]  ;;  %v3032_v19 = vld [vmem:[#allocation34 + $0x18] sm:$0xff] }
0x18f2   :  { %3164 = vmatpush.msra.mxu3 %v3031_v40  ;;  %3187 = vmatpush.msra.mxu0 %v3032_v19  ;;  %v3292_v40 = vld [vmem:[#allocation37 + $0xc8] sm:$0xff] }
0x18f3   :  { %v2986_v28 = vmul.f32 %v5515_v57, %v5515_v57  ;;  %v2987_v29 = vmul.f32 %v5512_v21, %v5512_v21  ;;  %3335 = vmatpush.msra.mxu1 %v3282_v46  ;;  %3358 = vmatpush.msra.mxu2 %v3298_v53  ;;  %v3308_v19 = vld [vmem:[#allocation37 + $0x148] sm:$0xff]  ;;  %v3290_v46 = vld [vmem:[#allocation37 + $0xb8] sm:$0xff] }
0x18f4   :  { %3404 = vmatpush.msrb.mxu0 %v3330_v33  ;;  %v3306_v33 = vld [vmem:[#allocation37 + $0x138] sm:$0xff] }
0x18f5   :  { %2988 = vadd.xlane.f32.xlu2 %v2986_v28  ;;  %v2990_v31 = vsel %vm615_vm1, %v2987_v29, 0.0  ;;  %3336 = vmatpush.msra.mxu1 %v3281_v34  ;;  %v3319_v34 = vld [vmem:[#allocation37 + $0x1a0] sm:$0xff] }
0x18f6   :  { %2991 = vadd.xlane.f32.xlu0 %v2990_v31  ;;  %3405 = vmatpush.msrb.mxu0 %v3329_v12  ;;  %v3270_v12 = vld [vmem:[#allocation37 + $0x18] sm:$0xff] }
0x18f7   :  { %3337 = vmatpush.msra.mxu1 %v3280_v35  ;;  %3359 = vmatpush.msra.mxu2 %v3297_v23  ;;  %v3289_v35 = vld [vmem:[#allocation37 + $0xb0] sm:$0xff] }
0x18f8   :  { %3406 = vmatpush.msrb.mxu0 %v3328_v62  ;;  %v3305_v62 = vld [vmem:[#allocation37 + $0x130] sm:$0xff] }
0x18f9   :  { %3338 = vmatpush.msra.mxu1 %v3279_v22  ;;  %3360 = vmatpush.msra.mxu2 %v3296_v61 }
0x18fa   :  { %3407 = vmatpush.msrb.mxu0 %v3327_v8 }
0x18fb   :  { %3361 = vmatpush.msra.mxu2 %v3295_v0 }
0x18fc   :  { %3408 = vmatpush.msrb.mxu0 %v3326_v24 }
0x18fd   :  { %3362 = vmatpush.msra.mxu2 %v3294_v42 }
0x18fe   :  { %3409 = vmatpush.msrb.mxu0 %v3325_v27 }
0x18ff   :  { %3363 = vmatpush.msra.mxu2 %v3293_v50 }
0x1900   :  { %3410 = vmatpush.msrb.mxu0 %v3324_v3 }
0x1901   :  { %3364 = vmatpush.msra.mxu2 %v3292_v40 }
0x1902   :  { %3411 = vmatpush.msrb.mxu0 %v3323_v7 }
0x1904   :  { %3412 = vmatpush.msrb.mxu0 %v3322_v47 }
0x1968   :  { %v2989_v28 = vpop.xlane.xlu2 %2988 }
0x1969   :  { %v2993_v29 = vmul.f32 %v2989_v28, %v4989_v54  ;;  %v2992_v31 = vpop.xlane.xlu0 %2991  ;;  %v3321_v28 = vld [vmem:[#allocation37 + $0x1b0] sm:$0xff] }
0x196a   :  { %v2994_v18 = vmul.f32 %v2992_v31, %v4989_v54  ;;  %3413 = vmatpush.msrb.mxu0 %v3321_v28  ;;  %v3291_v31 = vld [vmem:[#allocation37 + $0xc0] sm:$0xff] }
0x196b   :  { %v2995_v6 = vadd.f32 1e-05, %v2993_v29  ;;  %v3272_v29 = vld [vmem:[#allocation37 + $0x28] sm:$0xff]  ;;  %3365 = vmatpush.msra.mxu2 %v3291_v31 }
0x196c   :  { %v2996_v32 = vadd.f32 1e-05, %v2994_v18  ;;  %v3307_v18 = vld [vmem:[#allocation37 + $0x140] sm:$0xff] }
0x196d   :  { %3883 = vrsqrt.f32 %v2995_v6  ;;  %vm3003_vm14 = vweird.f32 %v2995_v6  ;;  %3366 = vmatpush.msra.mxu2 %v3290_v46 }
0x196e   :  { %3885 = vrsqrt.f32 %v2996_v32  ;;  %vm3013_vm7 = vweird.f32 %v2996_v32 }
0x196f   :  { %3367 = vmatpush.msra.mxu2 %v3289_v35 }
0x1973   :  { %v3884_v63 = vpop.eup %3883 }
0x1974   :  { %v3886_v37 = vpop.eup %3885  ;;  %v2998_v39 = vmul.f32 %v3884_v63, %v2995_v6  ;;  %vm3004_vm12 = vweird.f32 %v3884_v63  ;;  %v3320_v6 = vld [vmem:[#allocation37 + $0x1a8] sm:$0xff] }
0x1975   :  { %v3008_v44 = vmul.f32 %v3886_v37, %v2996_v32  ;;  %vm3014_vm15 = vweird.f32 %v3886_v37  ;;  %vm3005_vm6 = vmor %vm3003_vm14, %vm3004_vm12  ;;  %3414 = vmatpush.msrb.mxu0 %v3320_v6  ;;  %v3271_v32 = vld [vmem:[#allocation37 + $0x20] sm:$0xff] }
0x1976   :  { %v2999_v55 = vmul.f32 %v3884_v63, %v2998_v39  ;;  %vm3015_vm8 = vmor %vm3013_vm7, %vm3014_vm15  ;;  %v3288_v39 = vld [vmem:[#allocation37 + $0xa8] sm:$0xff] }
0x1977   :  { %v3009_v20 = vmul.f32 %v3886_v37, %v3008_v44  ;;  %3415 = vmatpush.msrb.mxu0 %v3319_v34  ;;  %v3304_v44 = vld [vmem:[#allocation37 + $0x128] sm:$0xff]  ;;  %3368 = vmatpush.msra.mxu2 %v3288_v39 }
0x1978   :  { %v3000_v11 = vmul.f32 0.5, %v2999_v55  ;;  %v3317_v55 = vld [vmem:[#allocation37 + $0x190] sm:$0xff] }
0x1979   :  { %v3010_v41 = vmul.f32 0.5, %v3009_v20  ;;  %v3268_v20 = vld [vmem:[#allocation37 + $0x8] sm:$0xff] }
0x197a   :  { %v3001_v45 = vsub.f32 1.5, %v3000_v11  ;;  %v3287_v11 = vld [vmem:[#allocation37 + $0xa0] sm:$0xff] }
0x197b   :  { %v3011_v16 = vsub.f32 1.5, %v3010_v41  ;;  %v3303_v41 = vld [vmem:[#allocation37 + $0x120] sm:$0xff]  ;;  %3369 = vmatpush.msra.mxu2 %v3287_v11 }
0x197c   :  { %v3002_v25 = vmul.f32 %v3884_v63, %v3001_v45  ;;  %v3316_v45 = vld [vmem:[#allocation37 + $0x188] sm:$0xff] }
0x197d   :  { %v3012_v38 = vmul.f32 %v3886_v37, %v3011_v16  ;;  %v3267_v16 = vld [vmem:[#allocation37] sm:$0xff] }
0x197e   :  { %v3006_v48 = vsel %vm3005_vm6, %v3884_v63, %v3002_v25  ;;  %v3318_v63 = vld [vmem:[#allocation37 + $0x198] sm:$0xff] }
0x197f   :  { %v3017_v49 = vmul.f32 %v3006_v48, %v5515_v57  ;;  %v3016_v52 = vsel %vm3015_vm8, %v3886_v37, %v3012_v38  ;;  %v3314_v57 = vld [vmem:[#allocation37 + $0x178] sm:$0xff]  ;;  %3416 = vmatpush.msrb.mxu0 %v3318_v63  ;;  %v3269_v37 = vld [vmem:[#allocation37 + $0x10] sm:$0xff]  ;;  %v3315_v48 = vld [vmem:[#allocation37 + $0x180] sm:$0xff] }
0x1980   :  { %v3018_v60 = vmul.f32 %v3016_v52, %v5512_v21  ;;  %3381 = vmatpush.msrb.mxu3 %v3314_v57  ;;  %v3278_v21 = vld [vmem:[#allocation37 + $0x58] sm:$0xff]  ;;  %v3284_v52 = vld [vmem:[#allocation37 + $0x88] sm:$0xff] }
0x1981   :  { %v3022_v14 = vmul.f32 %v3783_v43, %v3017_v49  ;;  %3339 = vmatpush.msra.mxu1 %v3278_v21  ;;  %3417 = vmatpush.msrb.mxu0 %v3317_v55  ;;  %v3286_v25 = vld [vmem:[#allocation37 + $0x98] sm:$0xff]  ;;  %v3285_v49 = vld [vmem:[#allocation37 + $0x90] sm:$0xff] }
0x1982   :  { %v3023_v15 = vmul.f32 %v3783_v43, %v3018_v60  ;;  %3382 = vmatpush.msrb.mxu3 %v3313_v56  ;;  %v3302_v38 = vld [vmem:[#allocation37 + $0x118] sm:$0xff]  ;;  %3370 = vmatpush.msra.mxu2 %v3286_v25 }
0x1983   :  { %v3027_v9 = vadd.f32 %v3784_v51, %v3022_v14  ;;  %3340 = vmatpush.msra.mxu1 %v3277_v59  ;;  %3418 = vmatpush.msrb.mxu0 %v3316_v45  ;;  %v5526_v43 = vld [vmem:[#allocation35] sm:$0xf]  ;;  %v3300_v14 = vld [vmem:[#allocation37 + $0x108] sm:$0xff] }
0x1984   :  { %v3028_v58 = vadd.f32 %v3784_v51, %v3023_v15  ;;  %3383 = vmatpush.msrb.mxu3 %v3312_v17  ;;  %v3301_v51 = vld [vmem:[#allocation37 + $0x110] sm:$0xff]  ;;  %3371 = vmatpush.msra.mxu2 %v3285_v49  ;;  %v3095_v60 = vperm.slane %v5526_v43, 0  ;;  %v3098_v15 = vperm.slane %v5526_v43, 3  ;;  %v3096_v23 = vperm.slane %v5526_v43, 1 }
0x1985   :  { %3119 = vmatmul.f32.vlgmr.msrb.gmra.mxu1 %v3027_v9  ;;  %3142 = vmatmul.f32.vlgmr.msrb.gmra.mxu2 %v3027_v9  ;;  %v3097_v24 = vperm.slane %v5526_v43, 2 }
0x1986   :  { %3165 = vmatmul.f32.vlgmr.msra.gmra.mxu3 %v3027_v9  ;;  %3188 = vmatmul.f32.vlgmr.msra.gmra.mxu0 %v3027_v9  ;;  %v3283_v9 = vld [vmem:[#allocation37 + $0x80] sm:$0xff] }
0x1987   :  { %3341 = vmatpush.msra.mxu1 %v3276_v26  ;;  %3384 = vmatpush.msrb.mxu3 %v3311_v30 }
0x1988   :  { %3419 = vmatpush.msrb.mxu0 %v3315_v48  ;;  %3372 = vmatpush.msra.mxu2 %v3284_v52 }
0x1989   :  { %3342 = vmatpush.msra.mxu1 %v3275_v4  ;;  %3385 = vmatpush.msrb.mxu3 %v3310_v5 }
0x198a   :  { %3373 = vmatpush.msra.mxu2 %v3283_v9 }
0x198b   :  { %3343 = vmatpush.msra.mxu1 %v3274_v36  ;;  %3386 = vmatpush.msrb.mxu3 %v3309_v10 }
0x198d   :  { %3122 = vmatmul.f32.gmra.mxu1 %v3028_v58  ;;  %3145 = vmatmul.f32.gmra.mxu2 %v3028_v58 }
0x198e   :  { %3168 = vmatmul.f32.gmra.mxu3 %v3028_v58  ;;  %3191 = vmatmul.f32.gmra.mxu0 %v3028_v58  ;;  %v3299_v58 = vld [vmem:[#allocation37 + $0x100] sm:$0xff] }
0x198f   :  { %3344 = vmatpush.msra.mxu1 %v3273_v13  ;;  %3387 = vmatpush.msrb.mxu3 %v3308_v19 }
0x1991   :  { %3345 = vmatpush.msra.mxu1 %v3272_v29  ;;  %3388 = vmatpush.msrb.mxu3 %v3307_v18 }
0x1993   :  { %3346 = vmatpush.msra.mxu1 %v3271_v32  ;;  %3389 = vmatpush.msrb.mxu3 %v3306_v33 }
0x1995   :  { %3347 = vmatpush.msra.mxu1 %v3270_v12  ;;  %3390 = vmatpush.msrb.mxu3 %v3305_v62 }
0x1997   :  { %3348 = vmatpush.msra.mxu1 %v3269_v37  ;;  %3391 = vmatpush.msrb.mxu3 %v3304_v44 }
0x1999   :  { %3349 = vmatpush.msra.mxu1 %v3268_v20  ;;  %3392 = vmatpush.msrb.mxu3 %v3303_v41 }
0x199b   :  { %3350 = vmatpush.msra.mxu1 %v3267_v16  ;;  %3393 = vmatpush.msrb.mxu3 %v3302_v38 }
0x199d   :  { %3394 = vmatpush.msrb.mxu3 %v3301_v51 }
0x199f   :  { %3395 = vmatpush.msrb.mxu3 %v3300_v14 }
0x19a1   :  { %3396 = vmatpush.msrb.mxu3 %v3299_v58 }
0x1a02   :  { %v3120_v22 = vpop.f32.mrf.mxu1 }
0x1a03   :  { %v5530_v53 = vadd.f32 %v3120_v22, %v3095_v60  ;;  %v3189_v57 = vpop.f32.mrf.mxu0 }
0x1a04   :  { %v5532_v8 = vadd.f32 %v3189_v57, %v3098_v15 }
0x1a05   :  { %v3195_v21 = vmul.f32 %v5530_v53, %v5530_v53 }
0x1a06   :  { %v3198_v56 = vmul.f32 %v5532_v8, %v5532_v8 }
0x1a07   :  { %v3203_v59 = vmul.f32 %v3195_v21, %v5530_v53 }
0x1a08   :  { %v3206_v61 = vmul.f32 %v3198_v56, %v5532_v8  ;;  %v3143_v17 = vpop.f32.mrf.mxu2 }
0x1a09   :  { %v3211_v27 = vmul.f32 0.044715, %v3203_v59  ;;  %v5542_v26 = vadd.f32 %v3143_v17, %v3096_v23  ;;  %v3166_v0 = vpop.f32.mrf.mxu3 }
0x1a0a   :  { %v3214_v30 = vmul.f32 0.044715, %v3206_v61  ;;  %v5544_v3 = vadd.f32 %v3166_v0, %v3097_v24  ;;  %v3123_v4 = vpop.f32.mrf.mxu1 }
0x1a0b   :  { %v3219_v42 = vadd.f32 %v3211_v27, %v5530_v53  ;;  %v3196_v5 = vmul.f32 %v5542_v26, %v5542_v26  ;;  %v5549_v7 = vadd.f32 %v3123_v4, %v3095_v60  ;;  %v3192_v36 = vpop.f32.mrf.mxu0 }
0x1a0c   :  { %v3222_v50 = vadd.f32 %v3214_v30, %v5532_v8  ;;  %v3197_v10 = vmul.f32 %v5544_v3, %v5544_v3  ;;  %v5554_v47 = vadd.f32 %v3192_v36, %v3098_v15 }
0x1a0d   :  { %v3227_v13 = vmul.f32 0.7978846, %v3219_v42  ;;  %v3204_v40 = vmul.f32 %v3196_v5, %v5542_v26  ;;  %v3199_v19 = vmul.f32 %v5549_v7, %v5549_v7 }
0x1a0e   :  { %v3230_v28 = vmul.f32 0.7978846, %v3222_v50  ;;  %v3205_v29 = vmul.f32 %v3197_v10, %v5544_v3  ;;  %v3202_v31 = vmul.f32 %v5554_v47, %v5554_v47 }
0x1a0f   :  { %3887 = vtanh.f32 %v3227_v13  ;;  %v3212_v18 = vmul.f32 0.044715, %v3204_v40  ;;  %v3207_v6 = vmul.f32 %v3199_v19, %v5549_v7 }
0x1a10   :  { %3889 = vtanh.f32 %v3230_v28  ;;  %v3213_v32 = vmul.f32 0.044715, %v3205_v29  ;;  %v3210_v46 = vmul.f32 %v3202_v31, %v5554_v47  ;;  %v3146_v33 = vpop.f32.mrf.mxu2 }
0x1a11   :  { %v3220_v34 = vadd.f32 %v3212_v18, %v5542_v26  ;;  %v5565_v12 = vadd.f32 %v3146_v33, %v3096_v23  ;;  %v3169_v35 = vpop.f32.mrf.mxu3  ;;  %v3215_v62 = vmul.f32 0.044715, %v3207_v6 }
0x1a12   :  { %v3221_v63 = vadd.f32 %v3213_v32, %v5544_v3  ;;  %v3218_v37 = vmul.f32 0.044715, %v3210_v46  ;;  %v3170_v39 = vadd.f32 %v3169_v35, %v3097_v24  ;;  %v3785_v32 = vld [vmem:[#allocation38] ss:$0 sm:$0xff] }
0x1a13   :  { %v3228_v44 = vmul.f32 0.7978846, %v3220_v34  ;;  %v3200_v55 = vmul.f32 %v5565_v12, %v5565_v12  ;;  %v3223_v20 = vadd.f32 %v3215_v62, %v5549_v7 }
0x1a14   :  { %v3229_v11 = vmul.f32 0.7978846, %v3221_v63  ;;  %v3226_v41 = vadd.f32 %v3218_v37, %v5554_v47  ;;  %v3201_v45 = vmul.f32 %v3170_v39, %v3170_v39  ;;  %v4655_v37 = vmov 5.0  }
0x1a15   :  { %v3888_v16 = vpop.eup %3887  ;;  %3891 = vtanh.f32 %v3228_v44  ;;  %v3208_v25 = vmul.f32 %v3200_v55, %v5565_v12  ;;  %v3231_v38 = vmul.f32 0.7978846, %v3223_v20 }
0x1a16   :  { %v3890_v43 = vpop.eup %3889  ;;  %3893 = vtanh.f32 %v3229_v11  ;;  %v3209_v48 = vmul.f32 %v3201_v45, %v3170_v39  ;;  %v3243_v49 = vadd.f32 1.0, %v3888_v16  ;;  %v3234_v51 = vmul.f32 0.7978846, %v3226_v41 }
0x1a17   :  { %v3246_v52 = vadd.f32 1.0, %v3890_v43  ;;  %3895 = vtanh.f32 %v3231_v38  ;;  %v3216_v14 = vmul.f32 0.044715, %v3208_v25 }
0x1a18   :  { %v3251_v60 = vmul.f32 0.5, %v3243_v49  ;;  %3897 = vtanh.f32 %v3234_v51  ;;  %v3217_v9 = vmul.f32 0.044715, %v3209_v48 }
0x1a19   :  { %v3254_v15 = vmul.f32 0.5, %v3246_v52  ;;  %v3224_v58 = vadd.f32 %v3216_v14, %v5565_v12 }
0x1a1a   :  { %v3259_v22 = vmul.f32 %v3251_v60, %v5530_v53  ;;  %v3225_v57 = vadd.f32 %v3217_v9, %v3170_v39 }
0x1a1b   :  { %v3892_v21 = vpop.eup %3891  ;;  %v3262_v23 = vmul.f32 %v3254_v15, %v5532_v8  ;;  %v3232_v56 = vmul.f32 0.7978846, %v3224_v58 }
0x1a1c   :  { %v3894_v24 = vpop.eup %3893  ;;  %3351 = vmatmul.f32.vlgmr.msra.gmra.mxu1 %v3259_v22  ;;  %v3244_v59 = vadd.f32 1.0, %v3892_v21  ;;  %v3233_v61 = vmul.f32 0.7978846, %v3225_v57 }
0x1a1d   :  { %v3896_v17 = vpop.eup %3895  ;;  %3420 = vmatmul.f32.vlgmr.msrb.gmra.mxu0 %v3262_v23  ;;  %v3245_v27 = vadd.f32 1.0, %v3894_v24  ;;  %3899 = vtanh.f32 %v3232_v56 }
0x1a1e   :  { %v3898_v0 = vpop.eup %3897  ;;  %v3252_v30 = vmul.f32 0.5, %v3244_v59  ;;  %v3247_v4 = vadd.f32 1.0, %v3896_v17  ;;  %3901 = vtanh.f32 %v3233_v61 }
0x1a1f   :  { %v3253_v42 = vmul.f32 0.5, %v3245_v27  ;;  %v3250_v5 = vadd.f32 1.0, %v3898_v0  ;;  %3903 = vrcp.f32 %v4655_v37 }
0x1a20   :  { %v3260_v53 = vmul.f32 %v3252_v30, %v5542_v26  ;;  %v3255_v36 = vmul.f32 0.5, %v3247_v4 }
0x1a21   :  { %v3261_v8 = vmul.f32 %v3253_v42, %v5544_v3  ;;  %v3258_v50 = vmul.f32 0.5, %v3250_v5  ;;  %v3506_v42 = vld [vmem:[%s5662_s19 + $0x78] sm:$0xff]  ;;  %v3505_v5 = vld [vmem:[%s5662_s19 + $0x70] sm:$0xff] }
0x1a22   :  { %3374 = vmatmul.f32.vlgmr.msra.gmra.mxu2 %v3260_v53  ;;  %v3263_v10 = vmul.f32 %v3255_v36, %v5549_v7  ;;  %3511 = vmatpush.msrb.mxu1 %v3506_v42 }
0x1a23   :  { %v3900_v13 = vpop.eup %3899  ;;  %3397 = vmatmul.f32.vlgmr.msrb.gmra.mxu3 %v3261_v8  ;;  %v3266_v40 = vmul.f32 %v3258_v50, %v5554_v47 }
0x1a24   :  { %v3902_v19 = vpop.eup %3901  ;;  %3354 = vmatmul.f32.gmra.mxu1 %v3263_v10  ;;  %v3248_v28 = vadd.f32 1.0, %v3900_v13  ;;  %v3504_v13 = vld [vmem:[%s5662_s19 + $0x68] sm:$0xff] }
0x1a25   :  { %3423 = vmatmul.f32.gmra.mxu0 %v3266_v40  ;;  %v3249_v29 = vadd.f32 1.0, %v3902_v19  ;;  %v3904_v45 = vpop.eup %3903  ;;  %3512 = vmatpush.msrb.mxu1 %v3505_v5  ;;  %v3503_v40 = vld [vmem:[%s5662_s19 + $0x60] sm:$0xff]  ;;  %v3502_v19 = vld [vmem:[%s5662_s19 + $0x58] sm:$0xff] }
0x1a26   :  { %v3256_v31 = vmul.f32 0.5, %v3248_v28  ;;  %v3437_v48 = vmul.f32 5.0, %v3904_v45  ;;  %vm3441_vm9 = vweird.f32 %v3904_v45  ;;  %v3501_v28 = vld [vmem:[%s5662_s19 + $0x50] sm:$0xff] }
0x1a27   :  { %v3257_v18 = vmul.f32 0.5, %v3249_v29  ;;  %3513 = vmatpush.msrb.mxu1 %v3504_v13  ;;  %v3500_v29 = vld [vmem:[%s5662_s19 + $0x48] sm:$0xff] }
0x1a28   :  { %v3264_v26 = vmul.f32 %v3256_v31, %v5565_v12  ;;  %v3438_v60 = vsub.f32 1.0, %v3437_v48  ;;  %v3499_v31 = vld [vmem:[%s5662_s19 + $0x40] sm:$0xff] }
0x1a29   :  { %v3265_v6 = vmul.f32 %v3257_v18, %v3170_v39  ;;  %3514 = vmatpush.msrb.mxu1 %v3503_v40  ;;  %v3498_v18 = vld [vmem:[%s5662_s19 + $0x38] sm:$0xff] }
0x1a2a   :  { %3377 = vmatmul.f32.gmra.mxu2 %v3264_v26  ;;  %v3439_v22 = vmul.f32 %v3904_v45, %v3438_v60  ;;  %v3497_v26 = vld [vmem:[%s5662_s19 + $0x30] sm:$0xff] }
0x1a2b   :  { %3400 = vmatmul.f32.gmra.mxu3 %v3265_v6  ;;  %3515 = vmatpush.msrb.mxu1 %v3502_v19  ;;  %v3496_v6 = vld [vmem:[%s5662_s19 + $0x28] sm:$0xff] }
0x1a2c   :  { %v3440_v56 = vadd.f32 %v3904_v45, %v3439_v22 }
0x1a2d   :  { %3516 = vmatpush.msrb.mxu1 %v3501_v28 }
0x1a2e   :  { %v3442_v61 = vsel %vm3441_vm9, %v3904_v45, %v3440_v56 }
0x1a2f   :  { %3517 = vmatpush.msrb.mxu1 %v3500_v29 }
0x1a31   :  { %3518 = vmatpush.msrb.mxu1 %v3499_v31 }
0x1a33   :  { %3519 = vmatpush.msrb.mxu1 %v3498_v18 }
0x1a35   :  { %3520 = vmatpush.msrb.mxu1 %v3497_v26 }
0x1a37   :  { %3521 = vmatpush.msrb.mxu1 %v3496_v6 }
0x1a99   :  { %v3352_v3 = vpop.f32.mrf.mxu1 }
0x1a9a   :  { %v3353_v46 = vadd.f32 %v3785_v32, %v3352_v3  ;;  %v3421_v35 = vpop.f32.mrf.mxu0  ;;  %v3495_v3 = vld [vmem:[%s5662_s19 + $0x20] sm:$0xff] }
0x1a9b   :  { %3522 = vmatpush.msrb.mxu1 %v3495_v3 }
0x1aa1   :  { %v3355_v62 = vpop.f32.mrf.mxu1 }
0x1aa2   :  { %v3356_v44 = vadd.f32 %v3785_v32, %v3355_v62  ;;  %v3424_v25 = vpop.f32.mrf.mxu0  ;;  %v3494_v32 = vld [vmem:[%s5662_s19 + $0x18] sm:$0xff] }
0x1aa3   :  { %3523 = vmatpush.msrb.mxu1 %v3494_v32 }
0x1aa5   :  { %v3375_v7 = vpop.f32.mrf.mxu2 }
0x1aa6   :  { %v3376_v33 = vadd.f32 %v3375_v7, %v3353_v46  ;;  %v3398_v34 = vpop.f32.mrf.mxu3  ;;  %v3493_v46 = vld [vmem:[%s5662_s19 + $0x10] sm:$0xff]  ;;  %v3492_v7 = vld [vmem:[%s5662_s19 + $0x8] sm:$0xff] }
0x1aa7   :  { %3524 = vmatpush.msrb.mxu1 %v3493_v46 }
0x1aa8   :  { %v3399_v47 = vadd.f32 %v3398_v34, %v3376_v33  ;;  %v3491_v33 = vld [vmem:[%s5662_s19] sm:$0xff] }
0x1aa9   :  { %3525 = vmatpush.msrb.mxu1 %v3492_v7 }
0x1aaa   :  { %v3422_v63 = vadd.f32 %v3421_v35, %v3399_v47 }
0x1aab   :  { %3526 = vmatpush.msrb.mxu1 %v3491_v33 }
0x1aac   :  { %v3427_v55 = vadd.f32 %v3422_v63, %v5504_v2 }
0x1aad   :  { %v3378_v20 = vpop.f32.mrf.mxu2 }
0x1aae   :  { %v3429_v12 = vsel %vm607_vm3, %v3427_v55, 0.0  ;;  %v3379_v39 = vadd.f32 %v3378_v20, %v3356_v44  ;;  %v3401_v41 = vpop.f32.mrf.mxu3  ;;  %v3446_v52 = vrot.slane %v3427_v55, 5 }
0x1aaf   :  { %v3430_v11 = vrot.slane %v3429_v12, 4 }
0x1ab0   :  { %v3402_v16 = vadd.f32 %v3401_v41, %v3379_v39  ;;  %v3787_v41 = vld [vmem:[#allocation41] ss:$0 sm:$0xff] }
0x1ab1   :  { %v3431_v38 = vadd.f32 %v3430_v11, %v3429_v12  ;;  %v3786_v12 = vld [vmem:[#allocation40] ss:$0 sm:$0xff] }
0x1ab2   :  { %v3425_v43 = vadd.f32 %v3424_v25, %v3402_v16 }
0x1ab3   :  { %v3432_v51 = vrot.slane %v3431_v38, 2 }
0x1ab4   :  { %v3428_v49 = vadd.f32 %v3425_v43, %v5501_v1 }
0x1ab5   :  { %v3433_v15 = vadd.f32 %v3432_v51, %v3431_v38 }
0x1ab6   :  { %v3447_v14 = vrot.slane %v3428_v49, 5 }
0x1ab7   :  { %v3434_v21 = vrot.slane %v3433_v15, 1 }
0x1ab8   :  { %v3448_v2 = vsel %vm1184_vm13, %v3446_v52, %v3447_v14  ;;  %vm3531_vm13 = vcmask 123904  }
0x1ab9   :  { %v3450_v9 = vsel %vm607_vm3, %v3448_v2, 0.0  ;;  %v3435_v1 = vadd.f32 %v3434_v21, %v3433_v15 }
0x1aba   :  { %v3451_v58 = vrot.slane %v3450_v9, 4 }
0x1abb   :  { %v3443_v27 = vmul.f32 %v3442_v61, %v3435_v1 }
0x1abc   :  { %v3452_v57 = vadd.f32 %v3451_v58, %v3450_v9 }
0x1abe   :  { %v3453_v23 = vrot.slane %v3452_v57, 2 }
0x1ac0   :  { %v3454_v24 = vadd.f32 %v3453_v23, %v3452_v57 }
0x1ac2   :  { %v3455_v59 = vrot.slane %v3454_v24, 1 }
0x1ac4   :  { %v3456_v17 = vadd.f32 %v3455_v59, %v3454_v24 }
0x1ac6   :  { %v3457_v0 = vmul.f32 %v3456_v17, %v3442_v61 }
0x1ac8   :  { %v3458_v30 = vsel %vm605_vm2, %v3443_v27, %v3457_v0 }
0x1ac9   :  { %v3461_v4 = vsel %vm615_vm1, %v3458_v30, 0.0 }
0x1aca   :  { %3462 = vadd.xlane.f32.xlu0 %v3461_v4 }
0x1b3d   :  { %v3463_v53 = vpop.xlane.xlu0 %3462 }
0x1b3e   :  { %v3464_v36 = vmul.f32 %v3463_v53, %v4989_v54 }
0x1b40   :  { %v3465_v8 = vsub.f32 %v3458_v30, %v3464_v36 }
0x1b42   :  { %v3466_v50 = vmul.f32 %v3465_v8, %v3465_v8 }
0x1b44   :  { %v3467_v10 = vsel %vm615_vm1, %v3466_v50, 0.0 }
0x1b45   :  { %3468 = vadd.xlane.f32.xlu1 %v3467_v10 }
0x1bb8   :  { %v3469_v34 = vpop.xlane.xlu1 %3468 }
0x1bb9   :  { %v3470_v35 = vmul.f32 %v3469_v34, %v4989_v54  ;;  %v3788_v54 = vld [vmem:[%s4825_s29] ss:$0 sm:$0xff] }
0x1bbb   :  { %v3471_v47 = vadd.f32 1e-05, %v3470_v35 }
0x1bbd   :  { %3905 = vrsqrt.f32 %v3471_v47  ;;  %vm3478_vm2 = vweird.f32 %v3471_v47 }
0x1bc3   :  { %v3906_v62 = vpop.eup %3905 }
0x1bc4   :  { %v3473_v63 = vmul.f32 %v3906_v62, %v3471_v47  ;;  %vm3479_vm1 = vweird.f32 %v3906_v62 }
0x1bc5   :  { %vm3480_vm3 = vmor %vm3478_vm2, %vm3479_vm1 }
0x1bc6   :  { %v3474_v37 = vmul.f32 %v3906_v62, %v3473_v63 }
0x1bc8   :  { %v3475_v44 = vmul.f32 0.5, %v3474_v37 }
0x1bca   :  { %v3476_v55 = vsub.f32 1.5, %v3475_v44 }
0x1bcc   :  { %v3477_v20 = vmul.f32 %v3906_v62, %v3476_v55 }
0x1bce   :  { %v3481_v39 = vsel %vm3480_vm3, %v3906_v62, %v3477_v20 }
0x1bcf   :  { %v3482_v11 = vmul.f32 %v3481_v39, %v3465_v8 }
0x1bd1   :  { %v3486_v45 = vmul.f32 %v3786_v12, %v3482_v11 }
0x1bd3   :  { %v3490_v16 = vadd.f32 %v3787_v41, %v3486_v45 }
0x1bd5   :  { %3527 = vmatmul.f32.vlgmr.msrb.gmra.mxu1 %v3490_v16 }
0x1c52   :  { %v3528_v25 = vpop.f32.mrf.mxu1 }
0x1c53   :  { %v3529_v38 = vadd.f32 %v3788_v54, %v3528_v25 }
0x1c55   :  { %3532 = vst.msk [vmem:[#allocation43] sm:$0x3] %vm3531_vm13, %v3529_v38 }
0x1c56   :  { %4554 = shalt.err (!%p4551_p8)
}
0x1c57   :  { %3543 = dma.vmem_to_hbm [thread:$0]  %s3539_s9, 32, %s3541_s1, [#allocation4]  }
0x1c58   :  { %4583 = dma.done.wait [#allocation4], 32  }
0x1c59   :  { %4584 = vsyncadd [#allocation4], 4294967264 }
0x1c5a   :  { %3556 = vsyncpa [#allocation3], 1 }
0x1c5b   :  { %3557 = vsyncpa [#allocation6], 1 }
0x1c5c   :  { %3558 = vsyncpa [#allocation9], 1 }
0x1c5d   :  { %3559 = vsyncpa [#allocation12], 1 }
0x1c5e   :  { %3560 = vsyncpa [#allocation15], 1 }
0x1c5f   :  { %3561 = vsyncpa [#allocation18], 1 }
0x1c60   :  { %3562 = vsyncpa [#allocation21], 1 }
0x1c61   :  { %3563 = vsyncpa [#allocation24], 1 }
0x1c62   :  { %3564 = vsyncpa [#allocation27], 1 }
0x1c63   :  { %3565 = vsyncpa [#allocation30], 1 }
0x1c64   :  { %3566 = vsyncpa [#allocation33], 1 }
0x1c65   :  { %3567 = vsyncpa [#allocation36], 1 }
0x1c66   :  { %3568 = vsyncpa [#allocation39], 1 }
0x1c67   :  { %3569 = vsyncpa [#allocation42], 1 }
0x1c68   :  { %3570 = vsyncpa [#allocation4], 1 }

</bundles_post_ra>
